<compile_context>
chip_gen: v6e
topology: v6e:2x2x1
jax: 0.10.0
libtpu: 0.0.40
codegen_flags: <defaults>
</compile_context>

<pallas_src>
import functools

import jax
import jax.numpy as jnp
from jax import lax
from jax.experimental import pallas as pl
from jax.experimental.pallas import tpu as pltpu


def _round_up(x, m):
    return (x + m - 1) // m * m


_LANE = 128
_VMEM_SOFT_BUDGET = 40 * 1024 * 1024   # keep streamed blocks well under v7x's 64 MiB
_VMEM_LIMIT_CAP = 56 * 1024 * 1024     # never request more than fits every generation


def _vmem_estimate(tc, block_b, i_pad, h_pad):
    """Rough VMEM footprint: double-buffered streamed blocks + single-buffered weights."""
    bf16, f32 = 2, 4
    stream = tc * block_b * (2 * i_pad + h_pad) * bf16        # seq + mod_term + outs blocks
    weights = (h_pad * i_pad + (i_pad + h_pad) * 4 * h_pad) * bf16 + 4 * h_pad * f32
    scratch = 2 * block_b * h_pad * f32                       # h / c carries
    return 2 * stream + weights + scratch


def _qmog_kernel(seq_ref, mod_ref, wmod_h_ref, wih_ref, whh_ref, bgate_ref,
                 outs_ref, h_sc, c_sc, *, tc, h_pad):
    """One grid step = (batch block, time chunk). h/c carried in VMEM scratch.

    NOTE: the h/c carry is only correct because grid axis 1 (time) is the
    innermost, sequentially executed ("arbitrary") axis.  Do NOT reorder the
    grid or mark axis 1 as parallel.
    """
    t_chunk = pl.program_id(1)

    @pl.when(t_chunk == 0)
    def _():
        h_sc[...] = jnp.zeros_like(h_sc)
        c_sc[...] = jnp.zeros_like(c_sc)

    bgate = bgate_ref[...]                    # (1, 4*H_pad) f32 — tiny, safe to hoist

    def step(tt, carry):
        h, c = carry                          # (Bb, H_pad) f32
        h_b = h.astype(jnp.bfloat16)
        x_t = seq_ref[tt]                     # (Bb, I_pad) bf16
        mod_t = mod_ref[tt]                   # (Bb, I_pad) bf16  (= d*Wd + lq*Wlq + b_mod)

        # mod linear: sigmoid(h @ Wmod_h + precomputed data term).  Weights are
        # loaded from their refs inside the step (short live ranges, no spills).
        m_pre = (jnp.dot(h_b, wmod_h_ref[...], preferred_element_type=jnp.float32)
                 + mod_t.astype(jnp.float32))
        m = jax.nn.sigmoid(m_pre)             # (Bb, I_pad) f32
        x = (m * x_t.astype(jnp.float32)).astype(jnp.bfloat16)

        # LSTM gates: two independent MXU dots (no per-step concat copy).
        gates = (jnp.dot(x, wih_ref[...], preferred_element_type=jnp.float32)
                 + jnp.dot(h_b, whh_ref[...], preferred_element_type=jnp.float32)
                 + bgate)                     # (Bb, 4*H_pad) f32

        # Gate order (i, f, g, o); each gate padded to H_pad -> 128-lane-aligned slices.
        i_g = jax.nn.sigmoid(gates[:, 0:h_pad])
        f_g = jax.nn.sigmoid(gates[:, h_pad:2 * h_pad])
        g_g = jnp.tanh(gates[:, 2 * h_pad:3 * h_pad])
        o_g = jax.nn.sigmoid(gates[:, 3 * h_pad:4 * h_pad])

        c_new = f_g * c + i_g * g_g
        h_new = o_g * jnp.tanh(c_new)
        outs_ref[tt] = h_new.astype(outs_ref.dtype)   # bf16 store, lane-dense
        return (h_new, c_new)

    # Unroll small chunks fully so stores / weight loads / EUP pushes overlap
    # with the next step's MXU work; partial unroll for long chunks.
    h_f, c_f = lax.fori_loop(0, tc, step, (h_sc[...], c_sc[...]),
                             unroll=True if tc <= 32 else 8)
    h_sc[...] = h_f
    c_sc[...] = c_f


def qmogrifier_forward(seq, d_seq, lq_seq, params, *, time_chunk=32):
    """seq: (B,S,I), d_seq: (B,S,1), lq_seq: (B,S,1). Returns ((B,S,H), (B,H))."""
    f32, bf16 = jnp.float32, jnp.bfloat16
    B, S, I = seq.shape
    H = params["w_hh"].shape[1]                      # w_hh: (4H, H)

    I_pad = _round_up(I, _LANE)
    H_pad = _round_up(H, _LANE)

    # --- batch blocking: multiples of 16 (bf16 sublane pair); never an 8-row
    # fallback for large batches; >= 2 blocks for moderate batches so v7x's two
    # TensorCores (and megacore "parallel") can split the batch axis.  128 fills
    # the MXU M dim on all generations.
    B_pad = _round_up(B, 16)
    if B_pad > 256:
        block_b = 128
        B_pad = _round_up(B_pad, block_b)
    elif B_pad >= 64:
        block_b = _round_up(B_pad, 32) // 2
        B_pad = 2 * block_b
    else:
        block_b = B_pad
    n_b = B_pad // block_b

    # --- time chunking: budget streamed blocks against v7x's 64 MiB VMEM.
    tc = max(1, min(S, time_chunk))
    while tc > 8 and _vmem_estimate(tc, block_b, I_pad, H_pad) > _VMEM_SOFT_BUDGET:
        tc = max(8, tc // 2)
    S_pad = _round_up(S, tc)
    n_t = S_pad // tc
    vmem_limit = int(min(_VMEM_LIMIT_CAP,
                         max(32 * 1024 * 1024,
                             1.5 * _vmem_estimate(tc, block_b, I_pad, H_pad))))

    # ---- weights: pad to hardware tiles, per-gate lane alignment, bf16 for MXU ----
    mod_w = params["mod_w"].astype(f32)                              # (I, H+2)
    wmod_h = (jnp.zeros((H_pad, I_pad), f32)
              .at[:H, :I].set(mod_w[:, :H].T).astype(bf16))          # (H_pad, I_pad)

    def per_gate_T(w, rows_pad):
        # w: (4H, in_dim) -> (rows_pad, 4*H_pad), per-gate transpose, zero padded.
        in_dim = w.shape[1]
        out = jnp.zeros((rows_pad, 4 * H_pad), f32)
        for g in range(4):
            out = out.at[:in_dim, g * H_pad:g * H_pad + H].set(
                w[g * H:(g + 1) * H, :].T)
        return out

    wih_T = per_gate_T(params["w_ih"].astype(f32), I_pad).astype(bf16)   # (I_pad, 4*H_pad)
    whh_T = per_gate_T(params["w_hh"].astype(f32), H_pad).astype(bf16)   # (H_pad, 4*H_pad)

    bsum = (params["b_ih"] + params["b_hh"]).astype(f32)             # (4H,)
    bgate = jnp.zeros((1, 4 * H_pad), f32)
    for g in range(4):
        bgate = bgate.at[0, g * H_pad:g * H_pad + H].set(bsum[g * H:(g + 1) * H])

    # ---- precompute the h-independent part of the mod linear outside the kernel:
    # mod_term[b,t,:] = d*W[:,H] + lq*W[:,H+1] + b_mod  (removes width-1 d/lq
    # blocks and their per-step lane broadcasts from the kernel).
    mod_term = (d_seq.astype(f32) * mod_w[:, H]
                + lq_seq.astype(f32) * mod_w[:, H + 1]
                + params["mod_b"].astype(f32))                       # (B, S, I)

    # ---- inputs: pad, go time-major (S_pad, B_pad, I_pad), bf16 HBM traffic ----
    def prep(x, feat, feat_pad):
        x = jnp.pad(x.astype(f32),
                    ((0, B_pad - B), (0, S_pad - S), (0, feat_pad - feat)))
        return jnp.transpose(x, (1, 0, 2)).astype(bf16)

    seq_tm = prep(seq, I, I_pad)
    mod_tm = prep(mod_term, I, I_pad)

    kernel = functools.partial(_qmog_kernel, tc=tc, h_pad=H_pad)

    def _stream_spec(feat):
        return pl.BlockSpec((tc, block_b, feat), lambda b, t: (t, b, 0))

    def _const_spec(shape):
        # Grid-invariant weights: single-buffer (default double-buffering is waste).
        kwargs = {}
        if hasattr(pl, "Buffered"):
            kwargs["pipeline_mode"] = pl.Buffered(1)
        return pl.BlockSpec(shape, lambda b, t: (0,) * len(shape), **kwargs)

    grid_spec = pltpu.PrefetchScalarGridSpec(
        num_scalar_prefetch=0,
        grid=(n_b, n_t),                          # batch blocks (parallel) x time (serial)
        in_specs=[
            _stream_spec(I_pad),                  # seq, bf16
            _stream_spec(I_pad),                  # precomputed mod term, bf16
            _const_spec((H_pad, I_pad)),          # Wmod h-columns, bf16
            _const_spec((I_pad, 4 * H_pad)),      # Wih.T per-gate, bf16
            _const_spec((H_pad, 4 * H_pad)),      # Whh.T per-gate, bf16
            _const_spec((1, 4 * H_pad)),          # b_ih + b_hh, f32
        ],
        out_specs=pl.BlockSpec((tc, block_b, H_pad), lambda b, t: (t, b, 0)),
        scratch_shapes=[
            pltpu.VMEM((block_b, H_pad), f32),    # h carry
            pltpu.VMEM((block_b, H_pad), f32),    # c carry
        ],
    )

    outs_tm = pl.pallas_call(
        kernel,
        out_shape=jax.ShapeDtypeStruct((S_pad, B_pad, H_pad), bf16),
        grid_spec=grid_spec,
        compiler_params=pltpu.CompilerParams(
            dimension_semantics=("parallel", "arbitrary"),   # time MUST stay serial
            vmem_limit_bytes=vmem_limit),
    )(seq_tm, mod_tm, wmod_h, wih_T, whh_T, bgate)

    # The (B,S,H) layout is required by the module API; bf16 keeps the transpose cheap.
    outs = jnp.transpose(outs_tm, (1, 0, 2))[:B, :S, :H].astype(seq.dtype)
    return outs, outs[:, -1]


def qmogrifier_reference(seq, d_seq, lq_seq, params):
    """Pure-JAX reference mirroring the PyTorch forward exactly (f32)."""
    B, S, I = seq.shape
    H = params["w_hh"].shape[1]
    h = jnp.zeros((B, H), jnp.float32)
    c = jnp.zeros((B, H), jnp.float32)
    outs = []
    for t in range(S):
        gate_in = jnp.concatenate([h, d_seq[:, t], lq_seq[:, t]], axis=1)
        m = jax.nn.sigmoid(gate_in @ params["mod_w"].T + params["mod_b"])
        gates = ((m * seq[:, t]) @ params["w_ih"].T + params["b_ih"]
                 + h @ params["w_hh"].T + params["b_hh"])
        i_g, f_g, g_g, o_g = jnp.split(gates, 4, axis=1)
        c = jax.nn.sigmoid(f_g) * c + jax.nn.sigmoid(i_g) * jnp.tanh(g_g)
        h = jax.nn.sigmoid(o_g) * jnp.tanh(c)
        outs.append(h[:, None])
    return jnp.concatenate(outs, axis=1), h


def init_params(key, input_size, hidden_size):
    """Deterministic synthetic parameters with PyTorch-convention shapes."""
    ks = jax.random.split(key, 6)
    kH = 1.0 / jnp.sqrt(hidden_size)
    kL = 1.0 / jnp.sqrt(hidden_size + 2)
    u = lambda k, shape, lim: jax.random.uniform(
        k, shape, jnp.float32, minval=-lim, maxval=lim)
    return {
        "mod_w": u(ks[0], (input_size, hidden_size + 2), kL),   # Linear weight
        "mod_b": u(ks[1], (input_size,), kL),                   # Linear bias
        "w_ih": u(ks[2], (4 * hidden_size, input_size), kH),    # LSTMCell weight_ih
        "w_hh": u(ks[3], (4 * hidden_size, hidden_size), kH),   # LSTMCell weight_hh
        "b_ih": u(ks[4], (4 * hidden_size,), kH),
        "b_hh": u(ks[5], (4 * hidden_size,), kH),
    }


if __name__ == "__main__":
    B, S, I, H = 2, 8, 16, 32
    key = jax.random.PRNGKey(0)
    k_seq, k_d, k_lq, k_par = jax.random.split(key, 4)

    seq = jax.random.normal(k_seq, (B, S, I), jnp.float32)
    d_seq = jax.random.normal(k_d, (B, S, 1), jnp.float32)
    lq_seq = jax.random.normal(k_lq, (B, S, 1), jnp.float32)
    params = init_params(k_par, I, H)

    fwd = jax.jit(qmogrifier_forward)
    outs, h_last = jax.block_until_ready(fwd(seq, d_seq, lq_seq, params))

    ref_outs, ref_h = qmogrifier_reference(seq, d_seq, lq_seq, params)
    assert outs.shape == (B, S, H) and h_last.shape == (B, H)
    assert jnp.allclose(outs, ref_outs, rtol=2e-2, atol=2e-2)
    assert jnp.allclose(h_last, ref_h, rtol=2e-2, atol=2e-2)

    print("KERNEL_OK")
</pallas_src>

<mosaic_0001>
module attributes {stable_mosaic.version = 11 : i64} {
  func.func @_qmog_kernel(%arg0: i32, %arg1: i32, %arg2: memref<8x16x128xbf16, #tpu.memory_space<vmem>>, %arg3: memref<8x16x128xbf16, #tpu.memory_space<vmem>>, %arg4: memref<128x128xbf16, #tpu.memory_space<vmem>>, %arg5: memref<128x512xbf16, #tpu.memory_space<vmem>>, %arg6: memref<128x512xbf16, #tpu.memory_space<vmem>>, %arg7: memref<1x512xf32, #tpu.memory_space<vmem>>, %arg8: memref<8x16x128xbf16, #tpu.memory_space<vmem>>, %arg9: memref<16x128xf32, #tpu.memory_space<vmem>>, %arg10: memref<16x128xf32, #tpu.memory_space<vmem>>) attributes {dimension_semantics = [#tpu.dimension_semantics<parallel>, #tpu.dimension_semantics<arbitrary>], iteration_bounds = array<i64: 1, 1>, scalar_prefetch = 0 : i64, scratch_operands = 2 : i64, tpu.core_type = #tpu.core_type<tc>, window_params = [{transform_indices = @transform_0, window_bounds = array<i64: 8, 16, 128>}, {transform_indices = @transform_1, window_bounds = array<i64: 8, 16, 128>}, {pipeline_mode = #tpu.pipeline_mode<synchronous>, transform_indices = @transform_2, window_bounds = array<i64: 128, 128>}, {pipeline_mode = #tpu.pipeline_mode<synchronous>, transform_indices = @transform_3, window_bounds = array<i64: 128, 512>}, {pipeline_mode = #tpu.pipeline_mode<synchronous>, transform_indices = @transform_4, window_bounds = array<i64: 128, 512>}, {pipeline_mode = #tpu.pipeline_mode<synchronous>, transform_indices = @transform_5, window_bounds = array<i64: 1, 512>}, {transform_indices = @transform_6, window_bounds = array<i64: 8, 16, 128>}]} {
    %c0_i32 = arith.constant 0 : i32
    %0 = arith.cmpi eq, %arg1, %c0_i32 : i32
    %1 = arith.extui %0 : i1 to i32
    %c0_i32_0 = arith.constant 0 : i32
    %2 = arith.cmpi ne, %1, %c0_i32_0 : i32
    scf.if %2 {
      %cst_162 = arith.constant 0.000000e+00 : f32
      %456 = vector.broadcast %cst_162 : f32 to vector<16x128xf32>
      %c0_163 = arith.constant 0 : index
      %c0_164 = arith.constant 0 : index
      %457 = vector.load %arg9[%c0_163, %c0_164] : memref<16x128xf32, #tpu.memory_space<vmem>>, vector<16x128xf32>
      tpu.vector_store %arg9[%c0_163, %c0_164], %456 {strides = array<i32>} : memref<16x128xf32, #tpu.memory_space<vmem>>, vector<16x128xf32>,
      %cst_165 = arith.constant 0.000000e+00 : f32
      %458 = vector.broadcast %cst_165 : f32 to vector<16x128xf32>
      %c0_166 = arith.constant 0 : index
      %c0_167 = arith.constant 0 : index
      %459 = vector.load %arg10[%c0_166, %c0_167] : memref<16x128xf32, #tpu.memory_space<vmem>>, vector<16x128xf32>
      tpu.vector_store %arg10[%c0_166, %c0_167], %458 {strides = array<i32>} : memref<16x128xf32, #tpu.memory_space<vmem>>, vector<16x128xf32>,
    } else {
    }
    %c0 = arith.constant 0 : index
    %c0_1 = arith.constant 0 : index
    %3 = vector.load %arg7[%c0, %c0_1] : memref<1x512xf32, #tpu.memory_space<vmem>>, vector<1x512xf32>
    %c0_2 = arith.constant 0 : index
    %c0_3 = arith.constant 0 : index
    %4 = vector.load %arg9[%c0_2, %c0_3] : memref<16x128xf32, #tpu.memory_space<vmem>>, vector<16x128xf32>
    %c0_4 = arith.constant 0 : index
    %c0_5 = arith.constant 0 : index
    %5 = vector.load %arg10[%c0_4, %c0_5] : memref<16x128xf32, #tpu.memory_space<vmem>>, vector<16x128xf32>
    %c0_i32_6 = arith.constant 0 : i32
    %6 = arith.truncf %4 : vector<16x128xf32> to vector<16x128xbf16>
    %7 = arith.index_cast %c0_i32_6 : i32 to index
    %c0_7 = arith.constant 0 : index
    %c0_8 = arith.constant 0 : index
    %8 = vector.load %arg2[%7, %c0_7, %c0_8] : memref<8x16x128xbf16, #tpu.memory_space<vmem>>, vector<1x16x128xbf16>
    %9 = vector.shape_cast %8 : vector<1x16x128xbf16> to vector<16x128xbf16>
    %10 = arith.index_cast %c0_i32_6 : i32 to index
    %c0_9 = arith.constant 0 : index
    %c0_10 = arith.constant 0 : index
    %11 = vector.load %arg3[%10, %c0_9, %c0_10] : memref<8x16x128xbf16, #tpu.memory_space<vmem>>, vector<1x16x128xbf16>
    %12 = vector.shape_cast %11 : vector<1x16x128xbf16> to vector<16x128xbf16>
    %c0_11 = arith.constant 0 : index
    %c0_12 = arith.constant 0 : index
    %13 = vector.load %arg4[%c0_11, %c0_12] : memref<128x128xbf16, #tpu.memory_space<vmem>>, vector<128x128xbf16>
    %cst = arith.constant dense<0.000000e+00> : vector<16x128xf32>
    %14 = tpu.matmul %6, %13, %cst {dimension_numbers = #tpu.dot_dimension_numbers<[1], [0], [0], [1], [0, 0, 1, 1], [], []>} : vector<16x128xbf16>, vector<128x128xbf16>, vector<16x128xf32> -> vector<16x128xf32>
    %15 = arith.extf %12 : vector<16x128xbf16> to vector<16x128xf32>
    %16 = arith.addf %14, %15 : vector<16x128xf32>
    %17 = arith.negf %16 : vector<16x128xf32>
    %18 = math.exp %17 : vector<16x128xf32>
    %cst_13 = arith.constant 1.000000e+00 : f32
    %19 = vector.broadcast %cst_13 : f32 to vector<16x128xf32>
    %20 = arith.addf %19, %18 : vector<16x128xf32>
    %21 = arith.divf %19, %20 : vector<16x128xf32>
    %22 = arith.extf %9 : vector<16x128xbf16> to vector<16x128xf32>
    %23 = arith.mulf %21, %22 : vector<16x128xf32>
    %24 = arith.truncf %23 : vector<16x128xf32> to vector<16x128xbf16>
    %c0_14 = arith.constant 0 : index
    %c0_15 = arith.constant 0 : index
    %25 = vector.load %arg5[%c0_14, %c0_15] : memref<128x512xbf16, #tpu.memory_space<vmem>>, vector<128x512xbf16>
    %cst_16 = arith.constant dense<0.000000e+00> : vector<16x512xf32>
    %26 = tpu.matmul %24, %25, %cst_16 {dimension_numbers = #tpu.dot_dimension_numbers<[1], [0], [0], [1], [0, 0, 1, 1], [], []>} : vector<16x128xbf16>, vector<128x512xbf16>, vector<16x512xf32> -> vector<16x512xf32>
    %c0_17 = arith.constant 0 : index
    %c0_18 = arith.constant 0 : index
    %27 = vector.load %arg6[%c0_17, %c0_18] : memref<128x512xbf16, #tpu.memory_space<vmem>>, vector<128x512xbf16>
    %cst_19 = arith.constant dense<0.000000e+00> : vector<16x512xf32>
    %28 = tpu.matmul %6, %27, %cst_19 {dimension_numbers = #tpu.dot_dimension_numbers<[1], [0], [0], [1], [0, 0, 1, 1], [], []>} : vector<16x128xbf16>, vector<128x512xbf16>, vector<16x512xf32> -> vector<16x512xf32>
    %29 = arith.addf %26, %28 : vector<16x512xf32>
    %30 = vector.broadcast %3 : vector<1x512xf32> to vector<16x512xf32>
    %31 = arith.addf %29, %30 : vector<16x512xf32>
    %32 = vector.extract_strided_slice %31 {offsets = [0, 0], sizes = [16, 128], strides = [1, 1]} : vector<16x512xf32> to vector<16x128xf32>
    %33 = arith.negf %32 : vector<16x128xf32>
    %34 = math.exp %33 : vector<16x128xf32>
    %cst_20 = arith.constant 1.000000e+00 : f32
    %35 = vector.broadcast %cst_20 : f32 to vector<16x128xf32>
    %36 = arith.addf %35, %34 : vector<16x128xf32>
    %37 = arith.divf %35, %36 : vector<16x128xf32>
    %38 = vector.extract_strided_slice %31 {offsets = [0, 128], sizes = [16, 128], strides = [1, 1]} : vector<16x512xf32> to vector<16x128xf32>
    %39 = arith.negf %38 : vector<16x128xf32>
    %40 = math.exp %39 : vector<16x128xf32>
    %cst_21 = arith.constant 1.000000e+00 : f32
    %41 = vector.broadcast %cst_21 : f32 to vector<16x128xf32>
    %42 = arith.addf %41, %40 : vector<16x128xf32>
    %43 = arith.divf %41, %42 : vector<16x128xf32>
    %44 = vector.extract_strided_slice %31 {offsets = [0, 256], sizes = [16, 128], strides = [1, 1]} : vector<16x512xf32> to vector<16x128xf32>
    %45 = math.tanh %44 : vector<16x128xf32>
    %46 = vector.extract_strided_slice %31 {offsets = [0, 384], sizes = [16, 128], strides = [1, 1]} : vector<16x512xf32> to vector<16x128xf32>
    %47 = arith.negf %46 : vector<16x128xf32>
    %48 = math.exp %47 : vector<16x128xf32>
    %cst_22 = arith.constant 1.000000e+00 : f32
    %49 = vector.broadcast %cst_22 : f32 to vector<16x128xf32>
    %50 = arith.addf %49, %48 : vector<16x128xf32>
    %51 = arith.divf %49, %50 : vector<16x128xf32>
    %52 = arith.mulf %43, %5 : vector<16x128xf32>
    %53 = arith.mulf %37, %45 : vector<16x128xf32>
    %54 = arith.addf %52, %53 : vector<16x128xf32>
    %55 = math.tanh %54 : vector<16x128xf32>
    %56 = arith.mulf %51, %55 : vector<16x128xf32>
    %57 = arith.truncf %56 : vector<16x128xf32> to vector<16x128xbf16>
    %58 = arith.index_cast %c0_i32_6 : i32 to index
    %c0_23 = arith.constant 0 : index
    %c0_24 = arith.constant 0 : index
    %59 = vector.load %arg8[%58, %c0_23, %c0_24] : memref<8x16x128xbf16, #tpu.memory_space<vmem>>, vector<1x16x128xbf16>
    %60 = vector.shape_cast %59 : vector<1x16x128xbf16> to vector<16x128xbf16>
    %61 = vector.shape_cast %57 : vector<16x128xbf16> to vector<1x16x128xbf16>
    tpu.vector_store %arg8[%58, %c0_23, %c0_24], %61 {strides = array<i32>} : memref<8x16x128xbf16, #tpu.memory_space<vmem>>, vector<1x16x128xbf16>,
    %c1_i32 = arith.constant 1 : i32
    %62 = arith.truncf %56 : vector<16x128xf32> to vector<16x128xbf16>
    %63 = arith.index_cast %c1_i32 : i32 to index
    %c0_25 = arith.constant 0 : index
    %c0_26 = arith.constant 0 : index
    %64 = vector.load %arg2[%63, %c0_25, %c0_26] : memref<8x16x128xbf16, #tpu.memory_space<vmem>>, vector<1x16x128xbf16>
    %65 = vector.shape_cast %64 : vector<1x16x128xbf16> to vector<16x128xbf16>
    %66 = arith.index_cast %c1_i32 : i32 to index
    %c0_27 = arith.constant 0 : index
    %c0_28 = arith.constant 0 : index
    %67 = vector.load %arg3[%66, %c0_27, %c0_28] : memref<8x16x128xbf16, #tpu.memory_space<vmem>>, vector<1x16x128xbf16>
    %68 = vector.shape_cast %67 : vector<1x16x128xbf16> to vector<16x128xbf16>
    %c0_29 = arith.constant 0 : index
    %c0_30 = arith.constant 0 : index
    %69 = vector.load %arg4[%c0_29, %c0_30] : memref<128x128xbf16, #tpu.memory_space<vmem>>, vector<128x128xbf16>
    %cst_31 = arith.constant dense<0.000000e+00> : vector<16x128xf32>
    %70 = tpu.matmul %62, %69, %cst_31 {dimension_numbers = #tpu.dot_dimension_numbers<[1], [0], [0], [1], [0, 0, 1, 1], [], []>} : vector<16x128xbf16>, vector<128x128xbf16>, vector<16x128xf32> -> vector<16x128xf32>
    %71 = arith.extf %68 : vector<16x128xbf16> to vector<16x128xf32>
    %72 = arith.addf %70, %71 : vector<16x128xf32>
    %73 = arith.negf %72 : vector<16x128xf32>
    %74 = math.exp %73 : vector<16x128xf32>
    %cst_32 = arith.constant 1.000000e+00 : f32
    %75 = vector.broadcast %cst_32 : f32 to vector<16x128xf32>
    %76 = arith.addf %75, %74 : vector<16x128xf32>
    %77 = arith.divf %75, %76 : vector<16x128xf32>
    %78 = arith.extf %65 : vector<16x128xbf16> to vector<16x128xf32>
    %79 = arith.mulf %77, %78 : vector<16x128xf32>
    %80 = arith.truncf %79 : vector<16x128xf32> to vector<16x128xbf16>
    %c0_33 = arith.constant 0 : index
    %c0_34 = arith.constant 0 : index
    %81 = vector.load %arg5[%c0_33, %c0_34] : memref<128x512xbf16, #tpu.memory_space<vmem>>, vector<128x512xbf16>
    %cst_35 = arith.constant dense<0.000000e+00> : vector<16x512xf32>
    %82 = tpu.matmul %80, %81, %cst_35 {dimension_numbers = #tpu.dot_dimension_numbers<[1], [0], [0], [1], [0, 0, 1, 1], [], []>} : vector<16x128xbf16>, vector<128x512xbf16>, vector<16x512xf32> -> vector<16x512xf32>
    %c0_36 = arith.constant 0 : index
    %c0_37 = arith.constant 0 : index
    %83 = vector.load %arg6[%c0_36, %c0_37] : memref<128x512xbf16, #tpu.memory_space<vmem>>, vector<128x512xbf16>
    %cst_38 = arith.constant dense<0.000000e+00> : vector<16x512xf32>
    %84 = tpu.matmul %62, %83, %cst_38 {dimension_numbers = #tpu.dot_dimension_numbers<[1], [0], [0], [1], [0, 0, 1, 1], [], []>} : vector<16x128xbf16>, vector<128x512xbf16>, vector<16x512xf32> -> vector<16x512xf32>
    %85 = arith.addf %82, %84 : vector<16x512xf32>
    %86 = vector.broadcast %3 : vector<1x512xf32> to vector<16x512xf32>
    %87 = arith.addf %85, %86 : vector<16x512xf32>
    %88 = vector.extract_strided_slice %87 {offsets = [0, 0], sizes = [16, 128], strides = [1, 1]} : vector<16x512xf32> to vector<16x128xf32>
    %89 = arith.negf %88 : vector<16x128xf32>
    %90 = math.exp %89 : vector<16x128xf32>
    %cst_39 = arith.constant 1.000000e+00 : f32
    %91 = vector.broadcast %cst_39 : f32 to vector<16x128xf32>
    %92 = arith.addf %91, %90 : vector<16x128xf32>
    %93 = arith.divf %91, %92 : vector<16x128xf32>
    %94 = vector.extract_strided_slice %87 {offsets = [0, 128], sizes = [16, 128], strides = [1, 1]} : vector<16x512xf32> to vector<16x128xf32>
    %95 = arith.negf %94 : vector<16x128xf32>
    %96 = math.exp %95 : vector<16x128xf32>
    %cst_40 = arith.constant 1.000000e+00 : f32
    %97 = vector.broadcast %cst_40 : f32 to vector<16x128xf32>
    %98 = arith.addf %97, %96 : vector<16x128xf32>
    %99 = arith.divf %97, %98 : vector<16x128xf32>
    %100 = vector.extract_strided_slice %87 {offsets = [0, 256], sizes = [16, 128], strides = [1, 1]} : vector<16x512xf32> to vector<16x128xf32>
    %101 = math.tanh %100 : vector<16x128xf32>
    %102 = vector.extract_strided_slice %87 {offsets = [0, 384], sizes = [16, 128], strides = [1, 1]} : vector<16x512xf32> to vector<16x128xf32>
    %103 = arith.negf %102 : vector<16x128xf32>
    %104 = math.exp %103 : vector<16x128xf32>
    %cst_41 = arith.constant 1.000000e+00 : f32
    %105 = vector.broadcast %cst_41 : f32 to vector<16x128xf32>
    %106 = arith.addf %105, %104 : vector<16x128xf32>
    %107 = arith.divf %105, %106 : vector<16x128xf32>
    %108 = arith.mulf %99, %54 : vector<16x128xf32>
    %109 = arith.mulf %93, %101 : vector<16x128xf32>
    %110 = arith.addf %108, %109 : vector<16x128xf32>
    %111 = math.tanh %110 : vector<16x128xf32>
    %112 = arith.mulf %107, %111 : vector<16x128xf32>
    %113 = arith.truncf %112 : vector<16x128xf32> to vector<16x128xbf16>
    %114 = arith.index_cast %c1_i32 : i32 to index
    %c0_42 = arith.constant 0 : index
    %c0_43 = arith.constant 0 : index
    %115 = vector.load %arg8[%114, %c0_42, %c0_43] : memref<8x16x128xbf16, #tpu.memory_space<vmem>>, vector<1x16x128xbf16>
    %116 = vector.shape_cast %115 : vector<1x16x128xbf16> to vector<16x128xbf16>
    %117 = vector.shape_cast %113 : vector<16x128xbf16> to vector<1x16x128xbf16>
    tpu.vector_store %arg8[%114, %c0_42, %c0_43], %117 {strides = array<i32>} : memref<8x16x128xbf16, #tpu.memory_space<vmem>>, vector<1x16x128xbf16>,
    %c2_i32 = arith.constant 2 : i32
    %118 = arith.truncf %112 : vector<16x128xf32> to vector<16x128xbf16>
    %119 = arith.index_cast %c2_i32 : i32 to index
    %c0_44 = arith.constant 0 : index
    %c0_45 = arith.constant 0 : index
    %120 = vector.load %arg2[%119, %c0_44, %c0_45] : memref<8x16x128xbf16, #tpu.memory_space<vmem>>, vector<1x16x128xbf16>
    %121 = vector.shape_cast %120 : vector<1x16x128xbf16> to vector<16x128xbf16>
    %122 = arith.index_cast %c2_i32 : i32 to index
    %c0_46 = arith.constant 0 : index
    %c0_47 = arith.constant 0 : index
    %123 = vector.load %arg3[%122, %c0_46, %c0_47] : memref<8x16x128xbf16, #tpu.memory_space<vmem>>, vector<1x16x128xbf16>
    %124 = vector.shape_cast %123 : vector<1x16x128xbf16> to vector<16x128xbf16>
    %c0_48 = arith.constant 0 : index
    %c0_49 = arith.constant 0 : index
    %125 = vector.load %arg4[%c0_48, %c0_49] : memref<128x128xbf16, #tpu.memory_space<vmem>>, vector<128x128xbf16>
    %cst_50 = arith.constant dense<0.000000e+00> : vector<16x128xf32>
    %126 = tpu.matmul %118, %125, %cst_50 {dimension_numbers = #tpu.dot_dimension_numbers<[1], [0], [0], [1], [0, 0, 1, 1], [], []>} : vector<16x128xbf16>, vector<128x128xbf16>, vector<16x128xf32> -> vector<16x128xf32>
    %127 = arith.extf %124 : vector<16x128xbf16> to vector<16x128xf32>
    %128 = arith.addf %126, %127 : vector<16x128xf32>
    %129 = arith.negf %128 : vector<16x128xf32>
    %130 = math.exp %129 : vector<16x128xf32>
    %cst_51 = arith.constant 1.000000e+00 : f32
    %131 = vector.broadcast %cst_51 : f32 to vector<16x128xf32>
    %132 = arith.addf %131, %130 : vector<16x128xf32>
    %133 = arith.divf %131, %132 : vector<16x128xf32>
    %134 = arith.extf %121 : vector<16x128xbf16> to vector<16x128xf32>
    %135 = arith.mulf %133, %134 : vector<16x128xf32>
    %136 = arith.truncf %135 : vector<16x128xf32> to vector<16x128xbf16>
    %c0_52 = arith.constant 0 : index
    %c0_53 = arith.constant 0 : index
    %137 = vector.load %arg5[%c0_52, %c0_53] : memref<128x512xbf16, #tpu.memory_space<vmem>>, vector<128x512xbf16>
    %cst_54 = arith.constant dense<0.000000e+00> : vector<16x512xf32>
    %138 = tpu.matmul %136, %137, %cst_54 {dimension_numbers = #tpu.dot_dimension_numbers<[1], [0], [0], [1], [0, 0, 1, 1], [], []>} : vector<16x128xbf16>, vector<128x512xbf16>, vector<16x512xf32> -> vector<16x512xf32>
    %c0_55 = arith.constant 0 : index
    %c0_56 = arith.constant 0 : index
    %139 = vector.load %arg6[%c0_55, %c0_56] : memref<128x512xbf16, #tpu.memory_space<vmem>>, vector<128x512xbf16>
    %cst_57 = arith.constant dense<0.000000e+00> : vector<16x512xf32>
    %140 = tpu.matmul %118, %139, %cst_57 {dimension_numbers = #tpu.dot_dimension_numbers<[1], [0], [0], [1], [0, 0, 1, 1], [], []>} : vector<16x128xbf16>, vector<128x512xbf16>, vector<16x512xf32> -> vector<16x512xf32>
    %141 = arith.addf %138, %140 : vector<16x512xf32>
    %142 = vector.broadcast %3 : vector<1x512xf32> to vector<16x512xf32>
    %143 = arith.addf %141, %142 : vector<16x512xf32>
    %144 = vector.extract_strided_slice %143 {offsets = [0, 0], sizes = [16, 128], strides = [1, 1]} : vector<16x512xf32> to vector<16x128xf32>
    %145 = arith.negf %144 : vector<16x128xf32>
    %146 = math.exp %145 : vector<16x128xf32>
    %cst_58 = arith.constant 1.000000e+00 : f32
    %147 = vector.broadcast %cst_58 : f32 to vector<16x128xf32>
    %148 = arith.addf %147, %146 : vector<16x128xf32>
    %149 = arith.divf %147, %148 : vector<16x128xf32>
    %150 = vector.extract_strided_slice %143 {offsets = [0, 128], sizes = [16, 128], strides = [1, 1]} : vector<16x512xf32> to vector<16x128xf32>
    %151 = arith.negf %150 : vector<16x128xf32>
    %152 = math.exp %151 : vector<16x128xf32>
    %cst_59 = arith.constant 1.000000e+00 : f32
    %153 = vector.broadcast %cst_59 : f32 to vector<16x128xf32>
    %154 = arith.addf %153, %152 : vector<16x128xf32>
    %155 = arith.divf %153, %154 : vector<16x128xf32>
    %156 = vector.extract_strided_slice %143 {offsets = [0, 256], sizes = [16, 128], strides = [1, 1]} : vector<16x512xf32> to vector<16x128xf32>
    %157 = math.tanh %156 : vector<16x128xf32>
    %158 = vector.extract_strided_slice %143 {offsets = [0, 384], sizes = [16, 128], strides = [1, 1]} : vector<16x512xf32> to vector<16x128xf32>
    %159 = arith.negf %158 : vector<16x128xf32>
    %160 = math.exp %159 : vector<16x128xf32>
    %cst_60 = arith.constant 1.000000e+00 : f32
    %161 = vector.broadcast %cst_60 : f32 to vector<16x128xf32>
    %162 = arith.addf %161, %160 : vector<16x128xf32>
    %163 = arith.divf %161, %162 : vector<16x128xf32>
    %164 = arith.mulf %155, %110 : vector<16x128xf32>
    %165 = arith.mulf %149, %157 : vector<16x128xf32>
    %166 = arith.addf %164, %165 : vector<16x128xf32>
    %167 = math.tanh %166 : vector<16x128xf32>
    %168 = arith.mulf %163, %167 : vector<16x128xf32>
    %169 = arith.truncf %168 : vector<16x128xf32> to vector<16x128xbf16>
    %170 = arith.index_cast %c2_i32 : i32 to index
    %c0_61 = arith.constant 0 : index
    %c0_62 = arith.constant 0 : index
    %171 = vector.load %arg8[%170, %c0_61, %c0_62] : memref<8x16x128xbf16, #tpu.memory_space<vmem>>, vector<1x16x128xbf16>
    %172 = vector.shape_cast %171 : vector<1x16x128xbf16> to vector<16x128xbf16>
    %173 = vector.shape_cast %169 : vector<16x128xbf16> to vector<1x16x128xbf16>
    tpu.vector_store %arg8[%170, %c0_61, %c0_62], %173 {strides = array<i32>} : memref<8x16x128xbf16, #tpu.memory_space<vmem>>, vector<1x16x128xbf16>,
    %c3_i32 = arith.constant 3 : i32
    %174 = arith.truncf %168 : vector<16x128xf32> to vector<16x128xbf16>
    %175 = arith.index_cast %c3_i32 : i32 to index
    %c0_63 = arith.constant 0 : index
    %c0_64 = arith.constant 0 : index
    %176 = vector.load %arg2[%175, %c0_63, %c0_64] : memref<8x16x128xbf16, #tpu.memory_space<vmem>>, vector<1x16x128xbf16>
    %177 = vector.shape_cast %176 : vector<1x16x128xbf16> to vector<16x128xbf16>
    %178 = arith.index_cast %c3_i32 : i32 to index
    %c0_65 = arith.constant 0 : index
    %c0_66 = arith.constant 0 : index
    %179 = vector.load %arg3[%178, %c0_65, %c0_66] : memref<8x16x128xbf16, #tpu.memory_space<vmem>>, vector<1x16x128xbf16>
    %180 = vector.shape_cast %179 : vector<1x16x128xbf16> to vector<16x128xbf16>
    %c0_67 = arith.constant 0 : index
    %c0_68 = arith.constant 0 : index
    %181 = vector.load %arg4[%c0_67, %c0_68] : memref<128x128xbf16, #tpu.memory_space<vmem>>, vector<128x128xbf16>
    %cst_69 = arith.constant dense<0.000000e+00> : vector<16x128xf32>
    %182 = tpu.matmul %174, %181, %cst_69 {dimension_numbers = #tpu.dot_dimension_numbers<[1], [0], [0], [1], [0, 0, 1, 1], [], []>} : vector<16x128xbf16>, vector<128x128xbf16>, vector<16x128xf32> -> vector<16x128xf32>
    %183 = arith.extf %180 : vector<16x128xbf16> to vector<16x128xf32>
    %184 = arith.addf %182, %183 : vector<16x128xf32>
    %185 = arith.negf %184 : vector<16x128xf32>
    %186 = math.exp %185 : vector<16x128xf32>
    %cst_70 = arith.constant 1.000000e+00 : f32
    %187 = vector.broadcast %cst_70 : f32 to vector<16x128xf32>
    %188 = arith.addf %187, %186 : vector<16x128xf32>
    %189 = arith.divf %187, %188 : vector<16x128xf32>
    %190 = arith.extf %177 : vector<16x128xbf16> to vector<16x128xf32>
    %191 = arith.mulf %189, %190 : vector<16x128xf32>
    %192 = arith.truncf %191 : vector<16x128xf32> to vector<16x128xbf16>
    %c0_71 = arith.constant 0 : index
    %c0_72 = arith.constant 0 : index
    %193 = vector.load %arg5[%c0_71, %c0_72] : memref<128x512xbf16, #tpu.memory_space<vmem>>, vector<128x512xbf16>
    %cst_73 = arith.constant dense<0.000000e+00> : vector<16x512xf32>
    %194 = tpu.matmul %192, %193, %cst_73 {dimension_numbers = #tpu.dot_dimension_numbers<[1], [0], [0], [1], [0, 0, 1, 1], [], []>} : vector<16x128xbf16>, vector<128x512xbf16>, vector<16x512xf32> -> vector<16x512xf32>
    %c0_74 = arith.constant 0 : index
    %c0_75 = arith.constant 0 : index
    %195 = vector.load %arg6[%c0_74, %c0_75] : memref<128x512xbf16, #tpu.memory_space<vmem>>, vector<128x512xbf16>
    %cst_76 = arith.constant dense<0.000000e+00> : vector<16x512xf32>
    %196 = tpu.matmul %174, %195, %cst_76 {dimension_numbers = #tpu.dot_dimension_numbers<[1], [0], [0], [1], [0, 0, 1, 1], [], []>} : vector<16x128xbf16>, vector<128x512xbf16>, vector<16x512xf32> -> vector<16x512xf32>
    %197 = arith.addf %194, %196 : vector<16x512xf32>
    %198 = vector.broadcast %3 : vector<1x512xf32> to vector<16x512xf32>
    %199 = arith.addf %197, %198 : vector<16x512xf32>
    %200 = vector.extract_strided_slice %199 {offsets = [0, 0], sizes = [16, 128], strides = [1, 1]} : vector<16x512xf32> to vector<16x128xf32>
    %201 = arith.negf %200 : vector<16x128xf32>
    %202 = math.exp %201 : vector<16x128xf32>
    %cst_77 = arith.constant 1.000000e+00 : f32
    %203 = vector.broadcast %cst_77 : f32 to vector<16x128xf32>
    %204 = arith.addf %203, %202 : vector<16x128xf32>
    %205 = arith.divf %203, %204 : vector<16x128xf32>
    %206 = vector.extract_strided_slice %199 {offsets = [0, 128], sizes = [16, 128], strides = [1, 1]} : vector<16x512xf32> to vector<16x128xf32>
    %207 = arith.negf %206 : vector<16x128xf32>
    %208 = math.exp %207 : vector<16x128xf32>
    %cst_78 = arith.constant 1.000000e+00 : f32
    %209 = vector.broadcast %cst_78 : f32 to vector<16x128xf32>
    %210 = arith.addf %209, %208 : vector<16x128xf32>
    %211 = arith.divf %209, %210 : vector<16x128xf32>
    %212 = vector.extract_strided_slice %199 {offsets = [0, 256], sizes = [16, 128], strides = [1, 1]} : vector<16x512xf32> to vector<16x128xf32>
    %213 = math.tanh %212 : vector<16x128xf32>
    %214 = vector.extract_strided_slice %199 {offsets = [0, 384], sizes = [16, 128], strides = [1, 1]} : vector<16x512xf32> to vector<16x128xf32>
    %215 = arith.negf %214 : vector<16x128xf32>
    %216 = math.exp %215 : vector<16x128xf32>
    %cst_79 = arith.constant 1.000000e+00 : f32
    %217 = vector.broadcast %cst_79 : f32 to vector<16x128xf32>
    %218 = arith.addf %217, %216 : vector<16x128xf32>
    %219 = arith.divf %217, %218 : vector<16x128xf32>
    %220 = arith.mulf %211, %166 : vector<16x128xf32>
    %221 = arith.mulf %205, %213 : vector<16x128xf32>
    %222 = arith.addf %220, %221 : vector<16x128xf32>
    %223 = math.tanh %222 : vector<16x128xf32>
    %224 = arith.mulf %219, %223 : vector<16x128xf32>
    %225 = arith.truncf %224 : vector<16x128xf32> to vector<16x128xbf16>
    %226 = arith.index_cast %c3_i32 : i32 to index
    %c0_80 = arith.constant 0 : index
    %c0_81 = arith.constant 0 : index
    %227 = vector.load %arg8[%226, %c0_80, %c0_81] : memref<8x16x128xbf16, #tpu.memory_space<vmem>>, vector<1x16x128xbf16>
    %228 = vector.shape_cast %227 : vector<1x16x128xbf16> to vector<16x128xbf16>
    %229 = vector.shape_cast %225 : vector<16x128xbf16> to vector<1x16x128xbf16>
    tpu.vector_store %arg8[%226, %c0_80, %c0_81], %229 {strides = array<i32>} : memref<8x16x128xbf16, #tpu.memory_space<vmem>>, vector<1x16x128xbf16>,
    %c4_i32 = arith.constant 4 : i32
    %230 = arith.truncf %224 : vector<16x128xf32> to vector<16x128xbf16>
    %231 = arith.index_cast %c4_i32 : i32 to index
    %c0_82 = arith.constant 0 : index
    %c0_83 = arith.constant 0 : index
    %232 = vector.load %arg2[%231, %c0_82, %c0_83] : memref<8x16x128xbf16, #tpu.memory_space<vmem>>, vector<1x16x128xbf16>
    %233 = vector.shape_cast %232 : vector<1x16x128xbf16> to vector<16x128xbf16>
    %234 = arith.index_cast %c4_i32 : i32 to index
    %c0_84 = arith.constant 0 : index
    %c0_85 = arith.constant 0 : index
    %235 = vector.load %arg3[%234, %c0_84, %c0_85] : memref<8x16x128xbf16, #tpu.memory_space<vmem>>, vector<1x16x128xbf16>
    %236 = vector.shape_cast %235 : vector<1x16x128xbf16> to vector<16x128xbf16>
    %c0_86 = arith.constant 0 : index
    %c0_87 = arith.constant 0 : index
    %237 = vector.load %arg4[%c0_86, %c0_87] : memref<128x128xbf16, #tpu.memory_space<vmem>>, vector<128x128xbf16>
    %cst_88 = arith.constant dense<0.000000e+00> : vector<16x128xf32>
    %238 = tpu.matmul %230, %237, %cst_88 {dimension_numbers = #tpu.dot_dimension_numbers<[1], [0], [0], [1], [0, 0, 1, 1], [], []>} : vector<16x128xbf16>, vector<128x128xbf16>, vector<16x128xf32> -> vector<16x128xf32>
    %239 = arith.extf %236 : vector<16x128xbf16> to vector<16x128xf32>
    %240 = arith.addf %238, %239 : vector<16x128xf32>
    %241 = arith.negf %240 : vector<16x128xf32>
    %242 = math.exp %241 : vector<16x128xf32>
    %cst_89 = arith.constant 1.000000e+00 : f32
    %243 = vector.broadcast %cst_89 : f32 to vector<16x128xf32>
    %244 = arith.addf %243, %242 : vector<16x128xf32>
    %245 = arith.divf %243, %244 : vector<16x128xf32>
    %246 = arith.extf %233 : vector<16x128xbf16> to vector<16x128xf32>
    %247 = arith.mulf %245, %246 : vector<16x128xf32>
    %248 = arith.truncf %247 : vector<16x128xf32> to vector<16x128xbf16>
    %c0_90 = arith.constant 0 : index
    %c0_91 = arith.constant 0 : index
    %249 = vector.load %arg5[%c0_90, %c0_91] : memref<128x512xbf16, #tpu.memory_space<vmem>>, vector<128x512xbf16>
    %cst_92 = arith.constant dense<0.000000e+00> : vector<16x512xf32>
    %250 = tpu.matmul %248, %249, %cst_92 {dimension_numbers = #tpu.dot_dimension_numbers<[1], [0], [0], [1], [0, 0, 1, 1], [], []>} : vector<16x128xbf16>, vector<128x512xbf16>, vector<16x512xf32> -> vector<16x512xf32>
    %c0_93 = arith.constant 0 : index
    %c0_94 = arith.constant 0 : index
    %251 = vector.load %arg6[%c0_93, %c0_94] : memref<128x512xbf16, #tpu.memory_space<vmem>>, vector<128x512xbf16>
    %cst_95 = arith.constant dense<0.000000e+00> : vector<16x512xf32>
    %252 = tpu.matmul %230, %251, %cst_95 {dimension_numbers = #tpu.dot_dimension_numbers<[1], [0], [0], [1], [0, 0, 1, 1], [], []>} : vector<16x128xbf16>, vector<128x512xbf16>, vector<16x512xf32> -> vector<16x512xf32>
    %253 = arith.addf %250, %252 : vector<16x512xf32>
    %254 = vector.broadcast %3 : vector<1x512xf32> to vector<16x512xf32>
    %255 = arith.addf %253, %254 : vector<16x512xf32>
    %256 = vector.extract_strided_slice %255 {offsets = [0, 0], sizes = [16, 128], strides = [1, 1]} : vector<16x512xf32> to vector<16x128xf32>
    %257 = arith.negf %256 : vector<16x128xf32>
    %258 = math.exp %257 : vector<16x128xf32>
    %cst_96 = arith.constant 1.000000e+00 : f32
    %259 = vector.broadcast %cst_96 : f32 to vector<16x128xf32>
    %260 = arith.addf %259, %258 : vector<16x128xf32>
    %261 = arith.divf %259, %260 : vector<16x128xf32>
    %262 = vector.extract_strided_slice %255 {offsets = [0, 128], sizes = [16, 128], strides = [1, 1]} : vector<16x512xf32> to vector<16x128xf32>
    %263 = arith.negf %262 : vector<16x128xf32>
    %264 = math.exp %263 : vector<16x128xf32>
    %cst_97 = arith.constant 1.000000e+00 : f32
    %265 = vector.broadcast %cst_97 : f32 to vector<16x128xf32>
    %266 = arith.addf %265, %264 : vector<16x128xf32>
    %267 = arith.divf %265, %266 : vector<16x128xf32>
    %268 = vector.extract_strided_slice %255 {offsets = [0, 256], sizes = [16, 128], strides = [1, 1]} : vector<16x512xf32> to vector<16x128xf32>
    %269 = math.tanh %268 : vector<16x128xf32>
    %270 = vector.extract_strided_slice %255 {offsets = [0, 384], sizes = [16, 128], strides = [1, 1]} : vector<16x512xf32> to vector<16x128xf32>
    %271 = arith.negf %270 : vector<16x128xf32>
    %272 = math.exp %271 : vector<16x128xf32>
    %cst_98 = arith.constant 1.000000e+00 : f32
    %273 = vector.broadcast %cst_98 : f32 to vector<16x128xf32>
    %274 = arith.addf %273, %272 : vector<16x128xf32>
    %275 = arith.divf %273, %274 : vector<16x128xf32>
    %276 = arith.mulf %267, %222 : vector<16x128xf32>
    %277 = arith.mulf %261, %269 : vector<16x128xf32>
    %278 = arith.addf %276, %277 : vector<16x128xf32>
    %279 = math.tanh %278 : vector<16x128xf32>
    %280 = arith.mulf %275, %279 : vector<16x128xf32>
    %281 = arith.truncf %280 : vector<16x128xf32> to vector<16x128xbf16>
    %282 = arith.index_cast %c4_i32 : i32 to index
    %c0_99 = arith.constant 0 : index
    %c0_100 = arith.constant 0 : index
    %283 = vector.load %arg8[%282, %c0_99, %c0_100] : memref<8x16x128xbf16, #tpu.memory_space<vmem>>, vector<1x16x128xbf16>
    %284 = vector.shape_cast %283 : vector<1x16x128xbf16> to vector<16x128xbf16>
    %285 = vector.shape_cast %281 : vector<16x128xbf16> to vector<1x16x128xbf16>
    tpu.vector_store %arg8[%282, %c0_99, %c0_100], %285 {strides = array<i32>} : memref<8x16x128xbf16, #tpu.memory_space<vmem>>, vector<1x16x128xbf16>,
    %c5_i32 = arith.constant 5 : i32
    %286 = arith.truncf %280 : vector<16x128xf32> to vector<16x128xbf16>
    %287 = arith.index_cast %c5_i32 : i32 to index
    %c0_101 = arith.constant 0 : index
    %c0_102 = arith.constant 0 : index
    %288 = vector.load %arg2[%287, %c0_101, %c0_102] : memref<8x16x128xbf16, #tpu.memory_space<vmem>>, vector<1x16x128xbf16>
    %289 = vector.shape_cast %288 : vector<1x16x128xbf16> to vector<16x128xbf16>
    %290 = arith.index_cast %c5_i32 : i32 to index
    %c0_103 = arith.constant 0 : index
    %c0_104 = arith.constant 0 : index
    %291 = vector.load %arg3[%290, %c0_103, %c0_104] : memref<8x16x128xbf16, #tpu.memory_space<vmem>>, vector<1x16x128xbf16>
    %292 = vector.shape_cast %291 : vector<1x16x128xbf16> to vector<16x128xbf16>
    %c0_105 = arith.constant 0 : index
    %c0_106 = arith.constant 0 : index
    %293 = vector.load %arg4[%c0_105, %c0_106] : memref<128x128xbf16, #tpu.memory_space<vmem>>, vector<128x128xbf16>
    %cst_107 = arith.constant dense<0.000000e+00> : vector<16x128xf32>
    %294 = tpu.matmul %286, %293, %cst_107 {dimension_numbers = #tpu.dot_dimension_numbers<[1], [0], [0], [1], [0, 0, 1, 1], [], []>} : vector<16x128xbf16>, vector<128x128xbf16>, vector<16x128xf32> -> vector<16x128xf32>
    %295 = arith.extf %292 : vector<16x128xbf16> to vector<16x128xf32>
    %296 = arith.addf %294, %295 : vector<16x128xf32>
    %297 = arith.negf %296 : vector<16x128xf32>
    %298 = math.exp %297 : vector<16x128xf32>
    %cst_108 = arith.constant 1.000000e+00 : f32
    %299 = vector.broadcast %cst_108 : f32 to vector<16x128xf32>
    %300 = arith.addf %299, %298 : vector<16x128xf32>
    %301 = arith.divf %299, %300 : vector<16x128xf32>
    %302 = arith.extf %289 : vector<16x128xbf16> to vector<16x128xf32>
    %303 = arith.mulf %301, %302 : vector<16x128xf32>
    %304 = arith.truncf %303 : vector<16x128xf32> to vector<16x128xbf16>
    %c0_109 = arith.constant 0 : index
    %c0_110 = arith.constant 0 : index
    %305 = vector.load %arg5[%c0_109, %c0_110] : memref<128x512xbf16, #tpu.memory_space<vmem>>, vector<128x512xbf16>
    %cst_111 = arith.constant dense<0.000000e+00> : vector<16x512xf32>
    %306 = tpu.matmul %304, %305, %cst_111 {dimension_numbers = #tpu.dot_dimension_numbers<[1], [0], [0], [1], [0, 0, 1, 1], [], []>} : vector<16x128xbf16>, vector<128x512xbf16>, vector<16x512xf32> -> vector<16x512xf32>
    %c0_112 = arith.constant 0 : index
    %c0_113 = arith.constant 0 : index
    %307 = vector.load %arg6[%c0_112, %c0_113] : memref<128x512xbf16, #tpu.memory_space<vmem>>, vector<128x512xbf16>
    %cst_114 = arith.constant dense<0.000000e+00> : vector<16x512xf32>
    %308 = tpu.matmul %286, %307, %cst_114 {dimension_numbers = #tpu.dot_dimension_numbers<[1], [0], [0], [1], [0, 0, 1, 1], [], []>} : vector<16x128xbf16>, vector<128x512xbf16>, vector<16x512xf32> -> vector<16x512xf32>
    %309 = arith.addf %306, %308 : vector<16x512xf32>
    %310 = vector.broadcast %3 : vector<1x512xf32> to vector<16x512xf32>
    %311 = arith.addf %309, %310 : vector<16x512xf32>
    %312 = vector.extract_strided_slice %311 {offsets = [0, 0], sizes = [16, 128], strides = [1, 1]} : vector<16x512xf32> to vector<16x128xf32>
    %313 = arith.negf %312 : vector<16x128xf32>
    %314 = math.exp %313 : vector<16x128xf32>
    %cst_115 = arith.constant 1.000000e+00 : f32
    %315 = vector.broadcast %cst_115 : f32 to vector<16x128xf32>
    %316 = arith.addf %315, %314 : vector<16x128xf32>
    %317 = arith.divf %315, %316 : vector<16x128xf32>
    %318 = vector.extract_strided_slice %311 {offsets = [0, 128], sizes = [16, 128], strides = [1, 1]} : vector<16x512xf32> to vector<16x128xf32>
    %319 = arith.negf %318 : vector<16x128xf32>
    %320 = math.exp %319 : vector<16x128xf32>
    %cst_116 = arith.constant 1.000000e+00 : f32
    %321 = vector.broadcast %cst_116 : f32 to vector<16x128xf32>
    %322 = arith.addf %321, %320 : vector<16x128xf32>
    %323 = arith.divf %321, %322 : vector<16x128xf32>
    %324 = vector.extract_strided_slice %311 {offsets = [0, 256], sizes = [16, 128], strides = [1, 1]} : vector<16x512xf32> to vector<16x128xf32>
    %325 = math.tanh %324 : vector<16x128xf32>
    %326 = vector.extract_strided_slice %311 {offsets = [0, 384], sizes = [16, 128], strides = [1, 1]} : vector<16x512xf32> to vector<16x128xf32>
    %327 = arith.negf %326 : vector<16x128xf32>
    %328 = math.exp %327 : vector<16x128xf32>
    %cst_117 = arith.constant 1.000000e+00 : f32
    %329 = vector.broadcast %cst_117 : f32 to vector<16x128xf32>
    %330 = arith.addf %329, %328 : vector<16x128xf32>
    %331 = arith.divf %329, %330 : vector<16x128xf32>
    %332 = arith.mulf %323, %278 : vector<16x128xf32>
    %333 = arith.mulf %317, %325 : vector<16x128xf32>
    %334 = arith.addf %332, %333 : vector<16x128xf32>
    %335 = math.tanh %334 : vector<16x128xf32>
    %336 = arith.mulf %331, %335 : vector<16x128xf32>
    %337 = arith.truncf %336 : vector<16x128xf32> to vector<16x128xbf16>
    %338 = arith.index_cast %c5_i32 : i32 to index
    %c0_118 = arith.constant 0 : index
    %c0_119 = arith.constant 0 : index
    %339 = vector.load %arg8[%338, %c0_118, %c0_119] : memref<8x16x128xbf16, #tpu.memory_space<vmem>>, vector<1x16x128xbf16>
    %340 = vector.shape_cast %339 : vector<1x16x128xbf16> to vector<16x128xbf16>
    %341 = vector.shape_cast %337 : vector<16x128xbf16> to vector<1x16x128xbf16>
    tpu.vector_store %arg8[%338, %c0_118, %c0_119], %341 {strides = array<i32>} : memref<8x16x128xbf16, #tpu.memory_space<vmem>>, vector<1x16x128xbf16>,
    %c6_i32 = arith.constant 6 : i32
    %342 = arith.truncf %336 : vector<16x128xf32> to vector<16x128xbf16>
    %343 = arith.index_cast %c6_i32 : i32 to index
    %c0_120 = arith.constant 0 : index
    %c0_121 = arith.constant 0 : index
    %344 = vector.load %arg2[%343, %c0_120, %c0_121] : memref<8x16x128xbf16, #tpu.memory_space<vmem>>, vector<1x16x128xbf16>
    %345 = vector.shape_cast %344 : vector<1x16x128xbf16> to vector<16x128xbf16>
    %346 = arith.index_cast %c6_i32 : i32 to index
    %c0_122 = arith.constant 0 : index
    %c0_123 = arith.constant 0 : index
    %347 = vector.load %arg3[%346, %c0_122, %c0_123] : memref<8x16x128xbf16, #tpu.memory_space<vmem>>, vector<1x16x128xbf16>
    %348 = vector.shape_cast %347 : vector<1x16x128xbf16> to vector<16x128xbf16>
    %c0_124 = arith.constant 0 : index
    %c0_125 = arith.constant 0 : index
    %349 = vector.load %arg4[%c0_124, %c0_125] : memref<128x128xbf16, #tpu.memory_space<vmem>>, vector<128x128xbf16>
    %cst_126 = arith.constant dense<0.000000e+00> : vector<16x128xf32>
    %350 = tpu.matmul %342, %349, %cst_126 {dimension_numbers = #tpu.dot_dimension_numbers<[1], [0], [0], [1], [0, 0, 1, 1], [], []>} : vector<16x128xbf16>, vector<128x128xbf16>, vector<16x128xf32> -> vector<16x128xf32>
    %351 = arith.extf %348 : vector<16x128xbf16> to vector<16x128xf32>
    %352 = arith.addf %350, %351 : vector<16x128xf32>
    %353 = arith.negf %352 : vector<16x128xf32>
    %354 = math.exp %353 : vector<16x128xf32>
    %cst_127 = arith.constant 1.000000e+00 : f32
    %355 = vector.broadcast %cst_127 : f32 to vector<16x128xf32>
    %356 = arith.addf %355, %354 : vector<16x128xf32>
    %357 = arith.divf %355, %356 : vector<16x128xf32>
    %358 = arith.extf %345 : vector<16x128xbf16> to vector<16x128xf32>
    %359 = arith.mulf %357, %358 : vector<16x128xf32>
    %360 = arith.truncf %359 : vector<16x128xf32> to vector<16x128xbf16>
    %c0_128 = arith.constant 0 : index
    %c0_129 = arith.constant 0 : index
    %361 = vector.load %arg5[%c0_128, %c0_129] : memref<128x512xbf16, #tpu.memory_space<vmem>>, vector<128x512xbf16>
    %cst_130 = arith.constant dense<0.000000e+00> : vector<16x512xf32>
    %362 = tpu.matmul %360, %361, %cst_130 {dimension_numbers = #tpu.dot_dimension_numbers<[1], [0], [0], [1], [0, 0, 1, 1], [], []>} : vector<16x128xbf16>, vector<128x512xbf16>, vector<16x512xf32> -> vector<16x512xf32>
    %c0_131 = arith.constant 0 : index
    %c0_132 = arith.constant 0 : index
    %363 = vector.load %arg6[%c0_131, %c0_132] : memref<128x512xbf16, #tpu.memory_space<vmem>>, vector<128x512xbf16>
    %cst_133 = arith.constant dense<0.000000e+00> : vector<16x512xf32>
    %364 = tpu.matmul %342, %363, %cst_133 {dimension_numbers = #tpu.dot_dimension_numbers<[1], [0], [0], [1], [0, 0, 1, 1], [], []>} : vector<16x128xbf16>, vector<128x512xbf16>, vector<16x512xf32> -> vector<16x512xf32>
    %365 = arith.addf %362, %364 : vector<16x512xf32>
    %366 = vector.broadcast %3 : vector<1x512xf32> to vector<16x512xf32>
    %367 = arith.addf %365, %366 : vector<16x512xf32>
    %368 = vector.extract_strided_slice %367 {offsets = [0, 0], sizes = [16, 128], strides = [1, 1]} : vector<16x512xf32> to vector<16x128xf32>
    %369 = arith.negf %368 : vector<16x128xf32>
    %370 = math.exp %369 : vector<16x128xf32>
    %cst_134 = arith.constant 1.000000e+00 : f32
    %371 = vector.broadcast %cst_134 : f32 to vector<16x128xf32>
    %372 = arith.addf %371, %370 : vector<16x128xf32>
    %373 = arith.divf %371, %372 : vector<16x128xf32>
    %374 = vector.extract_strided_slice %367 {offsets = [0, 128], sizes = [16, 128], strides = [1, 1]} : vector<16x512xf32> to vector<16x128xf32>
    %375 = arith.negf %374 : vector<16x128xf32>
    %376 = math.exp %375 : vector<16x128xf32>
    %cst_135 = arith.constant 1.000000e+00 : f32
    %377 = vector.broadcast %cst_135 : f32 to vector<16x128xf32>
    %378 = arith.addf %377, %376 : vector<16x128xf32>
    %379 = arith.divf %377, %378 : vector<16x128xf32>
    %380 = vector.extract_strided_slice %367 {offsets = [0, 256], sizes = [16, 128], strides = [1, 1]} : vector<16x512xf32> to vector<16x128xf32>
    %381 = math.tanh %380 : vector<16x128xf32>
    %382 = vector.extract_strided_slice %367 {offsets = [0, 384], sizes = [16, 128], strides = [1, 1]} : vector<16x512xf32> to vector<16x128xf32>
    %383 = arith.negf %382 : vector<16x128xf32>
    %384 = math.exp %383 : vector<16x128xf32>
    %cst_136 = arith.constant 1.000000e+00 : f32
    %385 = vector.broadcast %cst_136 : f32 to vector<16x128xf32>
    %386 = arith.addf %385, %384 : vector<16x128xf32>
    %387 = arith.divf %385, %386 : vector<16x128xf32>
    %388 = arith.mulf %379, %334 : vector<16x128xf32>
    %389 = arith.mulf %373, %381 : vector<16x128xf32>
    %390 = arith.addf %388, %389 : vector<16x128xf32>
    %391 = math.tanh %390 : vector<16x128xf32>
    %392 = arith.mulf %387, %391 : vector<16x128xf32>
    %393 = arith.truncf %392 : vector<16x128xf32> to vector<16x128xbf16>
    %394 = arith.index_cast %c6_i32 : i32 to index
    %c0_137 = arith.constant 0 : index
    %c0_138 = arith.constant 0 : index
    %395 = vector.load %arg8[%394, %c0_137, %c0_138] : memref<8x16x128xbf16, #tpu.memory_space<vmem>>, vector<1x16x128xbf16>
    %396 = vector.shape_cast %395 : vector<1x16x128xbf16> to vector<16x128xbf16>
    %397 = vector.shape_cast %393 : vector<16x128xbf16> to vector<1x16x128xbf16>
    tpu.vector_store %arg8[%394, %c0_137, %c0_138], %397 {strides = array<i32>} : memref<8x16x128xbf16, #tpu.memory_space<vmem>>, vector<1x16x128xbf16>,
    %c7_i32 = arith.constant 7 : i32
    %398 = arith.truncf %392 : vector<16x128xf32> to vector<16x128xbf16>
    %399 = arith.index_cast %c7_i32 : i32 to index
    %c0_139 = arith.constant 0 : index
    %c0_140 = arith.constant 0 : index
    %400 = vector.load %arg2[%399, %c0_139, %c0_140] : memref<8x16x128xbf16, #tpu.memory_space<vmem>>, vector<1x16x128xbf16>
    %401 = vector.shape_cast %400 : vector<1x16x128xbf16> to vector<16x128xbf16>
    %402 = arith.index_cast %c7_i32 : i32 to index
    %c0_141 = arith.constant 0 : index
    %c0_142 = arith.constant 0 : index
    %403 = vector.load %arg3[%402, %c0_141, %c0_142] : memref<8x16x128xbf16, #tpu.memory_space<vmem>>, vector<1x16x128xbf16>
    %404 = vector.shape_cast %403 : vector<1x16x128xbf16> to vector<16x128xbf16>
    %c0_143 = arith.constant 0 : index
    %c0_144 = arith.constant 0 : index
    %405 = vector.load %arg4[%c0_143, %c0_144] : memref<128x128xbf16, #tpu.memory_space<vmem>>, vector<128x128xbf16>
    %cst_145 = arith.constant dense<0.000000e+00> : vector<16x128xf32>
    %406 = tpu.matmul %398, %405, %cst_145 {dimension_numbers = #tpu.dot_dimension_numbers<[1], [0], [0], [1], [0, 0, 1, 1], [], []>} : vector<16x128xbf16>, vector<128x128xbf16>, vector<16x128xf32> -> vector<16x128xf32>
    %407 = arith.extf %404 : vector<16x128xbf16> to vector<16x128xf32>
    %408 = arith.addf %406, %407 : vector<16x128xf32>
    %409 = arith.negf %408 : vector<16x128xf32>
    %410 = math.exp %409 : vector<16x128xf32>
    %cst_146 = arith.constant 1.000000e+00 : f32
    %411 = vector.broadcast %cst_146 : f32 to vector<16x128xf32>
    %412 = arith.addf %411, %410 : vector<16x128xf32>
    %413 = arith.divf %411, %412 : vector<16x128xf32>
    %414 = arith.extf %401 : vector<16x128xbf16> to vector<16x128xf32>
    %415 = arith.mulf %413, %414 : vector<16x128xf32>
    %416 = arith.truncf %415 : vector<16x128xf32> to vector<16x128xbf16>
    %c0_147 = arith.constant 0 : index
    %c0_148 = arith.constant 0 : index
    %417 = vector.load %arg5[%c0_147, %c0_148] : memref<128x512xbf16, #tpu.memory_space<vmem>>, vector<128x512xbf16>
    %cst_149 = arith.constant dense<0.000000e+00> : vector<16x512xf32>
    %418 = tpu.matmul %416, %417, %cst_149 {dimension_numbers = #tpu.dot_dimension_numbers<[1], [0], [0], [1], [0, 0, 1, 1], [], []>} : vector<16x128xbf16>, vector<128x512xbf16>, vector<16x512xf32> -> vector<16x512xf32>
    %c0_150 = arith.constant 0 : index
    %c0_151 = arith.constant 0 : index
    %419 = vector.load %arg6[%c0_150, %c0_151] : memref<128x512xbf16, #tpu.memory_space<vmem>>, vector<128x512xbf16>
    %cst_152 = arith.constant dense<0.000000e+00> : vector<16x512xf32>
    %420 = tpu.matmul %398, %419, %cst_152 {dimension_numbers = #tpu.dot_dimension_numbers<[1], [0], [0], [1], [0, 0, 1, 1], [], []>} : vector<16x128xbf16>, vector<128x512xbf16>, vector<16x512xf32> -> vector<16x512xf32>
    %421 = arith.addf %418, %420 : vector<16x512xf32>
    %422 = vector.broadcast %3 : vector<1x512xf32> to vector<16x512xf32>
    %423 = arith.addf %421, %422 : vector<16x512xf32>
    %424 = vector.extract_strided_slice %423 {offsets = [0, 0], sizes = [16, 128], strides = [1, 1]} : vector<16x512xf32> to vector<16x128xf32>
    %425 = arith.negf %424 : vector<16x128xf32>
    %426 = math.exp %425 : vector<16x128xf32>
    %cst_153 = arith.constant 1.000000e+00 : f32
    %427 = vector.broadcast %cst_153 : f32 to vector<16x128xf32>
    %428 = arith.addf %427, %426 : vector<16x128xf32>
    %429 = arith.divf %427, %428 : vector<16x128xf32>
    %430 = vector.extract_strided_slice %423 {offsets = [0, 128], sizes = [16, 128], strides = [1, 1]} : vector<16x512xf32> to vector<16x128xf32>
    %431 = arith.negf %430 : vector<16x128xf32>
    %432 = math.exp %431 : vector<16x128xf32>
    %cst_154 = arith.constant 1.000000e+00 : f32
    %433 = vector.broadcast %cst_154 : f32 to vector<16x128xf32>
    %434 = arith.addf %433, %432 : vector<16x128xf32>
    %435 = arith.divf %433, %434 : vector<16x128xf32>
    %436 = vector.extract_strided_slice %423 {offsets = [0, 256], sizes = [16, 128], strides = [1, 1]} : vector<16x512xf32> to vector<16x128xf32>
    %437 = math.tanh %436 : vector<16x128xf32>
    %438 = vector.extract_strided_slice %423 {offsets = [0, 384], sizes = [16, 128], strides = [1, 1]} : vector<16x512xf32> to vector<16x128xf32>
    %439 = arith.negf %438 : vector<16x128xf32>
    %440 = math.exp %439 : vector<16x128xf32>
    %cst_155 = arith.constant 1.000000e+00 : f32
    %441 = vector.broadcast %cst_155 : f32 to vector<16x128xf32>
    %442 = arith.addf %441, %440 : vector<16x128xf32>
    %443 = arith.divf %441, %442 : vector<16x128xf32>
    %444 = arith.mulf %435, %390 : vector<16x128xf32>
    %445 = arith.mulf %429, %437 : vector<16x128xf32>
    %446 = arith.addf %444, %445 : vector<16x128xf32>
    %447 = math.tanh %446 : vector<16x128xf32>
    %448 = arith.mulf %443, %447 : vector<16x128xf32>
    %449 = arith.truncf %448 : vector<16x128xf32> to vector<16x128xbf16>
    %450 = arith.index_cast %c7_i32 : i32 to index
    %c0_156 = arith.constant 0 : index
    %c0_157 = arith.constant 0 : index
    %451 = vector.load %arg8[%450, %c0_156, %c0_157] : memref<8x16x128xbf16, #tpu.memory_space<vmem>>, vector<1x16x128xbf16>
    %452 = vector.shape_cast %451 : vector<1x16x128xbf16> to vector<16x128xbf16>
    %453 = vector.shape_cast %449 : vector<16x128xbf16> to vector<1x16x128xbf16>
    tpu.vector_store %arg8[%450, %c0_156, %c0_157], %453 {strides = array<i32>} : memref<8x16x128xbf16, #tpu.memory_space<vmem>>, vector<1x16x128xbf16>,
    %c8_i32 = arith.constant 8 : i32
    %c0_158 = arith.constant 0 : index
    %c0_159 = arith.constant 0 : index
    %454 = vector.load %arg9[%c0_158, %c0_159] : memref<16x128xf32, #tpu.memory_space<vmem>>, vector<16x128xf32>
    tpu.vector_store %arg9[%c0_158, %c0_159], %448 {strides = array<i32>} : memref<16x128xf32, #tpu.memory_space<vmem>>, vector<16x128xf32>,
    %c0_160 = arith.constant 0 : index
    %c0_161 = arith.constant 0 : index
    %455 = vector.load %arg10[%c0_160, %c0_161] : memref<16x128xf32, #tpu.memory_space<vmem>>, vector<16x128xf32>
    tpu.vector_store %arg10[%c0_160, %c0_161], %446 {strides = array<i32>} : memref<16x128xf32, #tpu.memory_space<vmem>>, vector<16x128xf32>,
    return
  }
  func.func @transform_0(%arg0: i32, %arg1: i32) -> (i32, i32, i32) {
    %c0_i32 = arith.constant 0 : i32
    %c0_i32_0 = arith.constant 0 : i32
    return %arg1, %arg0, %c0_i32 : i32, i32, i32
  }
  func.func @transform_1(%arg0: i32, %arg1: i32) -> (i32, i32, i32) {
    %c0_i32 = arith.constant 0 : i32
    %c0_i32_0 = arith.constant 0 : i32
    return %arg1, %arg0, %c0_i32 : i32, i32, i32
  }
  func.func @transform_2(%arg0: i32, %arg1: i32) -> (i32, i32) {
    %c0_i32 = arith.constant 0 : i32
    %c0_i32_0 = arith.constant 0 : i32
    %c0_i32_1 = arith.constant 0 : i32
    return %c0_i32, %c0_i32_0 : i32, i32
  }
  func.func @transform_3(%arg0: i32, %arg1: i32) -> (i32, i32) {
    %c0_i32 = arith.constant 0 : i32
    %c0_i32_0 = arith.constant 0 : i32
    %c0_i32_1 = arith.constant 0 : i32
    return %c0_i32, %c0_i32_0 : i32, i32
  }
  func.func @transform_4(%arg0: i32, %arg1: i32) -> (i32, i32) {
    %c0_i32 = arith.constant 0 : i32
    %c0_i32_0 = arith.constant 0 : i32
    %c0_i32_1 = arith.constant 0 : i32
    return %c0_i32, %c0_i32_0 : i32, i32
  }
  func.func @transform_5(%arg0: i32, %arg1: i32) -> (i32, i32) {
    %c0_i32 = arith.constant 0 : i32
    %c0_i32_0 = arith.constant 0 : i32
    %c0_i32_1 = arith.constant 0 : i32
    return %c0_i32, %c0_i32_0 : i32, i32
  }
  func.func @transform_6(%arg0: i32, %arg1: i32) -> (i32, i32, i32) {
    %c0_i32 = arith.constant 0 : i32
    %c0_i32_0 = arith.constant 0 : i32
    return %arg1, %arg0, %c0_i32 : i32, i32, i32
  }
}

</mosaic_0001>

<bundles_post_ra>
// kernel: qmogrifier_forward.1
= control target key start
LH: loop header
LB: loop body
LE: loop exit
PB: predicated region body
PF: predicated region fallthrough
CT: control target
= control target key end

     0   :  { %v10276_v0 = vmov 0.0   ;;  %vm7953_vm0 = vmmov 0   ;;  %v7954_v27 = vmov 0.0|0.0   ;;  %v10278_v40 = vmov 0   ;;  %s10269_s2 = inlined_call_operand.vmem [shape: bf16[128,128], index: 2, kind: input, shape index: {}]   ;;  %s10270_s4 = inlined_call_operand.vmem [shape: bf16[128,512], index: 4, kind: input, shape index: {}]   ;;  %s10271_s3 = inlined_call_operand.vmem [shape: bf16[128,512], index: 3, kind: input, shape index: {}]   ;;  %s10272_s1 = inlined_call_operand.vmem [shape: bf16[8,16,128], index: 1, kind: input, shape index: {}]   ;;  %s10273_s0 = inlined_call_operand.vmem [shape: bf16[8,16,128], index: 0, kind: input, shape index: {}]   ;;  %s10274_s5 = inlined_call_operand.vmem [shape: f32[1,512], index: 5, kind: input, shape index: {}]   ;;  %s10275_s6 = inlined_call_operand.vmem [shape: bf16[8,16,128], index: 6, kind: output, shape index: {}]  }
   0x1   :  { %6999 = vmatprep.subr.bf16.mxu0 %v10276_v0  ;;  %v7163_v1 = vld [vmem:[%s10269_s2 + $0x38] sm:$0xff]   ;;  %7015 = vmatprep.mubr.msk.bf16.mxu0 %vm7953_vm0, %v10276_v0  ;;  %v7164_v2 = vld [vmem:[%s10269_s2 + $0x30] sm:$0xff]   ;;  %v7165_v3 = vld [vmem:[%s10269_s2 + $0x28] sm:$0xff]  }
   0x2   :  { %7000 = vmatpush3.bf16.msra.mxu0 %v7163_v1  ;;  %v8008_v4 = vld [vmem:[%s10270_s4 + $0xe4] ss:$16 sps:$4 sm:$0xff]   ;;  %v7173_v5 = vld [vmem:[%s10270_s4 + $0xe0] ss:$16 sps:$4 sm:$0xff]   ;;  %v7167_v10 = vld [vmem:[%s10269_s2 + $0x18] sm:$0xff]   ;;  %422 = vmatprep.mubr.bf16.mxu1 %v10278_v40 }
   0x3   :  { %7001 = vmatprep.subr.bf16.mxu0 %v10276_v0  ;;  %v7166_v6 = vld [vmem:[%s10269_s2 + $0x20] sm:$0xff]   ;;  %390 = vmatprep.subr.bf16.mxu1 %v8008_v4  ;;  %v7168_v13 = vld [vmem:[%s10269_s2 + $0x10] sm:$0xff]   ;;  %v7169_v16 = vld [vmem:[%s10269_s2 + $0x8] sm:$0xff]  }
   0x4   :  { %v7174_v7 = vld [vmem:[%s10270_s4 + $0xc4] ss:$16 sps:$4 sm:$0xff]   ;;  %391 = vmatpush1.bf16.msra.mxu1 %v7173_v5  ;;  %v7176_v8 = vld [vmem:[%s10270_s4 + $0xc0] ss:$16 sps:$4 sm:$0xff]   ;;  %v7179_v20 = vld [vmem:[%s10270_s4 + $0xec] ss:$16 sps:$4 sm:$0xff]  }
   0x5   :  { %392 = vmatprep.subr.bf16.mxu1 %v7174_v7  ;;  %v7180_v9 = vld [vmem:[%s10270_s4 + $0xa4] ss:$16 sps:$4 sm:$0xff]   ;;  %v7182_v11 = vld [vmem:[%s10270_s4 + $0xa0] ss:$16 sps:$4 sm:$0xff]   ;;  %v7177_v23 = vld [vmem:[%s10270_s4 + $0xe8] ss:$16 sps:$4 sm:$0xff]  }
   0x6   :  { %7002 = vmatpush3.bf16.msra.mxu0 %v7164_v2  ;;  %v7186_v12 = vld [vmem:[%s10270_s4 + $0x84] ss:$16 sps:$4 sm:$0xff]   ;;  %v7188_v14 = vld [vmem:[%s10270_s4 + $0x80] ss:$16 sps:$4 sm:$0xff]   ;;  %v7185_v24 = vld [vmem:[%s10270_s4 + $0xcc] ss:$16 sps:$4 sm:$0xff]  }
   0x7   :  { %7003 = vmatprep.subr.bf16.mxu0 %v10276_v0  ;;  %v7192_v15 = vld [vmem:[%s10270_s4 + $0x64] ss:$16 sps:$4 sm:$0xff]   ;;  %v7194_v17 = vld [vmem:[%s10270_s4 + $0x60] ss:$16 sps:$4 sm:$0xff]   ;;  %v7183_v26 = vld [vmem:[%s10270_s4 + $0xc8] ss:$16 sps:$4 sm:$0xff]  }
   0x8   :  { %393 = vmatpush1.bf16.msra.mxu1 %v7176_v8  ;;  %v7170_v18 = vld [vmem:[%s10269_s2] sm:$0xff]   ;;  %v7191_v28 = vld [vmem:[%s10270_s4 + $0xac] ss:$16 sps:$4 sm:$0xff]   ;;  %v7189_v29 = vld [vmem:[%s10270_s4 + $0xa8] ss:$16 sps:$4 sm:$0xff]  }
   0x9   :  { %394 = vmatprep.subr.bf16.mxu1 %v7180_v9  ;;  %v8060_v19 = vld [vmem:[%s10270_s4 + $0x44] ss:$16 sps:$4 sm:$0xff]   ;;  %v8068_v21 = vld [vmem:[%s10270_s4 + $0x40] ss:$16 sps:$4 sm:$0xff]   ;;  %v7197_v30 = vld [vmem:[%s10270_s4 + $0x8c] ss:$16 sps:$4 sm:$0xff]  }
   0xa   :  { %7004 = vmatpush3.bf16.msra.mxu0 %v7165_v3  ;;  %v8073_v22 = vld [vmem:[%s10270_s4 + $0x24] ss:$16 sps:$4 sm:$0xff]   ;;  %v8086_v25 = vld [vmem:[%s10270_s4 + $0x20] ss:$16 sps:$4 sm:$0xff]   ;;  %v7195_v31 = vld [vmem:[%s10270_s4 + $0x88] ss:$16 sps:$4 sm:$0xff]  }
   0xb   :  { %7005 = vmatprep.subr.bf16.mxu0 %v10276_v0  ;;  %v7203_v32 = vld [vmem:[%s10270_s4 + $0x6c] ss:$16 sps:$4 sm:$0xff]   ;;  %v7201_v33 = vld [vmem:[%s10270_s4 + $0x68] ss:$16 sps:$4 sm:$0xff]   ;;  %v8121_v36 = vld [vmem:[%s10270_s4 + $0x4] ss:$16 sps:$4 sm:$0xff]  }
   0xc   :  { %395 = vmatpush1.bf16.msra.mxu1 %v7182_v11  ;;  %v7209_v34 = vld [vmem:[%s10270_s4 + $0x4c] ss:$16 sps:$4 sm:$0xff]   ;;  %v7207_v35 = vld [vmem:[%s10270_s4 + $0x48] ss:$16 sps:$4 sm:$0xff]   ;;  %v8126_v37 = vld [vmem:[%s10270_s4] ss:$16 sps:$4 sm:$0xff]  }
   0xd   :  { %396 = vmatprep.subr.bf16.mxu1 %v7186_v12  ;;  %v8131_v38 = vld [vmem:[%s10270_s4 + $0x2c] ss:$16 sps:$4 sm:$0xff]   ;;  %v8137_v39 = vld [vmem:[%s10270_s4 + $0x28] ss:$16 sps:$4 sm:$0xff]   ;;  %v8160_v43 = vld [vmem:[%s10271_s3 + $0xe4] ss:$16 sps:$4 sm:$0xff]  }
   0xe   :  { %7006 = vmatpush3.bf16.msra.mxu0 %v7166_v6  ;;  %v8146_v41 = vld [vmem:[%s10270_s4 + $0xc] ss:$16 sps:$4 sm:$0xff]   ;;  %v8152_v42 = vld [vmem:[%s10270_s4 + $0x8] ss:$16 sps:$4 sm:$0xff]   ;;  %v8165_v44 = vld [vmem:[%s10271_s3 + $0xe0] ss:$16 sps:$4 sm:$0xff]  }
   0xf   :  { %7007 = vmatprep.subr.bf16.mxu0 %v10276_v0  ;;  %v8171_v45 = vld [vmem:[%s10271_s3 + $0xe8] ss:$16 sps:$4 sm:$0xff]   ;;  %v8176_v46 = vld [vmem:[%s10271_s3 + $0xec] ss:$16 sps:$4 sm:$0xff]   ;;  %v8184_v47 = vld [vmem:[%s10271_s3 + $0xc4] ss:$16 sps:$4 sm:$0xff]  }
  0x10   :  { %397 = vmatpush1.bf16.msra.mxu1 %v7188_v14  ;;  %v8189_v48 = vld [vmem:[%s10271_s3 + $0xcc] ss:$16 sps:$4 sm:$0xff]   ;;  %v8195_v49 = vld [vmem:[%s10271_s3 + $0xc0] ss:$16 sps:$4 sm:$0xff]   ;;  %v8200_v50 = vld [vmem:[%s10271_s3 + $0xc8] ss:$16 sps:$4 sm:$0xff]  }
  0x11   :  { %398 = vmatprep.subr.bf16.mxu1 %v7192_v15  ;;  %v8208_v51 = vld [vmem:[%s10271_s3 + $0xa4] ss:$16 sps:$4 sm:$0xff]   ;;  %v8213_v52 = vld [vmem:[%s10271_s3 + $0xac] ss:$16 sps:$4 sm:$0xff]   ;;  %v8219_v53 = vld [vmem:[%s10271_s3 + $0xa0] ss:$16 sps:$4 sm:$0xff]  }
  0x12   :  { %7008 = vmatpush3.bf16.msra.mxu0 %v7167_v10  ;;  %v8224_v54 = vld [vmem:[%s10271_s3 + $0xa8] ss:$16 sps:$4 sm:$0xff]   ;;  %v8232_v55 = vld [vmem:[%s10271_s3 + $0x84] ss:$16 sps:$4 sm:$0xff]   ;;  %v8237_v56 = vld [vmem:[%s10271_s3 + $0x8c] ss:$16 sps:$4 sm:$0xff]  }
  0x13   :  { %7009 = vmatprep.subr.bf16.mxu0 %v10276_v0  ;;  %v8243_v57 = vld [vmem:[%s10271_s3 + $0x80] ss:$16 sps:$4 sm:$0xff]   ;;  %v8248_v58 = vld [vmem:[%s10271_s3 + $0x88] ss:$16 sps:$4 sm:$0xff]   ;;  %v8261_v60 = vld [vmem:[%s10271_s3 + $0x64] ss:$16 sps:$4 sm:$0xff]  }
  0x14   :  { %399 = vmatpush1.bf16.msra.mxu1 %v7194_v17  ;;  %v8256_v59 = vld [vmem:[%s10271_s3 + $0x60] ss:$16 sps:$4 sm:$0xff]   ;;  %v8267_v61 = vld [vmem:[%s10271_s3 + $0x68] ss:$16 sps:$4 sm:$0xff]   ;;  %v8272_v62 = vld [vmem:[%s10271_s3 + $0x6c] ss:$16 sps:$4 sm:$0xff]  }
  0x15   :  { %400 = vmatprep.subr.bf16.mxu1 %v8060_v19  ;;  %v8277_v63 = vld [vmem:[%s10271_s3 + $0x44] ss:$16 sps:$4 sm:$0xff]   ;;  %v8283_v1 = vld [vmem:[%s10271_s3 + $0x4c] ss:$16 sps:$4 sm:$0xff]   ;;  %v8290_v2 = vld [vmem:[%s10271_s3 + $0x40] ss:$16 sps:$4 sm:$0xff]  }
  0x16   :  { %7010 = vmatpush3.bf16.msra.mxu0 %v7168_v13  ;;  %v8296_v3 = vld [vmem:[%s10271_s3 + $0x48] ss:$16 sps:$4 sm:$0xff]   ;;  %v8301_v5 = vld [vmem:[%s10271_s3 + $0x24] ss:$16 sps:$4 sm:$0xff]   ;;  %v8307_v6 = vld [vmem:[%s10271_s3 + $0x20] ss:$16 sps:$4 sm:$0xff]  }
  0x17   :  { %7011 = vmatprep.subr.bf16.mxu0 %v10276_v0  ;;  %v8312_v7 = vld [vmem:[%s10271_s3 + $0x2c] ss:$16 sps:$4 sm:$0xff]   ;;  %v8318_v8 = vld [vmem:[%s10271_s3 + $0x4] ss:$16 sps:$4 sm:$0xff]   ;;  %v8324_v9 = vld [vmem:[%s10271_s3 + $0x28] ss:$16 sps:$4 sm:$0xff]  }
  0x18   :  { %401 = vmatpush1.bf16.msra.mxu1 %v8068_v21  ;;  %v8330_v10 = vld [vmem:[%s10271_s3 + $0xc] ss:$16 sps:$4 sm:$0xff]   ;;  %v8336_v11 = vld [vmem:[%s10271_s3] ss:$16 sps:$4 sm:$0xff]   ;;  %v8343_v12 = vld [vmem:[%s10271_s3 + $0x8] ss:$16 sps:$4 sm:$0xff]  }
  0x19   :  { %402 = vmatprep.subr.bf16.mxu1 %v8073_v22  ;;  %10350 = vst [vmem:[#allocation4_spill] sm:$0xff] %v8343_v12  ;;  %v6807_v13 = vld [vmem:[%s10272_s1] sm:$0xff]  }
  0x1a   :  { %7012 = vmatpush3.bf16.msra.mxu0 %v7169_v16  ;;  %v6808_v14 = vunpack.c.l.bf16 %v6807_v13  ;;  %v6809_v17 = vunpack.c.h.bf16 %v6807_v13 }
  0x1b   :  { %7013 = vmatprep.subr.bf16.mxu0 %v10276_v0 }
  0x1c   :  { %403 = vmatpush1.bf16.msra.mxu1 %v8086_v25 }
  0x1d   :  { %404 = vmatprep.subr.bf16.mxu1 %v8121_v36 }
  0x1e   :  { %7014 = vmatpush3.bf16.msra.mxu0 %v7170_v18 }
  0x1f   :  { %433 = vmatprep.subr.bf16.mxu0 %v7179_v20 }
  0x20   :  { %405 = vmatpush1.bf16.msra.mxu1 %v8126_v37 }
  0x21   :  { %7016 = vmatmul.mubr.bf16.vlgmr.msra.gmra.mxu0 %v7954_v27  ;;  %636 = vmatprep.subr.bf16.mxu1 %v8160_v43 }
  0x22   :  { %434 = vmatpush1.bf16.msra.mxu0 %v7177_v23  ;;  %465 = vmatprep.mubr.bf16.mxu0 %v10278_v40 }
  0x23   :  { %435 = vmatprep.subr.bf16.mxu0 %v7185_v24  ;;  %423 = vmatmul.mubr.bf16.vlgmr.msra.gmra.mxu1 %v7954_v27 }
  0x24   :  { %668 = vmatprep.mubr.bf16.mxu1 %v10278_v40  ;;  %637 = vmatpush1.bf16.msra.mxu1 %v8165_v44 }
  0x25   :  { %638 = vmatprep.subr.bf16.mxu1 %v8184_v47 }
  0x26   :  { %436 = vmatpush1.bf16.msra.mxu0 %v7183_v26 }
  0x27   :  { %437 = vmatprep.subr.bf16.mxu0 %v7191_v28 }
  0x28   :  { %639 = vmatpush1.bf16.msra.mxu1 %v8195_v49 }
  0x29   :  { %640 = vmatprep.subr.bf16.mxu1 %v8208_v51 }
  0x2a   :  { %438 = vmatpush1.bf16.msra.mxu0 %v7189_v29 }
  0x2b   :  { %439 = vmatprep.subr.bf16.mxu0 %v7197_v30 }
  0x2c   :  { %641 = vmatpush1.bf16.msra.mxu1 %v8219_v53 }
  0x2d   :  { %642 = vmatprep.subr.bf16.mxu1 %v8232_v55 }
  0x2e   :  { %440 = vmatpush1.bf16.msra.mxu0 %v7195_v31  ;;  %v6803_v31 = vld [vmem:[%s10273_s0] sm:$0xff]  }
  0x2f   :  { %441 = vmatprep.subr.bf16.mxu0 %v7203_v32  ;;  %v6804_v32 = vunpack.c.l.bf16 %v6803_v31 }
  0x30   :  { %643 = vmatpush1.bf16.msra.mxu1 %v8243_v57 }
  0x31   :  { %644 = vmatprep.subr.bf16.mxu1 %v8261_v60 }
  0x32   :  { %442 = vmatpush1.bf16.msra.mxu0 %v7201_v33  ;;  %v6805_v33 = vunpack.c.h.bf16 %v6803_v31 }
  0x33   :  { %443 = vmatprep.subr.bf16.mxu0 %v7209_v34 }
  0x34   :  { %645 = vmatpush1.bf16.msra.mxu1 %v8256_v59 }
  0x35   :  { %646 = vmatprep.subr.bf16.mxu1 %v8277_v63 }
  0x36   :  { %444 = vmatpush1.bf16.msra.mxu0 %v7207_v35 }
  0x37   :  { %445 = vmatprep.subr.bf16.mxu0 %v8131_v38 }
  0x38   :  { %647 = vmatpush1.bf16.msra.mxu1 %v8290_v2 }
  0x39   :  { %648 = vmatprep.subr.bf16.mxu1 %v8301_v5 }
  0x3a   :  { %446 = vmatpush1.bf16.msra.mxu0 %v8137_v39 }
  0x3b   :  { %447 = vmatprep.subr.bf16.mxu0 %v8146_v41 }
  0x3c   :  { %649 = vmatpush1.bf16.msra.mxu1 %v8307_v6 }
  0x3d   :  { %650 = vmatprep.subr.bf16.mxu1 %v8318_v8 }
  0x3e   :  { %448 = vmatpush1.bf16.msra.mxu0 %v8152_v42 }
  0x3f   :  { %679 = vmatprep.subr.bf16.mxu0 %v8176_v46 }
  0x40   :  { %651 = vmatpush1.bf16.msra.mxu1 %v8336_v11 }
  0x41   :  { %466 = vmatmul.mubr.bf16.vlgmr.msra.gmra.mxu0 %v7954_v27  ;;  %7019 = vmatprep.subr.bf16.mxu1 %v10276_v0 }
  0x42   :  { %711 = vmatprep.mubr.bf16.mxu0 %v10278_v40  ;;  %680 = vmatpush1.bf16.msra.mxu0 %v8171_v45 }
  0x43   :  { %681 = vmatprep.subr.bf16.mxu0 %v8189_v48 }
  0x46   :  { %682 = vmatpush1.bf16.msra.mxu0 %v8200_v50 }
  0x47   :  { %683 = vmatprep.subr.bf16.mxu0 %v8213_v52 }
  0x4a   :  { %684 = vmatpush1.bf16.msra.mxu0 %v8224_v54 }
  0x4b   :  { %685 = vmatprep.subr.bf16.mxu0 %v8237_v56 }
  0x4e   :  { %686 = vmatpush1.bf16.msra.mxu0 %v8248_v58 }
  0x4f   :  { %687 = vmatprep.subr.bf16.mxu0 %v8272_v62 }
  0x52   :  { %688 = vmatpush1.bf16.msra.mxu0 %v8267_v61 }
  0x53   :  { %689 = vmatprep.subr.bf16.mxu0 %v8283_v1 }
  0x56   :  { %690 = vmatpush1.bf16.msra.mxu0 %v8296_v3 }
  0x57   :  { %691 = vmatprep.subr.bf16.mxu0 %v8312_v7 }
  0x5a   :  { %692 = vmatpush1.bf16.msra.mxu0 %v8324_v9 }
  0x5b   :  { %693 = vmatprep.subr.bf16.mxu0 %v8330_v10 }
  0x5e   :  { %694 = vmatpush1.bf16.msra.mxu0 %v8343_v12 }
  0x5f   :  { %1163 = vmatprep.subr.bf16.mxu0 %v8008_v4 }
  0xe1   :  { %v142_v15 = vpop.f32.mrf.mxu0 }
  0xe2   :  { %v143_v16 = vadd.f32 %v6808_v14, %v142_v15 }
  0xe3   :  { %v7017_v18 = vpop.f32.mrf.mxu0 }
  0xe4   :  { %v6096_v20 = vmul.f32 -1.442695, %v143_v16  ;;  %v7931_v16 = vld [vmem:[%s10270_s4 + $0xe0] ss:$16 sps:$4 sm:$0xff]  }
  0xe5   :  { %v145_v23 = vpop.f32.mrf.mxu0  ;;  %v7933_v18 = vld [vmem:[%s10270_s4 + $0xc0] ss:$16 sps:$4 sm:$0xff]  }
  0xe6   :  { %7611 = vpow2.f32 %v6096_v20  ;;  %v146_v24 = vadd.f32 %v6809_v17, %v145_v23  ;;  %v7932_v17 = vld [vmem:[%s10270_s4 + $0xc4] ss:$16 sps:$4 sm:$0xff]   ;;  %v7935_v23 = vld [vmem:[%s10270_s4 + $0xa0] ss:$16 sps:$4 sm:$0xff]  }
  0xe7   :  { %v7018_v26 = vpop.f32.mrf.mxu0  ;;  %v7934_v20 = vld [vmem:[%s10270_s4 + $0xa4] ss:$16 sps:$4 sm:$0xff]  }
  0xe8   :  { %v6097_v27 = vmul.f32 -1.442695, %v146_v24  ;;  %v7936_v24 = vld [vmem:[%s10270_s4 + $0x84] ss:$16 sps:$4 sm:$0xff]   ;;  %v7937_v26 = vld [vmem:[%s10270_s4 + $0x80] ss:$16 sps:$4 sm:$0xff]  }
  0xea   :  { %7613 = vpow2.f32 %v6097_v27  ;;  %v7938_v27 = vld [vmem:[%s10270_s4 + $0x64] ss:$16 sps:$4 sm:$0xff]  }
  0xf3   :  { %v7612_v28 = vpop.eup %7611 }
  0xf4   :  { %v155_v29 = vadd.f32 1.0, %v7612_v28  ;;  %v7939_v28 = vld [vmem:[%s10270_s4 + $0x60] ss:$16 sps:$4 sm:$0xff]  }
  0xf6   :  { %7615 = vrcp.f32 %v155_v29  ;;  %v7267_v29 = vld [vmem:[%s10269_s2 + $0x38] sm:$0xff]  }
  0xf7   :  { %v7614_v30 = vpop.eup %7613 }
  0xf8   :  { %v156_v4 = vadd.f32 1.0, %v7614_v30  ;;  %v7940_v30 = vld [vmem:[%s10270_s4 + $0xec] ss:$16 sps:$4 sm:$0xff]  }
  0xfa   :  { %7617 = vrcp.f32 %v156_v4  ;;  %v424_v4 = vpop.f32.mrf.mxu1 }
 0x101   :  { %v467_v31 = vpop.f32.mrf.mxu0 }
 0x103   :  { %v7616_v34 = vpop.eup %7615 }
 0x104   :  { %v163_v13 = vmul.f32 %v7616_v34, %v6804_v32  ;;  %v723_v32 = vlaneseq  ;;  %v469_v34 = vpop.f32.mrf.mxu0 }
 0x107   :  { %v7618_v35 = vpop.eup %7617 }
 0x108   :  { %v164_v14 = vmul.f32 %v7618_v35, %v6805_v33  ;;  %v426_v33 = vpop.f32.mrf.mxu1  ;;  %v724_v35 = vshrl.u32 %v723_v32, 7 }
 0x10a   :  { %v165_v15 = vpack.c.bf16 %v164_v14, %v163_v13  ;;  %v428_v13 = vpop.f32.mrf.mxu1  ;;  %v471_v14 = vpop.f32.mrf.mxu0 }
 0x10c   :  { %669 = vmatmul.mubr.bf16.vlgmr.msra.gmra.mxu1 %v165_v15  ;;  %712 = vmatmul.mubr.bf16.vlgmr.msra.gmra.mxu0 %v165_v15  ;;  %v725_v15 = vsub.s32 0, %v724_v35 }
 0x10d   :  { %1164 = vmatpush1.bf16.msra.mxu0 %v7931_v16  ;;  %7035 = vmatprep.mubr.msk.bf16.mxu1 %vm7953_vm0, %v10276_v0  ;;  %v32_v16 = vld [vmem:[%s10274_s5] sm:$0xf] }
 0x10e   :  { %1165 = vmatprep.subr.bf16.mxu0 %v7932_v17  ;;  %1195 = vmatprep.mubr.bf16.mxu0 %v10278_v40  ;;  %v729_v17 = vsub.s32 1, %v724_v35  ;;  %v737_v40 = vsub.s32 3, %v724_v35 }
 0x10f   :  { %7020 = vmatpush3.bf16.msra.mxu1 %v7267_v29 }
 0x110   :  { %7021 = vmatprep.subr.bf16.mxu1 %v10276_v0 }
 0x111   :  { %1166 = vmatpush1.bf16.msra.mxu0 %v7933_v18  ;;  %v430_v18 = vpop.f32.mrf.mxu1 }
 0x112   :  { %1167 = vmatprep.subr.bf16.mxu0 %v7934_v20  ;;  %v473_v20 = vpop.f32.mrf.mxu0 }
 0x115   :  { %1168 = vmatpush1.bf16.msra.mxu0 %v7935_v23  ;;  %v8432_v23 = vrot.slane %v32_v16, %v725_v15 }
 0x116   :  { %1169 = vmatprep.subr.bf16.mxu0 %v7936_v24 }
 0x119   :  { %1170 = vmatpush1.bf16.msra.mxu0 %v7937_v26 }
 0x11a   :  { %1171 = vmatprep.subr.bf16.mxu0 %v7938_v27 }
 0x11d   :  { %1172 = vmatpush1.bf16.msra.mxu0 %v7939_v28  ;;  %v8434_v28 = vrot.slane %v32_v16, %v729_v17 }
 0x11e   :  { %1173 = vmatprep.subr.bf16.mxu0 %v8060_v19  ;;  %v7268_v19 = vld [vmem:[%s10269_s2 + $0x30] sm:$0xff]  }
 0x11f   :  { %7022 = vmatpush3.bf16.msra.mxu1 %v7268_v19 }
 0x120   :  { %7023 = vmatprep.subr.bf16.mxu1 %v10276_v0 }
 0x121   :  { %1174 = vmatpush1.bf16.msra.mxu0 %v8068_v21  ;;  %v7269_v21 = vld [vmem:[%s10269_s2 + $0x28] sm:$0xff]  }
 0x122   :  { %1175 = vmatprep.subr.bf16.mxu0 %v8073_v22  ;;  %v7270_v22 = vld [vmem:[%s10269_s2 + $0x20] sm:$0xff]  }
 0x123   :  { %7024 = vmatpush3.bf16.msra.mxu1 %v7269_v21 }
 0x124   :  { %7025 = vmatprep.subr.bf16.mxu1 %v10276_v0 }
 0x125   :  { %1176 = vmatpush1.bf16.msra.mxu0 %v8086_v25  ;;  %v7271_v25 = vld [vmem:[%s10269_s2 + $0x18] sm:$0xff]  }
 0x126   :  { %1177 = vmatprep.subr.bf16.mxu0 %v8121_v36  ;;  %v7272_v36 = vld [vmem:[%s10269_s2 + $0x10] sm:$0xff]  }
 0x127   :  { %7026 = vmatpush3.bf16.msra.mxu1 %v7270_v22 }
 0x128   :  { %7027 = vmatprep.subr.bf16.mxu1 %v10276_v0 }
 0x129   :  { %1178 = vmatpush1.bf16.msra.mxu0 %v8126_v37  ;;  %v7273_v37 = vld [vmem:[%s10269_s2 + $0x8] sm:$0xff]  }
 0x12a   :  { %1409 = vmatprep.subr.bf16.mxu0 %v8160_v43  ;;  %v7274_v43 = vld [vmem:[%s10269_s2] sm:$0xff]  }
 0x12b   :  { %7028 = vmatpush3.bf16.msra.mxu1 %v7271_v25 }
 0x12c   :  { %7029 = vmatprep.subr.bf16.mxu1 %v10276_v0 }
 0x12f   :  { %7030 = vmatpush3.bf16.msra.mxu1 %v7272_v36 }
 0x130   :  { %7031 = vmatprep.subr.bf16.mxu1 %v10276_v0 }
 0x133   :  { %7032 = vmatpush3.bf16.msra.mxu1 %v7273_v37 }
 0x134   :  { %7033 = vmatprep.subr.bf16.mxu1 %v10276_v0 }
 0x137   :  { %7034 = vmatpush3.bf16.msra.mxu1 %v7274_v43 }
 0x138   :  { %1206 = vmatprep.subr.bf16.mxu1 %v7940_v30 }
 0x1cc   :  { %v670_v24 = vpop.f32.mrf.mxu1  ;;  %v713_v26 = vpop.f32.mrf.mxu0 }
 0x1cd   :  { %v671_v27 = vadd.f32 %v670_v24, %v424_v4  ;;  %v733_v24 = vsub.s32 2, %v724_v35 }
 0x1ce   :  { %v672_v29 = vpop.f32.mrf.mxu1  ;;  %v715_v22 = vpop.f32.mrf.mxu0 }
 0x1cf   :  { %v743_v19 = vadd.f32 %v8432_v23, %v671_v27  ;;  %v673_v21 = vadd.f32 %v672_v29, %v426_v33  ;;  %v716_v12 = vadd.f32 %v715_v22, %v469_v34 }
 0x1d0   :  { %v674_v25 = vpop.f32.mrf.mxu1  ;;  %v717_v15 = vpop.f32.mrf.mxu0 }
 0x1d1   :  { %v6162_v36 = vmul.f32 -1.442695, %v743_v19  ;;  %v744_v37 = vadd.f32 %v8434_v28, %v673_v21  ;;  %v675_v43 = vadd.f32 %v674_v25, %v428_v13  ;;  %v8440_v19 = vrot.slane %v32_v16, %v737_v40 }
 0x1d2   :  { %v676_v30 = vpop.f32.mrf.mxu1  ;;  %v719_v29 = vpop.f32.mrf.mxu0  ;;  %v714_v13 = vadd.f32 %v713_v26, %v467_v31  ;;  %v8442_v21 = vrot.slane %v32_v16, %v733_v24 }
 0x1d3   :  { %7619 = vpow2.f32 %v6162_v36  ;;  %v6164_v32 = vmul.f32 -1.442695, %v744_v37  ;;  %v677_v0 = vadd.f32 %v676_v30, %v430_v18  ;;  %v747_v4 = vadd.f32 %v8432_v23, %v675_v43 }
 0x1d4   :  { %v720_v25 = vadd.f32 %v719_v29, %v473_v20  ;;  %v746_v18 = vadd.f32 %v8440_v19, %v716_v12  ;;  %v745_v36 = vadd.f32 %v8442_v21, %v714_v13 }
 0x1d5   :  { %7621 = vpow2.f32 %v6164_v32  ;;  %v748_v17 = vadd.f32 %v8434_v28, %v677_v0  ;;  %v6163_v27 = vmul.f32 -1.442695, %v747_v4  ;;  %v718_v0 = vadd.f32 %v717_v15, %v471_v14 }
 0x1d6   :  { %v750_v37 = vadd.f32 %v8440_v19, %v720_v25  ;;  %v6166_v43 = vmul.f32 -1.442695, %v746_v18 }
 0x1d7   :  { %v6165_v33 = vmul.f32 -1.442695, %v748_v17  ;;  %7623 = vpow2.f32 %v6163_v27  ;;  %v749_v31 = vadd.f32 %v8442_v21, %v718_v0 }
 0x1d8   :  { %v6167_v40 = vmul.f32 -1.442695, %v750_v37 }
 0x1d9   :  { %7625 = vpow2.f32 %v6165_v33 }
 0x1da   :  { %7627 = vtanh.f32 %v745_v36 }
 0x1e0   :  { %v7620_v35 = vpop.eup %7619 }
 0x1e1   :  { %v757_v30 = vadd.f32 1.0, %v7620_v35 }
 0x1e2   :  { %v7622_v32 = vpop.eup %7621 }
 0x1e3   :  { %7629 = vrcp.f32 %v757_v30  ;;  %v769_v34 = vadd.f32 1.0, %v7622_v32 }
 0x1e4   :  { %7631 = vpow2.f32 %v6166_v43  ;;  %v7624_v16 = vpop.eup %7623 }
 0x1e5   :  { %7633 = vrcp.f32 %v769_v34  ;;  %v758_v12 = vadd.f32 1.0, %v7624_v16 }
 0x1e6   :  { %v7626_v20 = vpop.eup %7625  ;;  %7635 = vpow2.f32 %v6167_v40 }
 0x1e7   :  { %7637 = vtanh.f32 %v749_v31  ;;  %v770_v26 = vadd.f32 1.0, %v7626_v20  ;;  %v7628_v14 = vpop.eup %7627  ;;  %v7941_v20 = vld [vmem:[%s10270_s4 + $0xe8] ss:$16 sps:$4 sm:$0xff]  }
 0x1e8   :  { %7639 = vrcp.f32 %v758_v12  ;;  %v10351_v12 = vmov 0  }
 0x1e9   :  { %7641 = vrcp.f32 %v770_v26  ;;  %v7942_v26 = vld [vmem:[%s10270_s4 + $0xcc] ss:$16 sps:$4 sm:$0xff]  }
 0x1f0   :  { %v7630_v22 = vpop.eup %7629 }
 0x1f1   :  { %v7632_v15 = vpop.eup %7631  ;;  %v791_v27 = vmul.f32 %v7630_v22, %v7628_v14  ;;  %v7943_v14 = vld [vmem:[%s10270_s4 + $0xc8] ss:$16 sps:$4 sm:$0xff]   ;;  %v7944_v22 = vld [vmem:[%s10270_s4 + $0xac] ss:$16 sps:$4 sm:$0xff]  }
 0x1f2   :  { %v7634_v4 = vpop.eup %7633  ;;  %v783_v29 = vadd.f32 1.0, %v7632_v15  ;;  %v8549_v15 = vld [vmem:[%s10270_s4 + $0xe0] ss:$16 sps:$4 sm:$0xff]  }
 0x1f3   :  { %v7636_v17 = vpop.eup %7635  ;;  %v789_v24 = vmul.f32 0.0, %v7634_v4  ;;  %v7279_v4 = vld [vmem:[%s10269_s2 + $0x30] sm:$0xff]  }
 0x1f4   :  { %v7638_v33 = vpop.eup %7637  ;;  %v784_v36 = vadd.f32 1.0, %v7636_v17  ;;  %7643 = vrcp.f32 %v783_v29  ;;  %v8560_v17 = vld [vmem:[%s10270_s4 + $0xc4] ss:$16 sps:$4 sm:$0xff]   ;;  %v8581_v29 = vld [vmem:[%s10270_s4 + $0xa0] ss:$16 sps:$4 sm:$0xff]  }
 0x1f5   :  { %v7640_v13 = vpop.eup %7639  ;;  %v8448_v25 = vadd.f32 %v791_v27, %v789_v24  ;;  %v8565_v24 = vld [vmem:[%s10270_s4 + $0xc0] ss:$16 sps:$4 sm:$0xff]   ;;  %v7283_v27 = vld [vmem:[%s10269_s2 + $0x28] sm:$0xff]  }
 0x1f6   :  { %v7642_v18 = vpop.eup %7641  ;;  %v792_v0 = vmul.f32 %v7640_v13, %v7638_v33  ;;  %v8576_v33 = vld [vmem:[%s10270_s4 + $0xa4] ss:$16 sps:$4 sm:$0xff]  }
 0x1f7   :  { %v790_v37 = vmul.f32 0.0, %v7642_v18  ;;  %7645 = vtanh.f32 %v8448_v25  ;;  %v7287_v13 = vld [vmem:[%s10269_s2 + $0x20] sm:$0xff]  }
 0x1f8   :  { %7647 = vrcp.f32 %v784_v36  ;;  %v8592_v18 = vld [vmem:[%s10270_s4 + $0x80] ss:$16 sps:$4 sm:$0xff]   ;;  %v8597_v36 = vld [vmem:[%s10270_s4 + $0x84] ss:$16 sps:$4 sm:$0xff]  }
 0x1f9   :  { %v8451_v35 = vadd.f32 %v792_v0, %v790_v37  ;;  %v8602_v37 = vld [vmem:[%s10270_s4 + $0x64] ss:$16 sps:$4 sm:$0xff]   ;;  %v7291_v0 = vld [vmem:[%s10269_s2 + $0x18] sm:$0xff]  }
 0x1fb   :  { %7649 = vtanh.f32 %v8451_v35 }
 0x201   :  { %v7644_v43 = vpop.eup %7643 }
 0x204   :  { %v7646_v30 = vpop.eup %7645 }
 0x205   :  { %v7648_v32 = vpop.eup %7647  ;;  %v797_v34 = vmul.f32 %v7646_v30, %v7644_v43  ;;  %v8613_v43 = vld [vmem:[%s10270_s4 + $0x60] ss:$16 sps:$4 sm:$0xff]   ;;  %v8619_v30 = vld [vmem:[%s10270_s4 + $0x44] ss:$16 sps:$4 sm:$0xff]  }
 0x208   :  { %v7650_v40 = vpop.eup %7649 }
 0x209   :  { %v798_v31 = vmul.f32 %v7650_v40, %v7648_v32  ;;  %v7295_v32 = vld [vmem:[%s10269_s2 + $0x10] sm:$0xff]  }
 0x20a   :  { %v8629_v40 = vld [vmem:[%s10270_s4 + $0x40] ss:$16 sps:$4 sm:$0xff]  }
 0x20b   :  { %v799_v16 = vpack.c.bf16 %v798_v31, %v797_v34  ;;  %v8635_v34 = vld [vmem:[%s10270_s4 + $0x24] ss:$16 sps:$4 sm:$0xff]   ;;  %v7299_v31 = vld [vmem:[%s10269_s2 + $0x8] sm:$0xff]  }
 0x20d   :  { %6814 = vst [vmem:[%s10275_s6] sm:$0xff] %v799_v16   ;;  %7036 = vmatmul.mubr.bf16.vlgmr.msra.gmra.mxu1 %v799_v16  ;;  %1196 = vmatmul.mubr.bf16.vlgmr.msra.gmra.mxu0 %v799_v16 }
 0x20e   :  { %1207 = vmatpush1.bf16.msra.mxu1 %v7941_v20  ;;  %1238 = vmatprep.mubr.bf16.mxu1 %v10351_v12  ;;  %v8651_v20 = vld [vmem:[%s10270_s4 + $0x4] ss:$16 sps:$4 sm:$0xff]  }
 0x20f   :  { %1208 = vmatprep.subr.bf16.mxu1 %v7942_v26  ;;  %1410 = vmatpush1.bf16.msra.mxu0 %v8165_v44  ;;  %v7945_v44 = vld [vmem:[%s10270_s4 + $0xa8] ss:$16 sps:$4 sm:$0xff]   ;;  %v7303_v26 = vld [vmem:[%s10269_s2] sm:$0xff]  }
 0x210   :  { %1411 = vmatprep.subr.bf16.mxu0 %v8184_v47  ;;  %1441 = vmatprep.mubr.bf16.mxu0 %v10351_v12  ;;  %v7946_v47 = vld [vmem:[%s10270_s4 + $0x8c] ss:$16 sps:$4 sm:$0xff]  }
 0x212   :  { %1209 = vmatpush1.bf16.msra.mxu1 %v7943_v14  ;;  %v8661_v14 = vld [vmem:[%s10270_s4] ss:$16 sps:$4 sm:$0xff]  }
 0x213   :  { %1210 = vmatprep.subr.bf16.mxu1 %v7944_v22  ;;  %1412 = vmatpush1.bf16.msra.mxu0 %v8195_v49  ;;  %v7947_v49 = vld [vmem:[%s10270_s4 + $0x88] ss:$16 sps:$4 sm:$0xff]   ;;  %v8666_v22 = vld [vmem:[%s10270_s4 + $0xec] ss:$16 sps:$4 sm:$0xff]  }
 0x214   :  { %1413 = vmatprep.subr.bf16.mxu0 %v8208_v51  ;;  %v7948_v51 = vld [vmem:[%s10270_s4 + $0x6c] ss:$16 sps:$4 sm:$0xff]  }
 0x216   :  { %1211 = vmatpush1.bf16.msra.mxu1 %v7945_v44 }
 0x217   :  { %1212 = vmatprep.subr.bf16.mxu1 %v7946_v47  ;;  %1414 = vmatpush1.bf16.msra.mxu0 %v8219_v53  ;;  %v7949_v53 = vld [vmem:[%s10270_s4 + $0x68] ss:$16 sps:$4 sm:$0xff]  }
 0x218   :  { %1415 = vmatprep.subr.bf16.mxu0 %v8232_v55  ;;  %v7950_v55 = vld [vmem:[%s10270_s4 + $0x4c] ss:$16 sps:$4 sm:$0xff]  }
 0x21a   :  { %1213 = vmatpush1.bf16.msra.mxu1 %v7947_v49 }
 0x21b   :  { %1214 = vmatprep.subr.bf16.mxu1 %v7948_v51  ;;  %1416 = vmatpush1.bf16.msra.mxu0 %v8243_v57  ;;  %v7951_v57 = vld [vmem:[%s10270_s4 + $0x48] ss:$16 sps:$4 sm:$0xff]  }
 0x21c   :  { %1417 = vmatprep.subr.bf16.mxu0 %v8261_v60 }
 0x21e   :  { %1215 = vmatpush1.bf16.msra.mxu1 %v7949_v53 }
 0x21f   :  { %1216 = vmatprep.subr.bf16.mxu1 %v7950_v55  ;;  %1418 = vmatpush1.bf16.msra.mxu0 %v8256_v59  ;;  %v10352_v59 = vmov 0.0  }
 0x220   :  { %1419 = vmatprep.subr.bf16.mxu0 %v8277_v63 }
 0x222   :  { %1217 = vmatpush1.bf16.msra.mxu1 %v7951_v57 }
 0x223   :  { %1218 = vmatprep.subr.bf16.mxu1 %v8131_v38  ;;  %1420 = vmatpush1.bf16.msra.mxu0 %v8290_v2  ;;  %v10353_v38 = vld [vmem:[#allocation4_spill] sm:$0xff] }
 0x224   :  { %1421 = vmatprep.subr.bf16.mxu0 %v8301_v5 }
 0x226   :  { %1219 = vmatpush1.bf16.msra.mxu1 %v8137_v39  ;;  %v6907_v39 = vld [vmem:[%s10272_s1 + $0x8] sm:$0xff]  }
 0x227   :  { %1220 = vmatprep.subr.bf16.mxu1 %v8146_v41  ;;  %1422 = vmatpush1.bf16.msra.mxu0 %v8307_v6  ;;  %v6821_v41 = vunpack.c.l.bf16 %v6907_v39 }
 0x228   :  { %1423 = vmatprep.subr.bf16.mxu0 %v8318_v8 }
 0x22a   :  { %1221 = vmatpush1.bf16.msra.mxu1 %v8152_v42 }
 0x22b   :  { %1452 = vmatprep.subr.bf16.mxu1 %v8176_v46  ;;  %1424 = vmatpush1.bf16.msra.mxu0 %v8336_v11  ;;  %v6822_v46 = vunpack.c.h.bf16 %v6907_v39  ;;  %v8544_v11 = vld [vmem:[%s10270_s4 + $0xe4] ss:$16 sps:$4 sm:$0xff]  }
 0x22c   :  { %7039 = vmatprep.subr.bf16.mxu0 %v10352_v59 }
 0x22d   :  { %1239 = vmatmul.mubr.bf16.vlgmr.msra.gmra.mxu1 %v799_v16  ;;  %v8645_v16 = vld [vmem:[%s10270_s4 + $0x20] ss:$16 sps:$4 sm:$0xff]  }
 0x22e   :  { %1453 = vmatpush1.bf16.msra.mxu1 %v8171_v45  ;;  %1484 = vmatprep.mubr.bf16.mxu1 %v10351_v12 }
 0x22f   :  { %1454 = vmatprep.subr.bf16.mxu1 %v8189_v48 }
 0x232   :  { %1455 = vmatpush1.bf16.msra.mxu1 %v8200_v50 }
 0x233   :  { %1456 = vmatprep.subr.bf16.mxu1 %v8213_v52 }
 0x236   :  { %1457 = vmatpush1.bf16.msra.mxu1 %v8224_v54 }
 0x237   :  { %1458 = vmatprep.subr.bf16.mxu1 %v8237_v56 }
 0x23a   :  { %1459 = vmatpush1.bf16.msra.mxu1 %v8248_v58 }
 0x23b   :  { %1460 = vmatprep.subr.bf16.mxu1 %v8272_v62 }
 0x23e   :  { %1461 = vmatpush1.bf16.msra.mxu1 %v8267_v61 }
 0x23f   :  { %1462 = vmatprep.subr.bf16.mxu1 %v8283_v1  ;;  %v6906_v1 = vld [vmem:[%s10273_s0 + $0x8] sm:$0xff]  }
 0x240   :  { %v6817_v2 = vunpack.c.l.bf16 %v6906_v1 }
 0x242   :  { %1463 = vmatpush1.bf16.msra.mxu1 %v8296_v3  ;;  %v6818_v3 = vunpack.c.h.bf16 %v6906_v1 }
 0x243   :  { %1464 = vmatprep.subr.bf16.mxu1 %v8312_v7 }
 0x246   :  { %1465 = vmatpush1.bf16.msra.mxu1 %v8324_v9 }
 0x247   :  { %1466 = vmatprep.subr.bf16.mxu1 %v8330_v10  ;;  %v7275_v10 = vld [vmem:[%s10269_s2 + $0x38] sm:$0xff]  }
 0x24a   :  { %1467 = vmatpush1.bf16.msra.mxu1 %v10353_v38 }
 0x24b   :  { %1916 = vmatprep.subr.bf16.mxu1 %v8544_v11 }
 0x2cd   :  { %v915_v42 = vpop.f32.mrf.mxu1  ;;  %v1197_v44 = vpop.f32.mrf.mxu0 }
 0x2ce   :  { %v916_v45 = vadd.f32 %v6821_v41, %v915_v42 }
 0x2cf   :  { %v7037_v48 = vpop.f32.mrf.mxu1  ;;  %v1199_v49 = vpop.f32.mrf.mxu0 }
 0x2d0   :  { %v6182_v50 = vmul.f32 -1.442695, %v916_v45 }
 0x2d1   :  { %v918_v52 = vpop.f32.mrf.mxu1  ;;  %v1201_v53 = vpop.f32.mrf.mxu0 }
 0x2d2   :  { %7651 = vpow2.f32 %v6182_v50  ;;  %v919_v54 = vadd.f32 %v6822_v46, %v918_v52 }
 0x2d3   :  { %v7038_v56 = vpop.f32.mrf.mxu1  ;;  %v1203_v57 = vpop.f32.mrf.mxu0 }
 0x2d4   :  { %v6183_v58 = vmul.f32 -1.442695, %v919_v54 }
 0x2d6   :  { %7653 = vpow2.f32 %v6183_v58 }
 0x2df   :  { %v7652_v60 = vpop.eup %7651 }
 0x2e0   :  { %v928_v61 = vadd.f32 1.0, %v7652_v60 }
 0x2e2   :  { %7655 = vrcp.f32 %v928_v61 }
 0x2e3   :  { %v7654_v62 = vpop.eup %7653 }
 0x2e4   :  { %v929_v63 = vadd.f32 1.0, %v7654_v62 }
 0x2e6   :  { %7657 = vrcp.f32 %v929_v63 }
 0x2ed   :  { %v1240_v47 = vpop.f32.mrf.mxu1 }
 0x2ef   :  { %v7656_v5 = vpop.eup %7655  ;;  %v1242_v51 = vpop.f32.mrf.mxu1 }
 0x2f0   :  { %v936_v7 = vmul.f32 %v7656_v5, %v6817_v2 }
 0x2f1   :  { %v1244_v55 = vpop.f32.mrf.mxu1 }
 0x2f3   :  { %v7658_v6 = vpop.eup %7657  ;;  %v1246_v38 = vpop.f32.mrf.mxu1 }
 0x2f4   :  { %v937_v8 = vmul.f32 %v7658_v6, %v6818_v3 }
 0x2f6   :  { %v938_v9 = vpack.c.bf16 %v937_v8, %v936_v7 }
 0x2f8   :  { %1442 = vmatmul.mubr.bf16.vlgmr.msra.gmra.mxu0 %v938_v9  ;;  %1485 = vmatmul.mubr.bf16.vlgmr.msra.gmra.mxu1 %v938_v9 }
 0x2f9   :  { %7055 = vmatprep.mubr.msk.bf16.mxu0 %vm7953_vm0, %v10352_v59  ;;  %1948 = vmatprep.mubr.bf16.mxu1 %v10351_v12 }
 0x2fa   :  { %7040 = vmatpush3.bf16.msra.mxu0 %v7275_v10  ;;  %1917 = vmatpush1.bf16.msra.mxu1 %v8549_v15 }
 0x2fb   :  { %7041 = vmatprep.subr.bf16.mxu0 %v10352_v59  ;;  %1918 = vmatprep.subr.bf16.mxu1 %v8560_v17 }
 0x2fe   :  { %7042 = vmatpush3.bf16.msra.mxu0 %v7279_v4  ;;  %1919 = vmatpush1.bf16.msra.mxu1 %v8565_v24 }
 0x2ff   :  { %7043 = vmatprep.subr.bf16.mxu0 %v10352_v59  ;;  %1920 = vmatprep.subr.bf16.mxu1 %v8576_v33 }
 0x302   :  { %7044 = vmatpush3.bf16.msra.mxu0 %v7283_v27  ;;  %1921 = vmatpush1.bf16.msra.mxu1 %v8581_v29 }
 0x303   :  { %7045 = vmatprep.subr.bf16.mxu0 %v10352_v59  ;;  %1922 = vmatprep.subr.bf16.mxu1 %v8597_v36 }
 0x306   :  { %7046 = vmatpush3.bf16.msra.mxu0 %v7287_v13  ;;  %1923 = vmatpush1.bf16.msra.mxu1 %v8592_v18 }
 0x307   :  { %7047 = vmatprep.subr.bf16.mxu0 %v10352_v59  ;;  %1924 = vmatprep.subr.bf16.mxu1 %v8602_v37 }
 0x30a   :  { %7048 = vmatpush3.bf16.msra.mxu0 %v7291_v0  ;;  %1925 = vmatpush1.bf16.msra.mxu1 %v8613_v43 }
 0x30b   :  { %7049 = vmatprep.subr.bf16.mxu0 %v10352_v59  ;;  %1926 = vmatprep.subr.bf16.mxu1 %v8619_v30 }
 0x30e   :  { %7050 = vmatpush3.bf16.msra.mxu0 %v7295_v32  ;;  %1927 = vmatpush1.bf16.msra.mxu1 %v8629_v40 }
 0x30f   :  { %7051 = vmatprep.subr.bf16.mxu0 %v10352_v59  ;;  %1928 = vmatprep.subr.bf16.mxu1 %v8635_v34 }
 0x312   :  { %7052 = vmatpush3.bf16.msra.mxu0 %v7299_v31  ;;  %1929 = vmatpush1.bf16.msra.mxu1 %v8645_v16 }
 0x313   :  { %7053 = vmatprep.subr.bf16.mxu0 %v10352_v59  ;;  %1930 = vmatprep.subr.bf16.mxu1 %v8651_v20 }
 0x316   :  { %7054 = vmatpush3.bf16.msra.mxu0 %v7303_v26  ;;  %1931 = vmatpush1.bf16.msra.mxu1 %v8661_v14 }
 0x317   :  { %1959 = vmatprep.subr.bf16.mxu0 %v8666_v22 }
 0x3b8   :  { %v1443_v39 = vpop.f32.mrf.mxu0  ;;  %v1486_v41 = vpop.f32.mrf.mxu1 }
 0x3b9   :  { %v1444_v42 = vadd.f32 %v1443_v39, %v1197_v44  ;;  %v1487_v8 = vadd.f32 %v1486_v41, %v1240_v47 }
 0x3ba   :  { %v1445_v45 = vpop.f32.mrf.mxu0  ;;  %v1488_v50 = vpop.f32.mrf.mxu1 }
 0x3bb   :  { %v1495_v46 = vadd.f32 %v1444_v42, %v8432_v23  ;;  %v1446_v48 = vadd.f32 %v1445_v45, %v1199_v49  ;;  %v1489_v7 = vadd.f32 %v1488_v50, %v1242_v51  ;;  %v1497_v4 = vadd.f32 %v1487_v8, %v8442_v21  ;;  %v8695_v8 = vld [vmem:[%s10270_s4 + $0xcc] ss:$16 sps:$4 sm:$0xff]  }
 0x3bc   :  { %v1447_v52 = vpop.f32.mrf.mxu0  ;;  %v1490_v62 = vpop.f32.mrf.mxu1 }
 0x3bd   :  { %v6248_v54 = vmul.f32 -1.442695, %v1495_v46  ;;  %v1496_v56 = vadd.f32 %v1446_v48, %v8434_v28  ;;  %v1448_v58 = vadd.f32 %v1447_v52, %v1201_v53  ;;  %v1498_v10 = vadd.f32 %v1489_v7, %v8440_v19  ;;  %v8690_v7 = vld [vmem:[%s10270_s4 + $0xe8] ss:$16 sps:$4 sm:$0xff]  }
 0x3be   :  { %v1449_v60 = vpop.f32.mrf.mxu0  ;;  %v1492_v6 = vpop.f32.mrf.mxu1  ;;  %v1491_v13 = vadd.f32 %v1490_v62, %v1244_v55 }
 0x3bf   :  { %7659 = vpow2.f32 %v6248_v54  ;;  %v6250_v61 = vmul.f32 -1.442695, %v1496_v56  ;;  %v1450_v63 = vadd.f32 %v1449_v60, %v1203_v57  ;;  %v1499_v1 = vadd.f32 %v1448_v58, %v8432_v23 }
 0x3c0   :  { %v1493_v9 = vadd.f32 %v1492_v6, %v1246_v38  ;;  %v6252_v32 = vmul.f32 -1.442695, %v1498_v10  ;;  %v1501_v51 = vadd.f32 %v1491_v13, %v8442_v21  ;;  %v8711_v10 = vld [vmem:[%s10270_s4 + $0xac] ss:$16 sps:$4 sm:$0xff]   ;;  %v8730_v13 = vld [vmem:[%s10270_s4 + $0x88] ss:$16 sps:$4 sm:$0xff]  }
 0x3c1   :  { %7661 = vpow2.f32 %v6250_v61  ;;  %v1500_v2 = vadd.f32 %v1450_v63, %v8434_v28  ;;  %v6249_v3 = vmul.f32 -1.442695, %v1499_v1 }
 0x3c2   :  { %v1502_v27 = vadd.f32 %v1493_v9, %v8440_v19  ;;  %v8704_v9 = vld [vmem:[%s10270_s4 + $0xc8] ss:$16 sps:$4 sm:$0xff]  }
 0x3c3   :  { %v6251_v5 = vmul.f32 -1.442695, %v1500_v2  ;;  %7663 = vpow2.f32 %v6249_v3 }
 0x3c4   :  { %v6253_v44 = vmul.f32 -1.442695, %v1502_v27  ;;  %v8724_v27 = vld [vmem:[%s10270_s4 + $0x8c] ss:$16 sps:$4 sm:$0xff]  }
 0x3c5   :  { %7665 = vpow2.f32 %v6251_v5 }
 0x3c6   :  { %7667 = vtanh.f32 %v1497_v4  ;;  %v8718_v4 = vld [vmem:[%s10270_s4 + $0xa8] ss:$16 sps:$4 sm:$0xff]  }
 0x3cc   :  { %v7660_v0 = vpop.eup %7659 }
 0x3cd   :  { %v1509_v31 = vadd.f32 1.0, %v7660_v0  ;;  %v8736_v0 = vld [vmem:[%s10270_s4 + $0x6c] ss:$16 sps:$4 sm:$0xff]  }
 0x3ce   :  { %v7662_v26 = vpop.eup %7661 }
 0x3cf   :  { %7669 = vrcp.f32 %v1509_v31  ;;  %v1521_v49 = vadd.f32 1.0, %v7662_v26  ;;  %v8748_v31 = vld [vmem:[%s10270_s4 + $0x4c] ss:$16 sps:$4 sm:$0xff]   ;;  %v8754_v26 = vld [vmem:[%s10270_s4 + $0x48] ss:$16 sps:$4 sm:$0xff]  }
 0x3d0   :  { %7671 = vpow2.f32 %v6252_v32  ;;  %v7664_v47 = vpop.eup %7663  ;;  %v8742_v32 = vld [vmem:[%s10270_s4 + $0x68] ss:$16 sps:$4 sm:$0xff]  }
 0x3d1   :  { %7673 = vrcp.f32 %v1521_v49  ;;  %v1510_v57 = vadd.f32 1.0, %v7664_v47  ;;  %v8766_v49 = vld [vmem:[%s10270_s4 + $0x28] ss:$16 sps:$4 sm:$0xff]  }
 0x3d2   :  { %v7666_v53 = vpop.eup %7665  ;;  %7675 = vpow2.f32 %v6253_v44  ;;  %v8760_v44 = vld [vmem:[%s10270_s4 + $0x2c] ss:$16 sps:$4 sm:$0xff]   ;;  %10354 = vst [vmem:[#allocation4_spill] sm:$0xff] %v8766_v49  ;;  %v8778_v47 = vld [vmem:[%s10270_s4 + $0x8] ss:$16 sps:$4 sm:$0xff]  }
 0x3d3   :  { %7677 = vtanh.f32 %v1501_v51  ;;  %v1522_v38 = vadd.f32 1.0, %v7666_v53  ;;  %v7668_v55 = vpop.eup %7667  ;;  %v8772_v51 = vld [vmem:[%s10270_s4 + $0xc] ss:$16 sps:$4 sm:$0xff]   ;;  %10356 = vst [vmem:[#allocation6_spill] sm:$0xff] %v8778_v47  ;;  %v8786_v53 = vld [vmem:[%s10271_s3 + $0xe4] ss:$16 sps:$4 sm:$0xff]  }
 0x3d4   :  { %7679 = vrcp.f32 %v1510_v57  ;;  %10355 = vst [vmem:[#allocation5_spill] sm:$0xff] %v8772_v51  ;;  %v8791_v57 = vld [vmem:[%s10271_s3 + $0xec] ss:$16 sps:$4 sm:$0xff]   ;;  %2162 = vmatprep.subr.bf16.mxu1 %v8786_v53 }
 0x3d5   :  { %7681 = vrcp.f32 %v1522_v38  ;;  %10357 = vst [vmem:[#allocation7_spill] sm:$0xff] %v8791_v57  ;;  %v8796_v38 = vld [vmem:[%s10271_s3 + $0xe0] ss:$16 sps:$4 sm:$0xff]  }
 0x3dc   :  { %v7670_v39 = vpop.eup %7669 }
 0x3dd   :  { %v7672_v41 = vpop.eup %7671  ;;  %v1543_v46 = vmul.f32 %v7670_v39, %v7668_v55  ;;  %v8801_v55 = vld [vmem:[%s10271_s3 + $0xe8] ss:$16 sps:$4 sm:$0xff]   ;;  %v8810_v39 = vld [vmem:[%s10271_s3 + $0xc4] ss:$16 sps:$4 sm:$0xff]  }
 0x3de   :  { %v7674_v42 = vpop.eup %7673  ;;  %v1535_v52 = vadd.f32 1.0, %v7672_v41  ;;  %10358 = vst [vmem:[#allocation8_spill] sm:$0xff] %v8801_v55  ;;  %v8815_v41 = vld [vmem:[%s10271_s3 + $0xcc] ss:$16 sps:$4 sm:$0xff]  }
 0x3df   :  { %v7676_v45 = vpop.eup %7675  ;;  %v1541_v48 = vmul.f32 %v7674_v42, %v8448_v25  ;;  %10359 = vst [vmem:[#allocation9_spill] sm:$0xff] %v8815_v41  ;;  %v8820_v42 = vld [vmem:[%s10271_s3 + $0xc0] ss:$16 sps:$4 sm:$0xff]  }
 0x3e0   :  { %v7678_v50 = vpop.eup %7677  ;;  %v1536_v60 = vadd.f32 1.0, %v7676_v45  ;;  %7683 = vrcp.f32 %v1535_v52  ;;  %v8825_v45 = vld [vmem:[%s10271_s3 + $0xc8] ss:$16 sps:$4 sm:$0xff]  }
 0x3e1   :  { %v7680_v54 = vpop.eup %7679  ;;  %v8680_v56 = vadd.f32 %v1543_v46, %v1541_v48  ;;  %10360 = vst [vmem:[#allocation10_spill] sm:$0xff] %v8825_v45  ;;  %v8834_v46 = vld [vmem:[%s10271_s3 + $0xa4] ss:$16 sps:$4 sm:$0xff]   ;;  %v8839_v48 = vld [vmem:[%s10271_s3 + $0xac] ss:$16 sps:$4 sm:$0xff]  }
 0x3e2   :  { %v7682_v58 = vpop.eup %7681  ;;  %v1544_v61 = vmul.f32 %v7680_v54, %v7678_v50  ;;  %10361 = vst [vmem:[#allocation11_spill] sm:$0xff] %v8839_v48  ;;  %v8844_v50 = vld [vmem:[%s10271_s3 + $0xa0] ss:$16 sps:$4 sm:$0xff]   ;;  %v8849_v52 = vld [vmem:[%s10271_s3 + $0xa8] ss:$16 sps:$4 sm:$0xff]  }
 0x3e3   :  { %v1542_v62 = vmul.f32 %v7682_v58, %v8451_v35  ;;  %7685 = vtanh.f32 %v8680_v56  ;;  %10362 = vst [vmem:[#allocation12_spill] sm:$0xff] %v8849_v52  ;;  %v8858_v54 = vld [vmem:[%s10271_s3 + $0x84] ss:$16 sps:$4 sm:$0xff]   ;;  %v8863_v58 = vld [vmem:[%s10271_s3 + $0x8c] ss:$16 sps:$4 sm:$0xff]  }
 0x3e4   :  { %7687 = vrcp.f32 %v1536_v60  ;;  %10363 = vst [vmem:[#allocation13_spill] sm:$0xff] %v8863_v58  ;;  %v8868_v60 = vld [vmem:[%s10271_s3 + $0x80] ss:$16 sps:$4 sm:$0xff]  }
 0x3e5   :  { %v8683_v63 = vadd.f32 %v1544_v61, %v1542_v62  ;;  %v8873_v61 = vld [vmem:[%s10271_s3 + $0x88] ss:$16 sps:$4 sm:$0xff]   ;;  %v8880_v62 = vld [vmem:[%s10271_s3 + $0x64] ss:$16 sps:$4 sm:$0xff]  }
 0x3e6   :  { %10364 = vst [vmem:[#allocation14_spill] sm:$0xff] %v8873_v61 }
 0x3e7   :  { %7689 = vtanh.f32 %v8683_v63 }
 0x3ed   :  { %v7684_v1 = vpop.eup %7683 }
 0x3f0   :  { %v7686_v25 = vpop.eup %7685 }
 0x3f1   :  { %v7688_v2 = vpop.eup %7687  ;;  %v1549_v5 = vmul.f32 %v7686_v25, %v7684_v1  ;;  %v8887_v1 = vld [vmem:[%s10271_s3 + $0x60] ss:$16 sps:$4 sm:$0xff]   ;;  %v8892_v25 = vld [vmem:[%s10271_s3 + $0x68] ss:$16 sps:$4 sm:$0xff]  }
 0x3f2   :  { %10365 = vst [vmem:[#allocation15_spill] sm:$0xff] %v8892_v25 }
 0x3f4   :  { %v7690_v3 = vpop.eup %7689 }
 0x3f5   :  { %v1550_v6 = vmul.f32 %v7690_v3, %v7688_v2  ;;  %v8897_v2 = vld [vmem:[%s10271_s3 + $0x6c] ss:$16 sps:$4 sm:$0xff]   ;;  %v8906_v3 = vld [vmem:[%s10271_s3 + $0x44] ss:$16 sps:$4 sm:$0xff]  }
 0x3f6   :  { %10366 = vst [vmem:[#allocation16_spill] sm:$0xff] %v8897_v2 }
 0x3f7   :  { %v1551_v35 = vpack.c.bf16 %v1550_v6, %v1549_v5  ;;  %v8911_v5 = vld [vmem:[%s10271_s3 + $0x4c] ss:$16 sps:$4 sm:$0xff]   ;;  %v8916_v6 = vld [vmem:[%s10271_s3 + $0x40] ss:$16 sps:$4 sm:$0xff]  }
 0x3f8   :  { %10367 = vst [vmem:[#allocation17_spill] sm:$0xff] %v8911_v5 }
 0x3f9   :  { %6908 = vst [vmem:[%s10275_s6 + $0x8] sm:$0xff] %v1551_v35   ;;  %7056 = vmatmul.mubr.bf16.vlgmr.msra.gmra.mxu0 %v1551_v35  ;;  %1949 = vmatmul.mubr.bf16.vlgmr.msra.gmra.mxu1 %v1551_v35 }
 0x3fa   :  { %1960 = vmatpush1.bf16.msra.mxu0 %v8690_v7  ;;  %1991 = vmatprep.mubr.bf16.mxu0 %v10351_v12 }
 0x3fb   :  { %1961 = vmatprep.subr.bf16.mxu0 %v8695_v8  ;;  %2194 = vmatprep.mubr.bf16.mxu1 %v10351_v12 }
 0x3fc   :  { %2163 = vmatpush1.bf16.msra.mxu1 %v8796_v38 }
 0x3fd   :  { %2164 = vmatprep.subr.bf16.mxu1 %v8810_v39 }
 0x3fe   :  { %1962 = vmatpush1.bf16.msra.mxu0 %v8704_v9 }
 0x3ff   :  { %1963 = vmatprep.subr.bf16.mxu0 %v8711_v10 }
 0x400   :  { %2165 = vmatpush1.bf16.msra.mxu1 %v8820_v42 }
 0x401   :  { %2166 = vmatprep.subr.bf16.mxu1 %v8834_v46 }
 0x402   :  { %1964 = vmatpush1.bf16.msra.mxu0 %v8718_v4 }
 0x403   :  { %1965 = vmatprep.subr.bf16.mxu0 %v8724_v27 }
 0x404   :  { %2167 = vmatpush1.bf16.msra.mxu1 %v8844_v50 }
 0x405   :  { %2168 = vmatprep.subr.bf16.mxu1 %v8858_v54 }
 0x406   :  { %1966 = vmatpush1.bf16.msra.mxu0 %v8730_v13 }
 0x407   :  { %1967 = vmatprep.subr.bf16.mxu0 %v8736_v0 }
 0x408   :  { %2169 = vmatpush1.bf16.msra.mxu1 %v8868_v60 }
 0x409   :  { %2170 = vmatprep.subr.bf16.mxu1 %v8880_v62 }
 0x40a   :  { %1968 = vmatpush1.bf16.msra.mxu0 %v8742_v32 }
 0x40b   :  { %1969 = vmatprep.subr.bf16.mxu0 %v8748_v31 }
 0x40c   :  { %2171 = vmatpush1.bf16.msra.mxu1 %v8887_v1 }
 0x40d   :  { %2172 = vmatprep.subr.bf16.mxu1 %v8906_v3 }
 0x40e   :  { %1970 = vmatpush1.bf16.msra.mxu0 %v8754_v26 }
 0x40f   :  { %1971 = vmatprep.subr.bf16.mxu0 %v8760_v44 }
 0x410   :  { %2173 = vmatpush1.bf16.msra.mxu1 %v8916_v6 }
 0x412   :  { %1972 = vmatpush1.bf16.msra.mxu0 %v8766_v49 }
 0x413   :  { %1973 = vmatprep.subr.bf16.mxu0 %v8772_v51 }
 0x416   :  { %1974 = vmatpush1.bf16.msra.mxu0 %v8778_v47 }
 0x417   :  { %2205 = vmatprep.subr.bf16.mxu0 %v8791_v57 }
 0x419   :  { %1992 = vmatmul.mubr.bf16.vlgmr.msra.gmra.mxu0 %v1551_v35  ;;  %v8921_v35 = vld [vmem:[%s10271_s3 + $0x48] ss:$16 sps:$4 sm:$0xff]  }
 0x41a   :  { %2237 = vmatprep.mubr.bf16.mxu0 %v10351_v12  ;;  %2206 = vmatpush1.bf16.msra.mxu0 %v8801_v55  ;;  %10368 = vst [vmem:[#allocation18_spill] sm:$0xff] %v8921_v35 }
 0x41b   :  { %2207 = vmatprep.subr.bf16.mxu0 %v8815_v41 }
 0x41e   :  { %2208 = vmatpush1.bf16.msra.mxu0 %v8825_v45 }
 0x41f   :  { %2209 = vmatprep.subr.bf16.mxu0 %v8839_v48 }
 0x422   :  { %2210 = vmatpush1.bf16.msra.mxu0 %v8849_v52  ;;  %v8964_v52 = vld [vmem:[%s10271_s3 + $0x8] ss:$16 sps:$4 sm:$0xff]  }
 0x423   :  { %2211 = vmatprep.subr.bf16.mxu0 %v8863_v58  ;;  %v8959_v58 = vld [vmem:[%s10271_s3 + $0x4] ss:$16 sps:$4 sm:$0xff]   ;;  %10375 = vst [vmem:[#allocation25_spill] sm:$0xff] %v8964_v52 }
 0x424   :  { %10374 = vst [vmem:[#allocation24_spill] sm:$0xff] %v8959_v58 }
 0x426   :  { %2212 = vmatpush1.bf16.msra.mxu0 %v8873_v61  ;;  %v8940_v61 = vld [vmem:[%s10271_s3 + $0x20] ss:$16 sps:$4 sm:$0xff]  }
 0x427   :  { %2213 = vmatprep.subr.bf16.mxu0 %v8897_v2  ;;  %v8935_v2 = vld [vmem:[%s10271_s3 + $0x2c] ss:$16 sps:$4 sm:$0xff]   ;;  %10371 = vst [vmem:[#allocation21_spill] sm:$0xff] %v8940_v61 }
 0x428   :  { %10370 = vst [vmem:[#allocation20_spill] sm:$0xff] %v8935_v2 }
 0x42a   :  { %2214 = vmatpush1.bf16.msra.mxu0 %v8892_v25  ;;  %v8930_v25 = vld [vmem:[%s10271_s3 + $0x24] ss:$16 sps:$4 sm:$0xff]  }
 0x42b   :  { %2215 = vmatprep.subr.bf16.mxu0 %v8911_v5  ;;  %10369 = vst [vmem:[#allocation19_spill] sm:$0xff] %v8930_v25  ;;  %v8945_v5 = vld [vmem:[%s10271_s3 + $0x28] ss:$16 sps:$4 sm:$0xff]   ;;  %2174 = vmatprep.subr.bf16.mxu1 %v8930_v25  ;;  %v6909_v25 = vld [vmem:[%s10273_s0 + $0x10] sm:$0xff]  }
 0x42c   :  { %10372 = vst [vmem:[#allocation22_spill] sm:$0xff] %v8945_v5  ;;  %2175 = vmatpush1.bf16.msra.mxu1 %v8940_v61 }
 0x42d   :  { %2176 = vmatprep.subr.bf16.mxu1 %v8959_v58 }
 0x42e   :  { %2216 = vmatpush1.bf16.msra.mxu0 %v8921_v35  ;;  %v8954_v35 = vld [vmem:[%s10271_s3] ss:$16 sps:$4 sm:$0xff]  }
 0x42f   :  { %2217 = vmatprep.subr.bf16.mxu0 %v8935_v2  ;;  %10373 = vst [vmem:[#allocation23_spill] sm:$0xff] %v8954_v35  ;;  %v8969_v2 = vld [vmem:[%s10271_s3 + $0xc] ss:$16 sps:$4 sm:$0xff]  }
 0x430   :  { %10376 = vst [vmem:[#allocation26_spill] sm:$0xff] %v8969_v2  ;;  %2177 = vmatpush1.bf16.msra.mxu1 %v8954_v35 }
 0x431   :  { %7059 = vmatprep.subr.bf16.mxu1 %v10352_v59 }
 0x432   :  { %2218 = vmatpush1.bf16.msra.mxu0 %v8945_v5  ;;  %v6910_v5 = vld [vmem:[%s10272_s1 + $0x10] sm:$0xff]  }
 0x433   :  { %2219 = vmatprep.subr.bf16.mxu0 %v8969_v2  ;;  %v6834_v48 = vunpack.c.l.bf16 %v6910_v5  ;;  %v6835_v55 = vunpack.c.h.bf16 %v6910_v5 }
 0x436   :  { %2220 = vmatpush1.bf16.msra.mxu0 %v8964_v52 }
 0x437   :  { %2669 = vmatprep.subr.bf16.mxu0 %v8544_v11 }
 0x4b9   :  { %v1668_v45 = vpop.f32.mrf.mxu0 }
 0x4ba   :  { %v1669_v41 = vadd.f32 %v6834_v48, %v1668_v45  ;;  %v6830_v45 = vunpack.c.l.bf16 %v6909_v25  ;;  %v6831_v48 = vunpack.c.h.bf16 %v6909_v25 }
 0x4bb   :  { %v7057_v57 = vpop.f32.mrf.mxu0 }
 0x4bc   :  { %v6270_v47 = vmul.f32 -1.442695, %v1669_v41 }
 0x4bd   :  { %v1671_v58 = vpop.f32.mrf.mxu0 }
 0x4be   :  { %7691 = vpow2.f32 %v6270_v47  ;;  %v1672_v2 = vadd.f32 %v6835_v55, %v1671_v58 }
 0x4bf   :  { %v7058_v35 = vpop.f32.mrf.mxu0 }
 0x4c0   :  { %v6271_v61 = vmul.f32 -1.442695, %v1672_v2 }
 0x4c2   :  { %7693 = vpow2.f32 %v6271_v61 }
 0x4cb   :  { %v7692_v52 = vpop.eup %7691 }
 0x4cc   :  { %v1681_v51 = vadd.f32 1.0, %v7692_v52 }
 0x4ce   :  { %7695 = vrcp.f32 %v1681_v51 }
 0x4cf   :  { %v7694_v49 = vpop.eup %7693 }
 0x4d0   :  { %v1682_v11 = vadd.f32 1.0, %v7694_v49 }
 0x4d2   :  { %7697 = vrcp.f32 %v1682_v11 }
 0x4db   :  { %v7696_v57 = vpop.eup %7695 }
 0x4dc   :  { %v1689_v5 = vmul.f32 %v7696_v57, %v6830_v45 }
 0x4df   :  { %v7698_v41 = vpop.eup %7697 }
 0x4e0   :  { %v1690_v47 = vmul.f32 %v7698_v41, %v6831_v48 }
 0x4e2   :  { %v1691_v55 = vpack.c.bf16 %v1690_v47, %v1689_v5 }
 0x4e4   :  { %2195 = vmatmul.mubr.bf16.vlgmr.msra.gmra.mxu1 %v1691_v55  ;;  %2238 = vmatmul.mubr.bf16.vlgmr.msra.gmra.mxu0 %v1691_v55 }
 0x4e5   :  { %2670 = vmatpush1.bf16.msra.mxu0 %v8549_v15  ;;  %7075 = vmatprep.mubr.msk.bf16.mxu1 %vm7953_vm0, %v10352_v59  ;;  %v7379_v15 = vld [vmem:[%s10269_s2 + $0x38] sm:$0xff]  }
 0x4e6   :  { %2671 = vmatprep.subr.bf16.mxu0 %v8560_v17  ;;  %2701 = vmatprep.mubr.bf16.mxu0 %v10351_v12  ;;  %v7380_v17 = vld [vmem:[%s10269_s2 + $0x30] sm:$0xff]  }
 0x4e7   :  { %7060 = vmatpush3.bf16.msra.mxu1 %v7379_v15 }
 0x4e8   :  { %7061 = vmatprep.subr.bf16.mxu1 %v10352_v59 }
 0x4e9   :  { %2672 = vmatpush1.bf16.msra.mxu0 %v8565_v24  ;;  %v7381_v24 = vld [vmem:[%s10269_s2 + $0x28] sm:$0xff]  }
 0x4ea   :  { %2673 = vmatprep.subr.bf16.mxu0 %v8576_v33  ;;  %v7382_v33 = vld [vmem:[%s10269_s2 + $0x20] sm:$0xff]  }
 0x4eb   :  { %7062 = vmatpush3.bf16.msra.mxu1 %v7380_v17 }
 0x4ec   :  { %7063 = vmatprep.subr.bf16.mxu1 %v10352_v59 }
 0x4ed   :  { %2674 = vmatpush1.bf16.msra.mxu0 %v8581_v29  ;;  %v7383_v29 = vld [vmem:[%s10269_s2 + $0x18] sm:$0xff]  }
 0x4ee   :  { %2675 = vmatprep.subr.bf16.mxu0 %v8597_v36  ;;  %v7385_v36 = vld [vmem:[%s10269_s2 + $0x8] sm:$0xff]  }
 0x4ef   :  { %7064 = vmatpush3.bf16.msra.mxu1 %v7381_v24 }
 0x4f0   :  { %7065 = vmatprep.subr.bf16.mxu1 %v10352_v59 }
 0x4f1   :  { %2676 = vmatpush1.bf16.msra.mxu0 %v8592_v18  ;;  %v7384_v18 = vld [vmem:[%s10269_s2 + $0x10] sm:$0xff]  }
 0x4f2   :  { %2677 = vmatprep.subr.bf16.mxu0 %v8602_v37  ;;  %v7386_v37 = vld [vmem:[%s10269_s2] sm:$0xff]  }
 0x4f3   :  { %7066 = vmatpush3.bf16.msra.mxu1 %v7382_v33 }
 0x4f4   :  { %7067 = vmatprep.subr.bf16.mxu1 %v10352_v59 }
 0x4f5   :  { %2678 = vmatpush1.bf16.msra.mxu0 %v8613_v43  ;;  %v1950_v43 = vpop.f32.mrf.mxu1 }
 0x4f6   :  { %2679 = vmatprep.subr.bf16.mxu0 %v8619_v30  ;;  %v1993_v30 = vpop.f32.mrf.mxu0 }
 0x4f7   :  { %7068 = vmatpush3.bf16.msra.mxu1 %v7383_v29 }
 0x4f8   :  { %7069 = vmatprep.subr.bf16.mxu1 %v10352_v59 }
 0x4f9   :  { %2680 = vmatpush1.bf16.msra.mxu0 %v8629_v40  ;;  %v1952_v40 = vpop.f32.mrf.mxu1 }
 0x4fa   :  { %2681 = vmatprep.subr.bf16.mxu0 %v8635_v34  ;;  %v1995_v34 = vpop.f32.mrf.mxu0 }
 0x4fb   :  { %7070 = vmatpush3.bf16.msra.mxu1 %v7384_v18 }
 0x4fc   :  { %7071 = vmatprep.subr.bf16.mxu1 %v10352_v59 }
 0x4fd   :  { %2682 = vmatpush1.bf16.msra.mxu0 %v8645_v16  ;;  %v1954_v16 = vpop.f32.mrf.mxu1 }
 0x4fe   :  { %2683 = vmatprep.subr.bf16.mxu0 %v8651_v20  ;;  %v1997_v20 = vpop.f32.mrf.mxu0 }
 0x4ff   :  { %7072 = vmatpush3.bf16.msra.mxu1 %v7385_v36 }
 0x500   :  { %7073 = vmatprep.subr.bf16.mxu1 %v10352_v59  ;;  %v1999_v49 = vpop.f32.mrf.mxu0 }
 0x501   :  { %2684 = vmatpush1.bf16.msra.mxu0 %v8661_v14  ;;  %v1956_v14 = vpop.f32.mrf.mxu1 }
 0x502   :  { %2915 = vmatprep.subr.bf16.mxu0 %v8786_v53 }
 0x503   :  { %7074 = vmatpush3.bf16.msra.mxu1 %v7386_v37 }
 0x504   :  { %2712 = vmatprep.subr.bf16.mxu1 %v8666_v22 }
 0x5a4   :  { %v2196_v51 = vpop.f32.mrf.mxu1  ;;  %v2239_v53 = vpop.f32.mrf.mxu0 }
 0x5a5   :  { %v2197_v52 = vadd.f32 %v2196_v51, %v1950_v43  ;;  %v2240_v29 = vadd.f32 %v2239_v53, %v1993_v30 }
 0x5a6   :  { %v2198_v58 = vpop.f32.mrf.mxu1  ;;  %v2241_v2 = vpop.f32.mrf.mxu0 }
 0x5a7   :  { %v2248_v61 = vadd.f32 %v2197_v52, %v8432_v23  ;;  %v2199_v25 = vadd.f32 %v2198_v58, %v1952_v40  ;;  %v2242_v33 = vadd.f32 %v2241_v2, %v1995_v34  ;;  %v2250_v37 = vadd.f32 %v2240_v29, %v8442_v21 }
 0x5a8   :  { %v2200_v35 = vpop.f32.mrf.mxu1  ;;  %v2243_v41 = vpop.f32.mrf.mxu0 }
 0x5a9   :  { %v6336_v11 = vmul.f32 -1.442695, %v2248_v61  ;;  %v2249_v22 = vadd.f32 %v2199_v25, %v8434_v28  ;;  %v2201_v45 = vadd.f32 %v2200_v35, %v1954_v16  ;;  %v2251_v36 = vadd.f32 %v2242_v33, %v8440_v19 }
 0x5aa   :  { %v2202_v48 = vpop.f32.mrf.mxu1  ;;  %v2245_v24 = vpop.f32.mrf.mxu0  ;;  %v2244_v40 = vadd.f32 %v2243_v41, %v1997_v20 }
 0x5ab   :  { %7699 = vpow2.f32 %v6336_v11  ;;  %v6338_v57 = vmul.f32 -1.442695, %v2249_v22  ;;  %v2203_v5 = vadd.f32 %v2202_v48, %v1956_v14  ;;  %v2252_v47 = vadd.f32 %v2201_v45, %v8432_v23 }
 0x5ac   :  { %v2246_v18 = vadd.f32 %v2245_v24, %v1999_v49  ;;  %v6340_v14 = vmul.f32 -1.442695, %v2251_v36  ;;  %v2254_v34 = vadd.f32 %v2244_v40, %v8442_v21 }
 0x5ad   :  { %7701 = vpow2.f32 %v6338_v57  ;;  %v2253_v55 = vadd.f32 %v2203_v5, %v8434_v28  ;;  %v6337_v15 = vmul.f32 -1.442695, %v2252_v47 }
 0x5ae   :  { %v2255_v43 = vadd.f32 %v2246_v18, %v8440_v19 }
 0x5af   :  { %v6339_v17 = vmul.f32 -1.442695, %v2253_v55  ;;  %7703 = vpow2.f32 %v6337_v15 }
 0x5b0   :  { %v6341_v58 = vmul.f32 -1.442695, %v2255_v43 }
 0x5b1   :  { %7705 = vpow2.f32 %v6339_v17 }
 0x5b2   :  { %7707 = vtanh.f32 %v2250_v37 }
 0x5b8   :  { %v7700_v16 = vpop.eup %7699 }
 0x5b9   :  { %v2262_v51 = vadd.f32 1.0, %v7700_v16 }
 0x5ba   :  { %v7702_v52 = vpop.eup %7701 }
 0x5bb   :  { %7709 = vrcp.f32 %v2262_v51  ;;  %v2274_v61 = vadd.f32 1.0, %v7702_v52 }
 0x5bc   :  { %7711 = vpow2.f32 %v6340_v14  ;;  %v7704_v30 = vpop.eup %7703 }
 0x5bd   :  { %7713 = vrcp.f32 %v2274_v61  ;;  %v2263_v53 = vadd.f32 1.0, %v7704_v30 }
 0x5be   :  { %v7706_v49 = vpop.eup %7705  ;;  %7715 = vpow2.f32 %v6341_v58 }
 0x5bf   :  { %7717 = vtanh.f32 %v2254_v34  ;;  %v2275_v25 = vadd.f32 1.0, %v7706_v49  ;;  %v7708_v20 = vpop.eup %7707 }
 0x5c0   :  { %7719 = vrcp.f32 %v2263_v53 }
 0x5c1   :  { %7721 = vrcp.f32 %v2275_v25 }
 0x5c8   :  { %v7710_v2 = vpop.eup %7709 }
 0x5c9   :  { %v7712_v35 = vpop.eup %7711  ;;  %v2296_v45 = vmul.f32 %v7710_v2, %v7708_v20 }
 0x5ca   :  { %v7714_v11 = vpop.eup %7713  ;;  %v2288_v41 = vadd.f32 1.0, %v7712_v35 }
 0x5cb   :  { %v7716_v22 = vpop.eup %7715  ;;  %v2294_v48 = vmul.f32 %v7714_v11, %v8680_v56  ;;  %v6912_v11 = vld [vmem:[%s10273_s0 + $0x18] sm:$0xff]  }
 0x5cc   :  { %v7718_v57 = vpop.eup %7717  ;;  %v2289_v15 = vadd.f32 1.0, %v7716_v22  ;;  %7723 = vrcp.f32 %v2288_v41  ;;  %v6843_v22 = vunpack.c.l.bf16 %v6912_v11 }
 0x5cd   :  { %v7720_v5 = vpop.eup %7719  ;;  %v9043_v47 = vadd.f32 %v2296_v45, %v2294_v48  ;;  %v6844_v45 = vunpack.c.h.bf16 %v6912_v11 }
 0x5ce   :  { %v7722_v55 = vpop.eup %7721  ;;  %v2297_v17 = vmul.f32 %v7720_v5, %v7718_v57 }
 0x5cf   :  { %v2295_v24 = vmul.f32 %v7722_v55, %v8683_v63  ;;  %7725 = vtanh.f32 %v9043_v47  ;;  %v10377_v63 = vld [vmem:[#allocation19_spill] sm:$0xff] }
 0x5d0   :  { %7727 = vrcp.f32 %v2289_v15  ;;  %v7387_v15 = vld [vmem:[%s10269_s2 + $0x38] sm:$0xff]  }
 0x5d1   :  { %v9046_v33 = vadd.f32 %v2297_v17, %v2295_v24  ;;  %v9118_v17 = vld [vmem:[%s10270_s4 + $0xe4] ss:$16 sps:$4 sm:$0xff]   ;;  %v9123_v24 = vld [vmem:[%s10270_s4 + $0xe0] ss:$16 sps:$4 sm:$0xff]  }
 0x5d3   :  { %7729 = vtanh.f32 %v9046_v33 }
 0x5d9   :  { %v7724_v29 = vpop.eup %7723 }
 0x5dc   :  { %v7726_v56 = vpop.eup %7725 }
 0x5dd   :  { %v7728_v18 = vpop.eup %7727  ;;  %v2302_v37 = vmul.f32 %v7726_v56, %v7724_v29  ;;  %v7391_v29 = vld [vmem:[%s10269_s2 + $0x30] sm:$0xff]  }
 0x5de   :  { %v9134_v56 = vld [vmem:[%s10270_s4 + $0xc4] ss:$16 sps:$4 sm:$0xff]  }
 0x5e0   :  { %v7730_v36 = vpop.eup %7729 }
 0x5e1   :  { %v2303_v43 = vmul.f32 %v7730_v36, %v7728_v18  ;;  %v9139_v18 = vld [vmem:[%s10270_s4 + $0xc0] ss:$16 sps:$4 sm:$0xff]   ;;  %v7395_v36 = vld [vmem:[%s10269_s2 + $0x28] sm:$0xff]  }
 0x5e3   :  { %v2304_v40 = vpack.c.bf16 %v2303_v43, %v2302_v37  ;;  %v9150_v37 = vld [vmem:[%s10270_s4 + $0xa4] ss:$16 sps:$4 sm:$0xff]   ;;  %v9155_v43 = vld [vmem:[%s10270_s4 + $0xa0] ss:$16 sps:$4 sm:$0xff]  }
 0x5e5   :  { %6911 = vst [vmem:[%s10275_s6 + $0x10] sm:$0xff] %v2304_v40   ;;  %7076 = vmatmul.mubr.bf16.vlgmr.msra.gmra.mxu1 %v2304_v40  ;;  %2702 = vmatmul.mubr.bf16.vlgmr.msra.gmra.mxu0 %v2304_v40 }
 0x5e6   :  { %2713 = vmatpush1.bf16.msra.mxu1 %v8690_v7  ;;  %2744 = vmatprep.mubr.bf16.mxu1 %v10351_v12  ;;  %v10378_v7 = vld [vmem:[#allocation4_spill] sm:$0xff] }
 0x5e7   :  { %2714 = vmatprep.subr.bf16.mxu1 %v8695_v8  ;;  %2916 = vmatpush1.bf16.msra.mxu0 %v8796_v38  ;;  %v10379_v8 = vld [vmem:[#allocation5_spill] sm:$0xff] }
 0x5e8   :  { %2917 = vmatprep.subr.bf16.mxu0 %v8810_v39  ;;  %2947 = vmatprep.mubr.bf16.mxu0 %v10351_v12  ;;  %v10390_v38 = vld [vmem:[#allocation13_spill] sm:$0xff]  ;;  %v10391_v39 = vld [vmem:[#allocation14_spill] sm:$0xff] }
 0x5ea   :  { %2715 = vmatpush1.bf16.msra.mxu1 %v8704_v9  ;;  %v10380_v9 = vld [vmem:[#allocation21_spill] sm:$0xff] }
 0x5eb   :  { %2716 = vmatprep.subr.bf16.mxu1 %v8711_v10  ;;  %2918 = vmatpush1.bf16.msra.mxu0 %v8820_v42  ;;  %v10381_v10 = vld [vmem:[#allocation24_spill] sm:$0xff] }
 0x5ec   :  { %2919 = vmatprep.subr.bf16.mxu0 %v8834_v46  ;;  %v10392_v42 = vld [vmem:[#allocation16_spill] sm:$0xff]  ;;  %v10393_v46 = vld [vmem:[#allocation15_spill] sm:$0xff] }
 0x5ee   :  { %2717 = vmatpush1.bf16.msra.mxu1 %v8718_v4  ;;  %v10382_v4 = vld [vmem:[#allocation6_spill] sm:$0xff] }
 0x5ef   :  { %2718 = vmatprep.subr.bf16.mxu1 %v8724_v27  ;;  %2920 = vmatpush1.bf16.msra.mxu0 %v8844_v50  ;;  %v10383_v27 = vld [vmem:[#allocation7_spill] sm:$0xff]  ;;  %v10394_v50 = vld [vmem:[#allocation17_spill] sm:$0xff] }
 0x5f0   :  { %2921 = vmatprep.subr.bf16.mxu0 %v8858_v54  ;;  %v10395_v54 = vld [vmem:[#allocation18_spill] sm:$0xff] }
 0x5f2   :  { %2719 = vmatpush1.bf16.msra.mxu1 %v8730_v13  ;;  %v10384_v13 = vld [vmem:[#allocation23_spill] sm:$0xff] }
 0x5f3   :  { %2720 = vmatprep.subr.bf16.mxu1 %v8736_v0  ;;  %2922 = vmatpush1.bf16.msra.mxu0 %v8868_v60  ;;  %v10385_v0 = vld [vmem:[#allocation8_spill] sm:$0xff] }
 0x5f4   :  { %2923 = vmatprep.subr.bf16.mxu0 %v8880_v62  ;;  %v10396_v60 = vld [vmem:[#allocation20_spill] sm:$0xff]  ;;  %v10397_v62 = vld [vmem:[#allocation22_spill] sm:$0xff] }
 0x5f6   :  { %2721 = vmatpush1.bf16.msra.mxu1 %v8742_v32  ;;  %v10386_v32 = vld [vmem:[#allocation9_spill] sm:$0xff] }
 0x5f7   :  { %2722 = vmatprep.subr.bf16.mxu1 %v8748_v31  ;;  %2924 = vmatpush1.bf16.msra.mxu0 %v8887_v1  ;;  %v10387_v31 = vld [vmem:[#allocation10_spill] sm:$0xff] }
 0x5f8   :  { %2925 = vmatprep.subr.bf16.mxu0 %v8906_v3  ;;  %v10398_v1 = vld [vmem:[#allocation26_spill] sm:$0xff]  ;;  %v10399_v3 = vld [vmem:[#allocation25_spill] sm:$0xff] }
 0x5fa   :  { %2723 = vmatpush1.bf16.msra.mxu1 %v8754_v26  ;;  %v10388_v26 = vld [vmem:[#allocation11_spill] sm:$0xff] }
 0x5fb   :  { %2724 = vmatprep.subr.bf16.mxu1 %v8760_v44  ;;  %2926 = vmatpush1.bf16.msra.mxu0 %v8916_v6  ;;  %v10389_v44 = vld [vmem:[#allocation12_spill] sm:$0xff]  ;;  %v6913_v6 = vld [vmem:[%s10272_s1 + $0x18] sm:$0xff]  }
 0x5fc   :  { %2927 = vmatprep.subr.bf16.mxu0 %v10377_v63  ;;  %v6847_v16 = vunpack.c.l.bf16 %v6913_v6  ;;  %v6848_v52 = vunpack.c.h.bf16 %v6913_v6  ;;  %v9166_v63 = vld [vmem:[%s10270_s4 + $0x80] ss:$16 sps:$4 sm:$0xff]  }
 0x5fe   :  { %2725 = vmatpush1.bf16.msra.mxu1 %v10378_v7  ;;  %v9171_v7 = vld [vmem:[%s10270_s4 + $0x84] ss:$16 sps:$4 sm:$0xff]  }
 0x5ff   :  { %2726 = vmatprep.subr.bf16.mxu1 %v10379_v8  ;;  %2928 = vmatpush1.bf16.msra.mxu0 %v10380_v9  ;;  %v9176_v8 = vld [vmem:[%s10270_s4 + $0x64] ss:$16 sps:$4 sm:$0xff]   ;;  %v7403_v9 = vld [vmem:[%s10269_s2 + $0x18] sm:$0xff]  }
 0x600   :  { %2929 = vmatprep.subr.bf16.mxu0 %v10381_v10  ;;  %v9187_v10 = vld [vmem:[%s10270_s4 + $0x60] ss:$16 sps:$4 sm:$0xff]  }
 0x602   :  { %2727 = vmatpush1.bf16.msra.mxu1 %v10382_v4  ;;  %v9193_v4 = vld [vmem:[%s10270_s4 + $0x44] ss:$16 sps:$4 sm:$0xff]  }
 0x603   :  { %2958 = vmatprep.subr.bf16.mxu1 %v10383_v27  ;;  %2930 = vmatpush1.bf16.msra.mxu0 %v10384_v13  ;;  %v7407_v27 = vld [vmem:[%s10269_s2 + $0x10] sm:$0xff]  }
 0x604   :  { %7079 = vmatprep.subr.bf16.mxu0 %v10352_v59  ;;  %v9203_v13 = vld [vmem:[%s10270_s4 + $0x40] ss:$16 sps:$4 sm:$0xff]  }
 0x605   :  { %2745 = vmatmul.mubr.bf16.vlgmr.msra.gmra.mxu1 %v2304_v40  ;;  %v7399_v40 = vld [vmem:[%s10269_s2 + $0x20] sm:$0xff]  }
 0x606   :  { %2959 = vmatpush1.bf16.msra.mxu1 %v10385_v0  ;;  %2990 = vmatprep.mubr.bf16.mxu1 %v10351_v12  ;;  %v9209_v0 = vld [vmem:[%s10270_s4 + $0x24] ss:$16 sps:$4 sm:$0xff]  }
 0x607   :  { %2960 = vmatprep.subr.bf16.mxu1 %v10386_v32  ;;  %v7411_v32 = vld [vmem:[%s10269_s2 + $0x8] sm:$0xff]  }
 0x60a   :  { %2961 = vmatpush1.bf16.msra.mxu1 %v10387_v31  ;;  %v9219_v31 = vld [vmem:[%s10270_s4 + $0x20] ss:$16 sps:$4 sm:$0xff]  }
 0x60b   :  { %2962 = vmatprep.subr.bf16.mxu1 %v10388_v26  ;;  %v9225_v26 = vld [vmem:[%s10270_s4 + $0x4] ss:$16 sps:$4 sm:$0xff]  }
 0x60e   :  { %2963 = vmatpush1.bf16.msra.mxu1 %v10389_v44  ;;  %v7415_v44 = vld [vmem:[%s10269_s2] sm:$0xff]  }
 0x60f   :  { %2964 = vmatprep.subr.bf16.mxu1 %v10390_v38  ;;  %v9235_v38 = vld [vmem:[%s10270_s4] ss:$16 sps:$4 sm:$0xff]  }
 0x612   :  { %2965 = vmatpush1.bf16.msra.mxu1 %v10391_v39  ;;  %v9240_v39 = vld [vmem:[%s10270_s4 + $0xec] ss:$16 sps:$4 sm:$0xff]  }
 0x613   :  { %2966 = vmatprep.subr.bf16.mxu1 %v10392_v42 }
 0x616   :  { %2967 = vmatpush1.bf16.msra.mxu1 %v10393_v46 }
 0x617   :  { %2968 = vmatprep.subr.bf16.mxu1 %v10394_v50 }
 0x61a   :  { %2969 = vmatpush1.bf16.msra.mxu1 %v10395_v54 }
 0x61b   :  { %2970 = vmatprep.subr.bf16.mxu1 %v10396_v60 }
 0x61e   :  { %2971 = vmatpush1.bf16.msra.mxu1 %v10397_v62 }
 0x61f   :  { %2972 = vmatprep.subr.bf16.mxu1 %v10398_v1 }
 0x622   :  { %2973 = vmatpush1.bf16.msra.mxu1 %v10399_v3 }
 0x623   :  { %3422 = vmatprep.subr.bf16.mxu1 %v9118_v17 }
 0x6a5   :  { %v2421_v14 = vpop.f32.mrf.mxu1  ;;  %v2703_v42 = vpop.f32.mrf.mxu0 }
 0x6a6   :  { %v2422_v51 = vadd.f32 %v6847_v16, %v2421_v14 }
 0x6a7   :  { %v7077_v58 = vpop.f32.mrf.mxu1  ;;  %v2705_v50 = vpop.f32.mrf.mxu0 }
 0x6a8   :  { %v6358_v61 = vmul.f32 -1.442695, %v2422_v51 }
 0x6a9   :  { %v2424_v34 = vpop.f32.mrf.mxu1  ;;  %v2707_v60 = vpop.f32.mrf.mxu0 }
 0x6aa   :  { %7731 = vpow2.f32 %v6358_v61  ;;  %v2425_v30 = vadd.f32 %v6848_v52, %v2424_v34 }
 0x6ab   :  { %v7078_v49 = vpop.f32.mrf.mxu1  ;;  %v2709_v1 = vpop.f32.mrf.mxu0 }
 0x6ac   :  { %v6359_v53 = vmul.f32 -1.442695, %v2425_v30 }
 0x6ae   :  { %7733 = vpow2.f32 %v6359_v53 }
 0x6b7   :  { %v7732_v25 = vpop.eup %7731 }
 0x6b8   :  { %v2434_v20 = vadd.f32 1.0, %v7732_v25 }
 0x6ba   :  { %7735 = vrcp.f32 %v2434_v20 }
 0x6bb   :  { %v7734_v2 = vpop.eup %7733 }
 0x6bc   :  { %v2435_v35 = vadd.f32 1.0, %v7734_v2 }
 0x6be   :  { %7737 = vrcp.f32 %v2435_v35 }
 0x6c5   :  { %v2746_v46 = vpop.f32.mrf.mxu1 }
 0x6c7   :  { %v7736_v48 = vpop.eup %7735  ;;  %v2748_v54 = vpop.f32.mrf.mxu1 }
 0x6c8   :  { %v2442_v41 = vmul.f32 %v7736_v48, %v6843_v22 }
 0x6c9   :  { %v2750_v62 = vpop.f32.mrf.mxu1 }
 0x6cb   :  { %v7738_v57 = vpop.eup %7737  ;;  %v2752_v3 = vpop.f32.mrf.mxu1 }
 0x6cc   :  { %v2443_v5 = vmul.f32 %v7738_v57, %v6844_v45 }
 0x6ce   :  { %v2444_v55 = vpack.c.bf16 %v2443_v5, %v2442_v41 }
 0x6d0   :  { %2948 = vmatmul.mubr.bf16.vlgmr.msra.gmra.mxu0 %v2444_v55  ;;  %2991 = vmatmul.mubr.bf16.vlgmr.msra.gmra.mxu1 %v2444_v55 }
 0x6d1   :  { %7095 = vmatprep.mubr.msk.bf16.mxu0 %vm7953_vm0, %v10352_v59  ;;  %3454 = vmatprep.mubr.bf16.mxu1 %v10351_v12 }
 0x6d2   :  { %7080 = vmatpush3.bf16.msra.mxu0 %v7387_v15  ;;  %3423 = vmatpush1.bf16.msra.mxu1 %v9123_v24 }
 0x6d3   :  { %7081 = vmatprep.subr.bf16.mxu0 %v10352_v59  ;;  %3424 = vmatprep.subr.bf16.mxu1 %v9134_v56 }
 0x6d6   :  { %7082 = vmatpush3.bf16.msra.mxu0 %v7391_v29  ;;  %3425 = vmatpush1.bf16.msra.mxu1 %v9139_v18 }
 0x6d7   :  { %7083 = vmatprep.subr.bf16.mxu0 %v10352_v59  ;;  %3426 = vmatprep.subr.bf16.mxu1 %v9150_v37 }
 0x6da   :  { %7084 = vmatpush3.bf16.msra.mxu0 %v7395_v36  ;;  %3427 = vmatpush1.bf16.msra.mxu1 %v9155_v43 }
 0x6db   :  { %7085 = vmatprep.subr.bf16.mxu0 %v10352_v59  ;;  %3428 = vmatprep.subr.bf16.mxu1 %v9171_v7 }
 0x6de   :  { %7086 = vmatpush3.bf16.msra.mxu0 %v7399_v40  ;;  %3429 = vmatpush1.bf16.msra.mxu1 %v9166_v63 }
 0x6df   :  { %7087 = vmatprep.subr.bf16.mxu0 %v10352_v59  ;;  %3430 = vmatprep.subr.bf16.mxu1 %v9176_v8 }
 0x6e2   :  { %7088 = vmatpush3.bf16.msra.mxu0 %v7403_v9  ;;  %3431 = vmatpush1.bf16.msra.mxu1 %v9187_v10 }
 0x6e3   :  { %7089 = vmatprep.subr.bf16.mxu0 %v10352_v59  ;;  %3432 = vmatprep.subr.bf16.mxu1 %v9193_v4 }
 0x6e6   :  { %7090 = vmatpush3.bf16.msra.mxu0 %v7407_v27  ;;  %3433 = vmatpush1.bf16.msra.mxu1 %v9203_v13 }
 0x6e7   :  { %7091 = vmatprep.subr.bf16.mxu0 %v10352_v59  ;;  %3434 = vmatprep.subr.bf16.mxu1 %v9209_v0 }
 0x6ea   :  { %7092 = vmatpush3.bf16.msra.mxu0 %v7411_v32  ;;  %3435 = vmatpush1.bf16.msra.mxu1 %v9219_v31 }
 0x6eb   :  { %7093 = vmatprep.subr.bf16.mxu0 %v10352_v59  ;;  %3436 = vmatprep.subr.bf16.mxu1 %v9225_v26 }
 0x6ee   :  { %7094 = vmatpush3.bf16.msra.mxu0 %v7415_v44  ;;  %3437 = vmatpush1.bf16.msra.mxu1 %v9235_v38 }
 0x6ef   :  { %3465 = vmatprep.subr.bf16.mxu0 %v9240_v39 }
 0x790   :  { %v2949_v6 = vpop.f32.mrf.mxu0  ;;  %v2992_v16 = vpop.f32.mrf.mxu1 }
 0x791   :  { %v2950_v14 = vadd.f32 %v2949_v6, %v2703_v42  ;;  %v2993_v5 = vadd.f32 %v2992_v16, %v2746_v46 }
 0x792   :  { %v2951_v51 = vpop.f32.mrf.mxu0  ;;  %v2994_v61 = vpop.f32.mrf.mxu1 }
 0x793   :  { %v3001_v52 = vadd.f32 %v2950_v14, %v8432_v23  ;;  %v2952_v58 = vadd.f32 %v2951_v51, %v2705_v50  ;;  %v2995_v41 = vadd.f32 %v2994_v61, %v2748_v54  ;;  %v3003_v29 = vadd.f32 %v2993_v5, %v8442_v21  ;;  %v9269_v5 = vld [vmem:[%s10270_s4 + $0xcc] ss:$16 sps:$4 sm:$0xff]  }
 0x794   :  { %v2953_v34 = vpop.f32.mrf.mxu0  ;;  %v2996_v2 = vpop.f32.mrf.mxu1 }
 0x795   :  { %v6424_v30 = vmul.f32 -1.442695, %v3001_v52  ;;  %v3002_v49 = vadd.f32 %v2952_v58, %v8434_v28  ;;  %v2954_v53 = vadd.f32 %v2953_v34, %v2707_v60  ;;  %v3004_v15 = vadd.f32 %v2995_v41, %v8440_v19  ;;  %v9264_v41 = vld [vmem:[%s10270_s4 + $0xe8] ss:$16 sps:$4 sm:$0xff]  }
 0x796   :  { %v2955_v25 = vpop.f32.mrf.mxu0  ;;  %v2998_v57 = vpop.f32.mrf.mxu1  ;;  %v2997_v40 = vadd.f32 %v2996_v2, %v2750_v62 }
 0x797   :  { %7739 = vpow2.f32 %v6424_v30  ;;  %v6426_v20 = vmul.f32 -1.442695, %v3002_v49  ;;  %v2956_v35 = vadd.f32 %v2955_v25, %v2709_v1  ;;  %v3005_v11 = vadd.f32 %v2954_v53, %v8432_v23 }
 0x798   :  { %v2999_v55 = vadd.f32 %v2998_v57, %v2752_v3  ;;  %v6428_v27 = vmul.f32 -1.442695, %v3004_v15  ;;  %v3007_v54 = vadd.f32 %v2997_v40, %v8442_v21  ;;  %v9285_v15 = vld [vmem:[%s10270_s4 + $0xac] ss:$16 sps:$4 sm:$0xff]   ;;  %v9304_v40 = vld [vmem:[%s10270_s4 + $0x88] ss:$16 sps:$4 sm:$0xff]  }
 0x799   :  { %7741 = vpow2.f32 %v6426_v20  ;;  %v3006_v22 = vadd.f32 %v2956_v35, %v8434_v28  ;;  %v6425_v45 = vmul.f32 -1.442695, %v3005_v11 }
 0x79a   :  { %v3008_v36 = vadd.f32 %v2999_v55, %v8440_v19  ;;  %v9278_v55 = vld [vmem:[%s10270_s4 + $0xc8] ss:$16 sps:$4 sm:$0xff]  }
 0x79b   :  { %v6427_v48 = vmul.f32 -1.442695, %v3006_v22  ;;  %7743 = vpow2.f32 %v6425_v45 }
 0x79c   :  { %v6429_v42 = vmul.f32 -1.442695, %v3008_v36  ;;  %v9298_v36 = vld [vmem:[%s10270_s4 + $0x8c] ss:$16 sps:$4 sm:$0xff]  }
 0x79d   :  { %7745 = vpow2.f32 %v6427_v48 }
 0x79e   :  { %7747 = vtanh.f32 %v3003_v29  ;;  %v9292_v29 = vld [vmem:[%s10270_s4 + $0xa8] ss:$16 sps:$4 sm:$0xff]  }
 0x7a4   :  { %v7740_v9 = vpop.eup %7739 }
 0x7a5   :  { %v3015_v32 = vadd.f32 1.0, %v7740_v9  ;;  %v9310_v9 = vld [vmem:[%s10270_s4 + $0x6c] ss:$16 sps:$4 sm:$0xff]  }
 0x7a6   :  { %v7742_v44 = vpop.eup %7741 }
 0x7a7   :  { %7749 = vrcp.f32 %v3015_v32  ;;  %v3027_v50 = vadd.f32 1.0, %v7742_v44  ;;  %v9322_v32 = vld [vmem:[%s10270_s4 + $0x4c] ss:$16 sps:$4 sm:$0xff]   ;;  %v9328_v44 = vld [vmem:[%s10270_s4 + $0x48] ss:$16 sps:$4 sm:$0xff]  }
 0x7a8   :  { %7751 = vpow2.f32 %v6428_v27  ;;  %v7744_v46 = vpop.eup %7743  ;;  %v9316_v27 = vld [vmem:[%s10270_s4 + $0x68] ss:$16 sps:$4 sm:$0xff]  }
 0x7a9   :  { %7753 = vrcp.f32 %v3027_v50  ;;  %v3016_v1 = vadd.f32 1.0, %v7744_v46  ;;  %v9340_v50 = vld [vmem:[%s10270_s4 + $0x28] ss:$16 sps:$4 sm:$0xff]  }
 0x7aa   :  { %v7746_v60 = vpop.eup %7745  ;;  %7755 = vpow2.f32 %v6429_v42  ;;  %v9334_v42 = vld [vmem:[%s10270_s4 + $0x2c] ss:$16 sps:$4 sm:$0xff]   ;;  %10400 = vst [vmem:[#allocation19_spill] sm:$0xff] %v9340_v50  ;;  %v9352_v46 = vld [vmem:[%s10270_s4 + $0x8] ss:$16 sps:$4 sm:$0xff]  }
 0x7ab   :  { %7757 = vtanh.f32 %v3007_v54  ;;  %v3028_v3 = vadd.f32 1.0, %v7746_v60  ;;  %v7748_v62 = vpop.eup %7747  ;;  %v9346_v54 = vld [vmem:[%s10270_s4 + $0xc] ss:$16 sps:$4 sm:$0xff]   ;;  %10402 = vst [vmem:[#allocation5_spill] sm:$0xff] %v9352_v46  ;;  %v9360_v60 = vld [vmem:[%s10271_s3 + $0xe4] ss:$16 sps:$4 sm:$0xff]  }
 0x7ac   :  { %7759 = vrcp.f32 %v3016_v1  ;;  %10401 = vst [vmem:[#allocation4_spill] sm:$0xff] %v9346_v54  ;;  %v9365_v1 = vld [vmem:[%s10271_s3 + $0xec] ss:$16 sps:$4 sm:$0xff]   ;;  %3668 = vmatprep.subr.bf16.mxu1 %v9360_v60 }
 0x7ad   :  { %7761 = vrcp.f32 %v3028_v3  ;;  %10403 = vst [vmem:[#allocation21_spill] sm:$0xff] %v9365_v1  ;;  %v9370_v3 = vld [vmem:[%s10271_s3 + $0xe0] ss:$16 sps:$4 sm:$0xff]  }
 0x7b4   :  { %v7750_v6 = vpop.eup %7749 }
 0x7b5   :  { %v7752_v16 = vpop.eup %7751  ;;  %v3049_v52 = vmul.f32 %v7750_v6, %v7748_v62  ;;  %v9375_v62 = vld [vmem:[%s10271_s3 + $0xe8] ss:$16 sps:$4 sm:$0xff]   ;;  %v9384_v6 = vld [vmem:[%s10271_s3 + $0xc4] ss:$16 sps:$4 sm:$0xff]  }
 0x7b6   :  { %v7754_v14 = vpop.eup %7753  ;;  %v3041_v34 = vadd.f32 1.0, %v7752_v16  ;;  %10404 = vst [vmem:[#allocation24_spill] sm:$0xff] %v9375_v62  ;;  %v9389_v16 = vld [vmem:[%s10271_s3 + $0xcc] ss:$16 sps:$4 sm:$0xff]  }
 0x7b7   :  { %v7756_v51 = vpop.eup %7755  ;;  %v3047_v58 = vmul.f32 %v7754_v14, %v9043_v47  ;;  %10405 = vst [vmem:[#allocation6_spill] sm:$0xff] %v9389_v16  ;;  %v9394_v14 = vld [vmem:[%s10271_s3 + $0xc0] ss:$16 sps:$4 sm:$0xff]  }
 0x7b8   :  { %v7758_v61 = vpop.eup %7757  ;;  %v3042_v25 = vadd.f32 1.0, %v7756_v51  ;;  %7763 = vrcp.f32 %v3041_v34  ;;  %v9399_v51 = vld [vmem:[%s10271_s3 + $0xc8] ss:$16 sps:$4 sm:$0xff]  }
 0x7b9   :  { %v7760_v30 = vpop.eup %7759  ;;  %v9254_v49 = vadd.f32 %v3049_v52, %v3047_v58  ;;  %10406 = vst [vmem:[#allocation7_spill] sm:$0xff] %v9399_v51  ;;  %v9408_v52 = vld [vmem:[%s10271_s3 + $0xa4] ss:$16 sps:$4 sm:$0xff]   ;;  %v9413_v58 = vld [vmem:[%s10271_s3 + $0xac] ss:$16 sps:$4 sm:$0xff]  }
 0x7ba   :  { %v7762_v53 = vpop.eup %7761  ;;  %v3050_v20 = vmul.f32 %v7760_v30, %v7758_v61  ;;  %10407 = vst [vmem:[#allocation23_spill] sm:$0xff] %v9413_v58  ;;  %v9418_v61 = vld [vmem:[%s10271_s3 + $0xa0] ss:$16 sps:$4 sm:$0xff]   ;;  %v9423_v34 = vld [vmem:[%s10271_s3 + $0xa8] ss:$16 sps:$4 sm:$0xff]  }
 0x7bb   :  { %v3048_v2 = vmul.f32 %v7762_v53, %v9046_v33  ;;  %7765 = vtanh.f32 %v9254_v49  ;;  %10408 = vst [vmem:[#allocation8_spill] sm:$0xff] %v9423_v34  ;;  %v9432_v30 = vld [vmem:[%s10271_s3 + $0x84] ss:$16 sps:$4 sm:$0xff]   ;;  %v9437_v53 = vld [vmem:[%s10271_s3 + $0x8c] ss:$16 sps:$4 sm:$0xff]  }
 0x7bc   :  { %7767 = vrcp.f32 %v3042_v25  ;;  %10409 = vst [vmem:[#allocation9_spill] sm:$0xff] %v9437_v53  ;;  %v9442_v25 = vld [vmem:[%s10271_s3 + $0x80] ss:$16 sps:$4 sm:$0xff]  }
 0x7bd   :  { %v9257_v35 = vadd.f32 %v3050_v20, %v3048_v2  ;;  %v9447_v20 = vld [vmem:[%s10271_s3 + $0x88] ss:$16 sps:$4 sm:$0xff]   ;;  %v9454_v2 = vld [vmem:[%s10271_s3 + $0x64] ss:$16 sps:$4 sm:$0xff]  }
 0x7be   :  { %10410 = vst [vmem:[#allocation10_spill] sm:$0xff] %v9447_v20 }
 0x7bf   :  { %7769 = vtanh.f32 %v9257_v35 }
 0x7c5   :  { %v7764_v11 = vpop.eup %7763 }
 0x7c8   :  { %v7766_v47 = vpop.eup %7765 }
 0x7c9   :  { %v7768_v22 = vpop.eup %7767  ;;  %v3055_v48 = vmul.f32 %v7766_v47, %v7764_v11  ;;  %v9461_v11 = vld [vmem:[%s10271_s3 + $0x60] ss:$16 sps:$4 sm:$0xff]   ;;  %v9466_v47 = vld [vmem:[%s10271_s3 + $0x68] ss:$16 sps:$4 sm:$0xff]  }
 0x7ca   :  { %10411 = vst [vmem:[#allocation11_spill] sm:$0xff] %v9466_v47 }
 0x7cc   :  { %v7770_v45 = vpop.eup %7769 }
 0x7cd   :  { %v3056_v57 = vmul.f32 %v7770_v45, %v7768_v22  ;;  %v9471_v22 = vld [vmem:[%s10271_s3 + $0x6c] ss:$16 sps:$4 sm:$0xff]   ;;  %v9480_v45 = vld [vmem:[%s10271_s3 + $0x44] ss:$16 sps:$4 sm:$0xff]  }
 0x7ce   :  { %10412 = vst [vmem:[#allocation12_spill] sm:$0xff] %v9471_v22 }
 0x7cf   :  { %v3057_v33 = vpack.c.bf16 %v3056_v57, %v3055_v48  ;;  %v9485_v48 = vld [vmem:[%s10271_s3 + $0x4c] ss:$16 sps:$4 sm:$0xff]   ;;  %v9490_v57 = vld [vmem:[%s10271_s3 + $0x40] ss:$16 sps:$4 sm:$0xff]  }
 0x7d0   :  { %10413 = vst [vmem:[#allocation13_spill] sm:$0xff] %v9485_v48 }
 0x7d1   :  { %6914 = vst [vmem:[%s10275_s6 + $0x18] sm:$0xff] %v3057_v33   ;;  %7096 = vmatmul.mubr.bf16.vlgmr.msra.gmra.mxu0 %v3057_v33  ;;  %3455 = vmatmul.mubr.bf16.vlgmr.msra.gmra.mxu1 %v3057_v33 }
 0x7d2   :  { %3466 = vmatpush1.bf16.msra.mxu0 %v9264_v41  ;;  %3497 = vmatprep.mubr.bf16.mxu0 %v10351_v12 }
 0x7d3   :  { %3467 = vmatprep.subr.bf16.mxu0 %v9269_v5  ;;  %3700 = vmatprep.mubr.bf16.mxu1 %v10351_v12 }
 0x7d4   :  { %3669 = vmatpush1.bf16.msra.mxu1 %v9370_v3 }
 0x7d5   :  { %3670 = vmatprep.subr.bf16.mxu1 %v9384_v6 }
 0x7d6   :  { %3468 = vmatpush1.bf16.msra.mxu0 %v9278_v55 }
 0x7d7   :  { %3469 = vmatprep.subr.bf16.mxu0 %v9285_v15 }
 0x7d8   :  { %3671 = vmatpush1.bf16.msra.mxu1 %v9394_v14 }
 0x7d9   :  { %3672 = vmatprep.subr.bf16.mxu1 %v9408_v52 }
 0x7da   :  { %3470 = vmatpush1.bf16.msra.mxu0 %v9292_v29 }
 0x7db   :  { %3471 = vmatprep.subr.bf16.mxu0 %v9298_v36 }
 0x7dc   :  { %3673 = vmatpush1.bf16.msra.mxu1 %v9418_v61 }
 0x7dd   :  { %3674 = vmatprep.subr.bf16.mxu1 %v9432_v30 }
 0x7de   :  { %3472 = vmatpush1.bf16.msra.mxu0 %v9304_v40 }
 0x7df   :  { %3473 = vmatprep.subr.bf16.mxu0 %v9310_v9 }
 0x7e0   :  { %3675 = vmatpush1.bf16.msra.mxu1 %v9442_v25 }
 0x7e1   :  { %3676 = vmatprep.subr.bf16.mxu1 %v9454_v2 }
 0x7e2   :  { %3474 = vmatpush1.bf16.msra.mxu0 %v9316_v27 }
 0x7e3   :  { %3475 = vmatprep.subr.bf16.mxu0 %v9322_v32 }
 0x7e4   :  { %3677 = vmatpush1.bf16.msra.mxu1 %v9461_v11 }
 0x7e5   :  { %3678 = vmatprep.subr.bf16.mxu1 %v9480_v45 }
 0x7e6   :  { %3476 = vmatpush1.bf16.msra.mxu0 %v9328_v44 }
 0x7e7   :  { %3477 = vmatprep.subr.bf16.mxu0 %v9334_v42 }
 0x7e8   :  { %3679 = vmatpush1.bf16.msra.mxu1 %v9490_v57 }
 0x7ea   :  { %3478 = vmatpush1.bf16.msra.mxu0 %v9340_v50 }
 0x7eb   :  { %3479 = vmatprep.subr.bf16.mxu0 %v9346_v54 }
 0x7ee   :  { %3480 = vmatpush1.bf16.msra.mxu0 %v9352_v46 }
 0x7ef   :  { %3711 = vmatprep.subr.bf16.mxu0 %v9365_v1 }
 0x7f1   :  { %3498 = vmatmul.mubr.bf16.vlgmr.msra.gmra.mxu0 %v3057_v33  ;;  %v9495_v33 = vld [vmem:[%s10271_s3 + $0x48] ss:$16 sps:$4 sm:$0xff]  }
 0x7f2   :  { %3743 = vmatprep.mubr.bf16.mxu0 %v10351_v12  ;;  %3712 = vmatpush1.bf16.msra.mxu0 %v9375_v62  ;;  %10414 = vst [vmem:[#allocation14_spill] sm:$0xff] %v9495_v33 }
 0x7f3   :  { %3713 = vmatprep.subr.bf16.mxu0 %v9389_v16 }
 0x7f6   :  { %3714 = vmatpush1.bf16.msra.mxu0 %v9399_v51 }
 0x7f7   :  { %3715 = vmatprep.subr.bf16.mxu0 %v9413_v58 }
 0x7fa   :  { %3716 = vmatpush1.bf16.msra.mxu0 %v9423_v34  ;;  %v9538_v34 = vld [vmem:[%s10271_s3 + $0x8] ss:$16 sps:$4 sm:$0xff]  }
 0x7fb   :  { %3717 = vmatprep.subr.bf16.mxu0 %v9437_v53  ;;  %v9533_v53 = vld [vmem:[%s10271_s3 + $0x4] ss:$16 sps:$4 sm:$0xff]   ;;  %10421 = vst [vmem:[#allocation26_spill] sm:$0xff] %v9538_v34 }
 0x7fc   :  { %10420 = vst [vmem:[#allocation22_spill] sm:$0xff] %v9533_v53 }
 0x7fe   :  { %3718 = vmatpush1.bf16.msra.mxu0 %v9447_v20  ;;  %v9514_v20 = vld [vmem:[%s10271_s3 + $0x20] ss:$16 sps:$4 sm:$0xff]  }
 0x7ff   :  { %3719 = vmatprep.subr.bf16.mxu0 %v9471_v22  ;;  %v9509_v22 = vld [vmem:[%s10271_s3 + $0x2c] ss:$16 sps:$4 sm:$0xff]   ;;  %10417 = vst [vmem:[#allocation17_spill] sm:$0xff] %v9514_v20 }
 0x800   :  { %10416 = vst [vmem:[#allocation15_spill] sm:$0xff] %v9509_v22 }
 0x802   :  { %3720 = vmatpush1.bf16.msra.mxu0 %v9466_v47  ;;  %v9504_v47 = vld [vmem:[%s10271_s3 + $0x24] ss:$16 sps:$4 sm:$0xff]  }
 0x803   :  { %3721 = vmatprep.subr.bf16.mxu0 %v9485_v48  ;;  %10415 = vst [vmem:[#allocation16_spill] sm:$0xff] %v9504_v47  ;;  %v9519_v48 = vld [vmem:[%s10271_s3 + $0x28] ss:$16 sps:$4 sm:$0xff]   ;;  %3680 = vmatprep.subr.bf16.mxu1 %v9504_v47  ;;  %v6915_v47 = vld [vmem:[%s10273_s0 + $0x20] sm:$0xff]  }
 0x804   :  { %10418 = vst [vmem:[#allocation18_spill] sm:$0xff] %v9519_v48  ;;  %3681 = vmatpush1.bf16.msra.mxu1 %v9514_v20 }
 0x805   :  { %3682 = vmatprep.subr.bf16.mxu1 %v9533_v53 }
 0x806   :  { %3722 = vmatpush1.bf16.msra.mxu0 %v9495_v33  ;;  %v9528_v33 = vld [vmem:[%s10271_s3] ss:$16 sps:$4 sm:$0xff]  }
 0x807   :  { %3723 = vmatprep.subr.bf16.mxu0 %v9509_v22  ;;  %10419 = vst [vmem:[#allocation20_spill] sm:$0xff] %v9528_v33  ;;  %v9543_v22 = vld [vmem:[%s10271_s3 + $0xc] ss:$16 sps:$4 sm:$0xff]  }
 0x808   :  { %10422 = vst [vmem:[#allocation25_spill] sm:$0xff] %v9543_v22  ;;  %3683 = vmatpush1.bf16.msra.mxu1 %v9528_v33 }
 0x809   :  { %7099 = vmatprep.subr.bf16.mxu1 %v10352_v59 }
 0x80a   :  { %3724 = vmatpush1.bf16.msra.mxu0 %v9519_v48  ;;  %v6916_v48 = vld [vmem:[%s10272_s1 + $0x20] sm:$0xff]  }
 0x80b   :  { %3725 = vmatprep.subr.bf16.mxu0 %v9543_v22  ;;  %v6860_v58 = vunpack.c.l.bf16 %v6916_v48  ;;  %v6861_v62 = vunpack.c.h.bf16 %v6916_v48 }
 0x80e   :  { %3726 = vmatpush1.bf16.msra.mxu0 %v9538_v34 }
 0x80f   :  { %4175 = vmatprep.subr.bf16.mxu0 %v9118_v17 }
 0x891   :  { %v3174_v51 = vpop.f32.mrf.mxu0 }
 0x892   :  { %v3175_v16 = vadd.f32 %v6860_v58, %v3174_v51  ;;  %v6856_v51 = vunpack.c.l.bf16 %v6915_v47  ;;  %v6857_v58 = vunpack.c.h.bf16 %v6915_v47 }
 0x893   :  { %v7097_v1 = vpop.f32.mrf.mxu0 }
 0x894   :  { %v6446_v46 = vmul.f32 -1.442695, %v3175_v16 }
 0x895   :  { %v3177_v53 = vpop.f32.mrf.mxu0 }
 0x896   :  { %7771 = vpow2.f32 %v6446_v46  ;;  %v3178_v22 = vadd.f32 %v6861_v62, %v3177_v53 }
 0x897   :  { %v7098_v33 = vpop.f32.mrf.mxu0 }
 0x898   :  { %v6447_v20 = vmul.f32 -1.442695, %v3178_v22 }
 0x89a   :  { %7773 = vpow2.f32 %v6447_v20 }
 0x8a3   :  { %v7772_v34 = vpop.eup %7771 }
 0x8a4   :  { %v3187_v54 = vadd.f32 1.0, %v7772_v34 }
 0x8a6   :  { %7775 = vrcp.f32 %v3187_v54 }
 0x8a7   :  { %v7774_v50 = vpop.eup %7773 }
 0x8a8   :  { %v3188_v17 = vadd.f32 1.0, %v7774_v50 }
 0x8aa   :  { %7777 = vrcp.f32 %v3188_v17 }
 0x8b3   :  { %v7776_v1 = vpop.eup %7775 }
 0x8b4   :  { %v3195_v48 = vmul.f32 %v7776_v1, %v6856_v51 }
 0x8b7   :  { %v7778_v16 = vpop.eup %7777 }
 0x8b8   :  { %v3196_v46 = vmul.f32 %v7778_v16, %v6857_v58 }
 0x8ba   :  { %v3197_v62 = vpack.c.bf16 %v3196_v46, %v3195_v48 }
 0x8bc   :  { %3701 = vmatmul.mubr.bf16.vlgmr.msra.gmra.mxu1 %v3197_v62  ;;  %3744 = vmatmul.mubr.bf16.vlgmr.msra.gmra.mxu0 %v3197_v62 }
 0x8bd   :  { %4176 = vmatpush1.bf16.msra.mxu0 %v9123_v24  ;;  %7115 = vmatprep.mubr.msk.bf16.mxu1 %vm7953_vm0, %v10352_v59  ;;  %v7491_v24 = vld [vmem:[%s10269_s2 + $0x38] sm:$0xff]  }
 0x8be   :  { %4177 = vmatprep.subr.bf16.mxu0 %v9134_v56  ;;  %4207 = vmatprep.mubr.bf16.mxu0 %v10351_v12  ;;  %v7492_v56 = vld [vmem:[%s10269_s2 + $0x30] sm:$0xff]  }
 0x8bf   :  { %7100 = vmatpush3.bf16.msra.mxu1 %v7491_v24 }
 0x8c0   :  { %7101 = vmatprep.subr.bf16.mxu1 %v10352_v59 }
 0x8c1   :  { %4178 = vmatpush1.bf16.msra.mxu0 %v9139_v18  ;;  %v7493_v18 = vld [vmem:[%s10269_s2 + $0x28] sm:$0xff]  }
 0x8c2   :  { %4179 = vmatprep.subr.bf16.mxu0 %v9150_v37  ;;  %v7494_v37 = vld [vmem:[%s10269_s2 + $0x20] sm:$0xff]  }
 0x8c3   :  { %7102 = vmatpush3.bf16.msra.mxu1 %v7492_v56 }
 0x8c4   :  { %7103 = vmatprep.subr.bf16.mxu1 %v10352_v59 }
 0x8c5   :  { %4180 = vmatpush1.bf16.msra.mxu0 %v9155_v43  ;;  %v7495_v43 = vld [vmem:[%s10269_s2 + $0x18] sm:$0xff]  }
 0x8c6   :  { %4181 = vmatprep.subr.bf16.mxu0 %v9171_v7  ;;  %v7497_v7 = vld [vmem:[%s10269_s2 + $0x8] sm:$0xff]  }
 0x8c7   :  { %7104 = vmatpush3.bf16.msra.mxu1 %v7493_v18 }
 0x8c8   :  { %7105 = vmatprep.subr.bf16.mxu1 %v10352_v59 }
 0x8c9   :  { %4182 = vmatpush1.bf16.msra.mxu0 %v9166_v63  ;;  %v7496_v63 = vld [vmem:[%s10269_s2 + $0x10] sm:$0xff]  }
 0x8ca   :  { %4183 = vmatprep.subr.bf16.mxu0 %v9176_v8  ;;  %v7498_v8 = vld [vmem:[%s10269_s2] sm:$0xff]  }
 0x8cb   :  { %7106 = vmatpush3.bf16.msra.mxu1 %v7494_v37 }
 0x8cc   :  { %7107 = vmatprep.subr.bf16.mxu1 %v10352_v59 }
 0x8cd   :  { %4184 = vmatpush1.bf16.msra.mxu0 %v9187_v10  ;;  %v3456_v10 = vpop.f32.mrf.mxu1 }
 0x8ce   :  { %4185 = vmatprep.subr.bf16.mxu0 %v9193_v4  ;;  %v3499_v4 = vpop.f32.mrf.mxu0 }
 0x8cf   :  { %7108 = vmatpush3.bf16.msra.mxu1 %v7495_v43 }
 0x8d0   :  { %7109 = vmatprep.subr.bf16.mxu1 %v10352_v59 }
 0x8d1   :  { %4186 = vmatpush1.bf16.msra.mxu0 %v9203_v13  ;;  %v3458_v13 = vpop.f32.mrf.mxu1 }
 0x8d2   :  { %4187 = vmatprep.subr.bf16.mxu0 %v9209_v0  ;;  %v3501_v0 = vpop.f32.mrf.mxu0 }
 0x8d3   :  { %7110 = vmatpush3.bf16.msra.mxu1 %v7496_v63 }
 0x8d4   :  { %7111 = vmatprep.subr.bf16.mxu1 %v10352_v59 }
 0x8d5   :  { %4188 = vmatpush1.bf16.msra.mxu0 %v9219_v31  ;;  %v3460_v31 = vpop.f32.mrf.mxu1 }
 0x8d6   :  { %4189 = vmatprep.subr.bf16.mxu0 %v9225_v26  ;;  %v3503_v26 = vpop.f32.mrf.mxu0 }
 0x8d7   :  { %7112 = vmatpush3.bf16.msra.mxu1 %v7497_v7 }
 0x8d8   :  { %7113 = vmatprep.subr.bf16.mxu1 %v10352_v59  ;;  %v3505_v50 = vpop.f32.mrf.mxu0 }
 0x8d9   :  { %4190 = vmatpush1.bf16.msra.mxu0 %v9235_v38  ;;  %v3462_v38 = vpop.f32.mrf.mxu1 }
 0x8da   :  { %4421 = vmatprep.subr.bf16.mxu0 %v9360_v60 }
 0x8db   :  { %7114 = vmatpush3.bf16.msra.mxu1 %v7498_v8 }
 0x8dc   :  { %4218 = vmatprep.subr.bf16.mxu1 %v9240_v39 }
 0x97c   :  { %v3702_v54 = vpop.f32.mrf.mxu1  ;;  %v3745_v60 = vpop.f32.mrf.mxu0 }
 0x97d   :  { %v3703_v34 = vadd.f32 %v3702_v54, %v3456_v10  ;;  %v3746_v43 = vadd.f32 %v3745_v60, %v3499_v4 }
 0x97e   :  { %v3704_v53 = vpop.f32.mrf.mxu1  ;;  %v3747_v22 = vpop.f32.mrf.mxu0 }
 0x97f   :  { %v3754_v20 = vadd.f32 %v3703_v34, %v8432_v23  ;;  %v3705_v47 = vadd.f32 %v3704_v53, %v3458_v13  ;;  %v3748_v37 = vadd.f32 %v3747_v22, %v3501_v0  ;;  %v3756_v8 = vadd.f32 %v3746_v43, %v8442_v21 }
 0x980   :  { %v3706_v33 = vpop.f32.mrf.mxu1  ;;  %v3749_v16 = vpop.f32.mrf.mxu0 }
 0x981   :  { %v6512_v17 = vmul.f32 -1.442695, %v3754_v20  ;;  %v3755_v39 = vadd.f32 %v3705_v47, %v8434_v28  ;;  %v3707_v51 = vadd.f32 %v3706_v33, %v3460_v31  ;;  %v3757_v7 = vadd.f32 %v3748_v37, %v8440_v19 }
 0x982   :  { %v3708_v58 = vpop.f32.mrf.mxu1  ;;  %v3751_v18 = vpop.f32.mrf.mxu0  ;;  %v3750_v13 = vadd.f32 %v3749_v16, %v3503_v26 }
 0x983   :  { %7779 = vpow2.f32 %v6512_v17  ;;  %v6514_v1 = vmul.f32 -1.442695, %v3755_v39  ;;  %v3709_v48 = vadd.f32 %v3708_v58, %v3462_v38  ;;  %v3758_v46 = vadd.f32 %v3707_v51, %v8432_v23 }
 0x984   :  { %v3752_v63 = vadd.f32 %v3751_v18, %v3505_v50  ;;  %v6516_v38 = vmul.f32 -1.442695, %v3757_v7  ;;  %v3760_v0 = vadd.f32 %v3750_v13, %v8442_v21 }
 0x985   :  { %7781 = vpow2.f32 %v6514_v1  ;;  %v3759_v62 = vadd.f32 %v3709_v48, %v8434_v28  ;;  %v6513_v24 = vmul.f32 -1.442695, %v3758_v46 }
 0x986   :  { %v3761_v10 = vadd.f32 %v3752_v63, %v8440_v19 }
 0x987   :  { %v6515_v56 = vmul.f32 -1.442695, %v3759_v62  ;;  %7783 = vpow2.f32 %v6513_v24 }
 0x988   :  { %v6517_v53 = vmul.f32 -1.442695, %v3761_v10 }
 0x989   :  { %7785 = vpow2.f32 %v6515_v56 }
 0x98a   :  { %7787 = vtanh.f32 %v3756_v8 }
 0x990   :  { %v7780_v31 = vpop.eup %7779 }
 0x991   :  { %v3768_v54 = vadd.f32 1.0, %v7780_v31 }
 0x992   :  { %v7782_v34 = vpop.eup %7781 }
 0x993   :  { %7789 = vrcp.f32 %v3768_v54  ;;  %v3780_v20 = vadd.f32 1.0, %v7782_v34 }
 0x994   :  { %7791 = vpow2.f32 %v6516_v38  ;;  %v7784_v4 = vpop.eup %7783 }
 0x995   :  { %7793 = vrcp.f32 %v3780_v20  ;;  %v3769_v60 = vadd.f32 1.0, %v7784_v4 }
 0x996   :  { %v7786_v50 = vpop.eup %7785  ;;  %7795 = vpow2.f32 %v6517_v53 }
 0x997   :  { %7797 = vtanh.f32 %v3760_v0  ;;  %v3781_v47 = vadd.f32 1.0, %v7786_v50  ;;  %v7788_v26 = vpop.eup %7787 }
 0x998   :  { %7799 = vrcp.f32 %v3769_v60 }
 0x999   :  { %7801 = vrcp.f32 %v3781_v47 }
 0x9a0   :  { %v7790_v22 = vpop.eup %7789 }
 0x9a1   :  { %v7792_v33 = vpop.eup %7791  ;;  %v3802_v51 = vmul.f32 %v7790_v22, %v7788_v26 }
 0x9a2   :  { %v7794_v17 = vpop.eup %7793  ;;  %v3794_v16 = vadd.f32 1.0, %v7792_v33 }
 0x9a3   :  { %v7796_v39 = vpop.eup %7795  ;;  %v3800_v58 = vmul.f32 %v7794_v17, %v9254_v49  ;;  %v6918_v17 = vld [vmem:[%s10273_s0 + $0x28] sm:$0xff]  }
 0x9a4   :  { %v7798_v1 = vpop.eup %7797  ;;  %v3795_v24 = vadd.f32 1.0, %v7796_v39  ;;  %7803 = vrcp.f32 %v3794_v16  ;;  %v6869_v39 = vunpack.c.l.bf16 %v6918_v17 }
 0x9a5   :  { %v7800_v48 = vpop.eup %7799  ;;  %v9617_v46 = vadd.f32 %v3802_v51, %v3800_v58  ;;  %v6870_v51 = vunpack.c.h.bf16 %v6918_v17 }
 0x9a6   :  { %v7802_v62 = vpop.eup %7801  ;;  %v3803_v56 = vmul.f32 %v7800_v48, %v7798_v1 }
 0x9a7   :  { %v3801_v18 = vmul.f32 %v7802_v62, %v9257_v35  ;;  %7805 = vtanh.f32 %v9617_v46  ;;  %v10423_v35 = vld [vmem:[#allocation16_spill] sm:$0xff] }
 0x9a8   :  { %7807 = vrcp.f32 %v3795_v24  ;;  %v7499_v24 = vld [vmem:[%s10269_s2 + $0x38] sm:$0xff]  }
 0x9a9   :  { %v9620_v37 = vadd.f32 %v3803_v56, %v3801_v18  ;;  %v9692_v56 = vld [vmem:[%s10270_s4 + $0xe4] ss:$16 sps:$4 sm:$0xff]   ;;  %v9697_v18 = vld [vmem:[%s10270_s4 + $0xe0] ss:$16 sps:$4 sm:$0xff]  }
 0x9ab   :  { %7809 = vtanh.f32 %v9620_v37 }
 0x9b1   :  { %v7804_v43 = vpop.eup %7803 }
 0x9b4   :  { %v7806_v49 = vpop.eup %7805 }
 0x9b5   :  { %v7808_v63 = vpop.eup %7807  ;;  %v3808_v8 = vmul.f32 %v7806_v49, %v7804_v43  ;;  %v7503_v43 = vld [vmem:[%s10269_s2 + $0x30] sm:$0xff]  }
 0x9b6   :  { %v9708_v49 = vld [vmem:[%s10270_s4 + $0xc4] ss:$16 sps:$4 sm:$0xff]  }
 0x9b8   :  { %v7810_v7 = vpop.eup %7809 }
 0x9b9   :  { %v3809_v10 = vmul.f32 %v7810_v7, %v7808_v63  ;;  %v9713_v63 = vld [vmem:[%s10270_s4 + $0xc0] ss:$16 sps:$4 sm:$0xff]   ;;  %v7507_v7 = vld [vmem:[%s10269_s2 + $0x28] sm:$0xff]  }
 0x9bb   :  { %v3810_v13 = vpack.c.bf16 %v3809_v10, %v3808_v8  ;;  %v9724_v8 = vld [vmem:[%s10270_s4 + $0xa4] ss:$16 sps:$4 sm:$0xff]   ;;  %v9729_v10 = vld [vmem:[%s10270_s4 + $0xa0] ss:$16 sps:$4 sm:$0xff]  }
 0x9bd   :  { %6917 = vst [vmem:[%s10275_s6 + $0x20] sm:$0xff] %v3810_v13   ;;  %7116 = vmatmul.mubr.bf16.vlgmr.msra.gmra.mxu1 %v3810_v13  ;;  %4208 = vmatmul.mubr.bf16.vlgmr.msra.gmra.mxu0 %v3810_v13 }
 0x9be   :  { %4219 = vmatpush1.bf16.msra.mxu1 %v9264_v41  ;;  %4250 = vmatprep.mubr.bf16.mxu1 %v10351_v12  ;;  %v10424_v41 = vld [vmem:[#allocation19_spill] sm:$0xff] }
 0x9bf   :  { %4220 = vmatprep.subr.bf16.mxu1 %v9269_v5  ;;  %4422 = vmatpush1.bf16.msra.mxu0 %v9370_v3  ;;  %v10425_v5 = vld [vmem:[#allocation4_spill] sm:$0xff]  ;;  %v10436_v3 = vld [vmem:[#allocation9_spill] sm:$0xff] }
 0x9c0   :  { %4423 = vmatprep.subr.bf16.mxu0 %v9384_v6  ;;  %4453 = vmatprep.mubr.bf16.mxu0 %v10351_v12  ;;  %v10437_v6 = vld [vmem:[#allocation10_spill] sm:$0xff] }
 0x9c2   :  { %4221 = vmatpush1.bf16.msra.mxu1 %v9278_v55  ;;  %v10426_v55 = vld [vmem:[#allocation17_spill] sm:$0xff] }
 0x9c3   :  { %4222 = vmatprep.subr.bf16.mxu1 %v9285_v15  ;;  %4424 = vmatpush1.bf16.msra.mxu0 %v9394_v14  ;;  %v10427_v15 = vld [vmem:[#allocation22_spill] sm:$0xff]  ;;  %v10438_v14 = vld [vmem:[#allocation12_spill] sm:$0xff] }
 0x9c4   :  { %4425 = vmatprep.subr.bf16.mxu0 %v9408_v52  ;;  %v10439_v52 = vld [vmem:[#allocation11_spill] sm:$0xff] }
 0x9c6   :  { %4223 = vmatpush1.bf16.msra.mxu1 %v9292_v29  ;;  %v10428_v29 = vld [vmem:[#allocation5_spill] sm:$0xff] }
 0x9c7   :  { %4224 = vmatprep.subr.bf16.mxu1 %v9298_v36  ;;  %4426 = vmatpush1.bf16.msra.mxu0 %v9418_v61  ;;  %v10429_v36 = vld [vmem:[#allocation21_spill] sm:$0xff] }
 0x9c8   :  { %4427 = vmatprep.subr.bf16.mxu0 %v9432_v30  ;;  %v10440_v61 = vld [vmem:[#allocation13_spill] sm:$0xff]  ;;  %v10441_v30 = vld [vmem:[#allocation14_spill] sm:$0xff] }
 0x9ca   :  { %4225 = vmatpush1.bf16.msra.mxu1 %v9304_v40  ;;  %v10430_v40 = vld [vmem:[#allocation20_spill] sm:$0xff] }
 0x9cb   :  { %4226 = vmatprep.subr.bf16.mxu1 %v9310_v9  ;;  %4428 = vmatpush1.bf16.msra.mxu0 %v9442_v25  ;;  %v10431_v9 = vld [vmem:[#allocation24_spill] sm:$0xff]  ;;  %v10442_v25 = vld [vmem:[#allocation15_spill] sm:$0xff] }
 0x9cc   :  { %4429 = vmatprep.subr.bf16.mxu0 %v9454_v2  ;;  %v10443_v2 = vld [vmem:[#allocation18_spill] sm:$0xff] }
 0x9ce   :  { %4227 = vmatpush1.bf16.msra.mxu1 %v9316_v27  ;;  %v10432_v27 = vld [vmem:[#allocation6_spill] sm:$0xff] }
 0x9cf   :  { %4228 = vmatprep.subr.bf16.mxu1 %v9322_v32  ;;  %4430 = vmatpush1.bf16.msra.mxu0 %v9461_v11  ;;  %v10433_v32 = vld [vmem:[#allocation7_spill] sm:$0xff]  ;;  %v10444_v11 = vld [vmem:[#allocation25_spill] sm:$0xff] }
 0x9d0   :  { %4431 = vmatprep.subr.bf16.mxu0 %v9480_v45  ;;  %v10445_v45 = vld [vmem:[#allocation26_spill] sm:$0xff] }
 0x9d2   :  { %4229 = vmatpush1.bf16.msra.mxu1 %v9328_v44  ;;  %v10434_v44 = vld [vmem:[#allocation23_spill] sm:$0xff] }
 0x9d3   :  { %4230 = vmatprep.subr.bf16.mxu1 %v9334_v42  ;;  %4432 = vmatpush1.bf16.msra.mxu0 %v9490_v57  ;;  %v10435_v42 = vld [vmem:[#allocation8_spill] sm:$0xff]  ;;  %v6919_v57 = vld [vmem:[%s10272_s1 + $0x28] sm:$0xff]  }
 0x9d4   :  { %4433 = vmatprep.subr.bf16.mxu0 %v10423_v35  ;;  %v6873_v31 = vunpack.c.l.bf16 %v6919_v57  ;;  %v6874_v34 = vunpack.c.h.bf16 %v6919_v57  ;;  %v9740_v35 = vld [vmem:[%s10270_s4 + $0x80] ss:$16 sps:$4 sm:$0xff]  }
 0x9d6   :  { %4231 = vmatpush1.bf16.msra.mxu1 %v10424_v41  ;;  %v9745_v41 = vld [vmem:[%s10270_s4 + $0x84] ss:$16 sps:$4 sm:$0xff]  }
 0x9d7   :  { %4232 = vmatprep.subr.bf16.mxu1 %v10425_v5  ;;  %4434 = vmatpush1.bf16.msra.mxu0 %v10426_v55  ;;  %v9750_v5 = vld [vmem:[%s10270_s4 + $0x64] ss:$16 sps:$4 sm:$0xff]   ;;  %v7515_v55 = vld [vmem:[%s10269_s2 + $0x18] sm:$0xff]  }
 0x9d8   :  { %4435 = vmatprep.subr.bf16.mxu0 %v10427_v15  ;;  %v9761_v15 = vld [vmem:[%s10270_s4 + $0x60] ss:$16 sps:$4 sm:$0xff]  }
 0x9da   :  { %4233 = vmatpush1.bf16.msra.mxu1 %v10428_v29  ;;  %v9767_v29 = vld [vmem:[%s10270_s4 + $0x44] ss:$16 sps:$4 sm:$0xff]  }
 0x9db   :  { %4464 = vmatprep.subr.bf16.mxu1 %v10429_v36  ;;  %4436 = vmatpush1.bf16.msra.mxu0 %v10430_v40  ;;  %v7519_v36 = vld [vmem:[%s10269_s2 + $0x10] sm:$0xff]  }
 0x9dc   :  { %7119 = vmatprep.subr.bf16.mxu0 %v10352_v59  ;;  %v9777_v40 = vld [vmem:[%s10270_s4 + $0x40] ss:$16 sps:$4 sm:$0xff]  }
 0x9dd   :  { %4251 = vmatmul.mubr.bf16.vlgmr.msra.gmra.mxu1 %v3810_v13  ;;  %v7511_v13 = vld [vmem:[%s10269_s2 + $0x20] sm:$0xff]  }
 0x9de   :  { %4465 = vmatpush1.bf16.msra.mxu1 %v10431_v9  ;;  %4496 = vmatprep.mubr.bf16.mxu1 %v10351_v12  ;;  %v9783_v9 = vld [vmem:[%s10270_s4 + $0x24] ss:$16 sps:$4 sm:$0xff]  }
 0x9df   :  { %4466 = vmatprep.subr.bf16.mxu1 %v10432_v27  ;;  %v7523_v27 = vld [vmem:[%s10269_s2 + $0x8] sm:$0xff]  }
 0x9e2   :  { %4467 = vmatpush1.bf16.msra.mxu1 %v10433_v32  ;;  %v9793_v32 = vld [vmem:[%s10270_s4 + $0x20] ss:$16 sps:$4 sm:$0xff]  }
 0x9e3   :  { %4468 = vmatprep.subr.bf16.mxu1 %v10434_v44  ;;  %v9799_v44 = vld [vmem:[%s10270_s4 + $0x4] ss:$16 sps:$4 sm:$0xff]  }
 0x9e6   :  { %4469 = vmatpush1.bf16.msra.mxu1 %v10435_v42  ;;  %v7527_v42 = vld [vmem:[%s10269_s2] sm:$0xff]  }
 0x9e7   :  { %4470 = vmatprep.subr.bf16.mxu1 %v10436_v3  ;;  %v9809_v3 = vld [vmem:[%s10270_s4] ss:$16 sps:$4 sm:$0xff]  }
 0x9ea   :  { %4471 = vmatpush1.bf16.msra.mxu1 %v10437_v6  ;;  %v9814_v6 = vld [vmem:[%s10270_s4 + $0xec] ss:$16 sps:$4 sm:$0xff]  }
 0x9eb   :  { %4472 = vmatprep.subr.bf16.mxu1 %v10438_v14 }
 0x9ee   :  { %4473 = vmatpush1.bf16.msra.mxu1 %v10439_v52 }
 0x9ef   :  { %4474 = vmatprep.subr.bf16.mxu1 %v10440_v61 }
 0x9f2   :  { %4475 = vmatpush1.bf16.msra.mxu1 %v10441_v30 }
 0x9f3   :  { %4476 = vmatprep.subr.bf16.mxu1 %v10442_v25 }
 0x9f6   :  { %4477 = vmatpush1.bf16.msra.mxu1 %v10443_v2 }
 0x9f7   :  { %4478 = vmatprep.subr.bf16.mxu1 %v10444_v11 }
 0x9fa   :  { %4479 = vmatpush1.bf16.msra.mxu1 %v10445_v45 }
 0x9fb   :  { %4928 = vmatprep.subr.bf16.mxu1 %v9692_v56 }
 0xa7d   :  { %v3927_v38 = vpop.f32.mrf.mxu1  ;;  %v4209_v14 = vpop.f32.mrf.mxu0 }
 0xa7e   :  { %v3928_v54 = vadd.f32 %v6873_v31, %v3927_v38 }
 0xa7f   :  { %v7117_v53 = vpop.f32.mrf.mxu1  ;;  %v4211_v61 = vpop.f32.mrf.mxu0 }
 0xa80   :  { %v6534_v20 = vmul.f32 -1.442695, %v3928_v54 }
 0xa81   :  { %v3930_v0 = vpop.f32.mrf.mxu1  ;;  %v4213_v25 = vpop.f32.mrf.mxu0 }
 0xa82   :  { %7811 = vpow2.f32 %v6534_v20  ;;  %v3931_v4 = vadd.f32 %v6874_v34, %v3930_v0 }
 0xa83   :  { %v7118_v50 = vpop.f32.mrf.mxu1  ;;  %v4215_v11 = vpop.f32.mrf.mxu0 }
 0xa84   :  { %v6535_v60 = vmul.f32 -1.442695, %v3931_v4 }
 0xa86   :  { %7813 = vpow2.f32 %v6535_v60 }
 0xa8f   :  { %v7812_v47 = vpop.eup %7811 }
 0xa90   :  { %v3940_v26 = vadd.f32 1.0, %v7812_v47 }
 0xa92   :  { %7815 = vrcp.f32 %v3940_v26 }
 0xa93   :  { %v7814_v22 = vpop.eup %7813 }
 0xa94   :  { %v3941_v33 = vadd.f32 1.0, %v7814_v22 }
 0xa96   :  { %7817 = vrcp.f32 %v3941_v33 }
 0xa9d   :  { %v4252_v52 = vpop.f32.mrf.mxu1 }
 0xa9f   :  { %v7816_v58 = vpop.eup %7815  ;;  %v4254_v30 = vpop.f32.mrf.mxu1 }
 0xaa0   :  { %v3948_v16 = vmul.f32 %v7816_v58, %v6869_v39 }
 0xaa1   :  { %v4256_v2 = vpop.f32.mrf.mxu1 }
 0xaa3   :  { %v7818_v1 = vpop.eup %7817  ;;  %v4258_v45 = vpop.f32.mrf.mxu1 }
 0xaa4   :  { %v3949_v48 = vmul.f32 %v7818_v1, %v6870_v51 }
 0xaa6   :  { %v3950_v62 = vpack.c.bf16 %v3949_v48, %v3948_v16 }
 0xaa8   :  { %4454 = vmatmul.mubr.bf16.vlgmr.msra.gmra.mxu0 %v3950_v62  ;;  %4497 = vmatmul.mubr.bf16.vlgmr.msra.gmra.mxu1 %v3950_v62 }
 0xaa9   :  { %7135 = vmatprep.mubr.msk.bf16.mxu0 %vm7953_vm0, %v10352_v59  ;;  %4960 = vmatprep.mubr.bf16.mxu1 %v10351_v12 }
 0xaaa   :  { %7120 = vmatpush3.bf16.msra.mxu0 %v7499_v24  ;;  %4929 = vmatpush1.bf16.msra.mxu1 %v9697_v18 }
 0xaab   :  { %7121 = vmatprep.subr.bf16.mxu0 %v10352_v59  ;;  %4930 = vmatprep.subr.bf16.mxu1 %v9708_v49 }
 0xaae   :  { %7122 = vmatpush3.bf16.msra.mxu0 %v7503_v43  ;;  %4931 = vmatpush1.bf16.msra.mxu1 %v9713_v63 }
 0xaaf   :  { %7123 = vmatprep.subr.bf16.mxu0 %v10352_v59  ;;  %4932 = vmatprep.subr.bf16.mxu1 %v9724_v8 }
 0xab2   :  { %7124 = vmatpush3.bf16.msra.mxu0 %v7507_v7  ;;  %4933 = vmatpush1.bf16.msra.mxu1 %v9729_v10 }
 0xab3   :  { %7125 = vmatprep.subr.bf16.mxu0 %v10352_v59  ;;  %4934 = vmatprep.subr.bf16.mxu1 %v9745_v41 }
 0xab6   :  { %7126 = vmatpush3.bf16.msra.mxu0 %v7511_v13  ;;  %4935 = vmatpush1.bf16.msra.mxu1 %v9740_v35 }
 0xab7   :  { %7127 = vmatprep.subr.bf16.mxu0 %v10352_v59  ;;  %4936 = vmatprep.subr.bf16.mxu1 %v9750_v5 }
 0xaba   :  { %7128 = vmatpush3.bf16.msra.mxu0 %v7515_v55  ;;  %4937 = vmatpush1.bf16.msra.mxu1 %v9761_v15 }
 0xabb   :  { %7129 = vmatprep.subr.bf16.mxu0 %v10352_v59  ;;  %4938 = vmatprep.subr.bf16.mxu1 %v9767_v29 }
 0xabe   :  { %7130 = vmatpush3.bf16.msra.mxu0 %v7519_v36  ;;  %4939 = vmatpush1.bf16.msra.mxu1 %v9777_v40 }
 0xabf   :  { %7131 = vmatprep.subr.bf16.mxu0 %v10352_v59  ;;  %4940 = vmatprep.subr.bf16.mxu1 %v9783_v9 }
 0xac2   :  { %7132 = vmatpush3.bf16.msra.mxu0 %v7523_v27  ;;  %4941 = vmatpush1.bf16.msra.mxu1 %v9793_v32 }
 0xac3   :  { %7133 = vmatprep.subr.bf16.mxu0 %v10352_v59  ;;  %4942 = vmatprep.subr.bf16.mxu1 %v9799_v44 }
 0xac6   :  { %7134 = vmatpush3.bf16.msra.mxu0 %v7527_v42  ;;  %4943 = vmatpush1.bf16.msra.mxu1 %v9809_v3 }
 0xac7   :  { %4971 = vmatprep.subr.bf16.mxu0 %v9814_v6 }
 0xb68   :  { %v4455_v57 = vpop.f32.mrf.mxu0  ;;  %v4498_v31 = vpop.f32.mrf.mxu1 }
 0xb69   :  { %v4456_v38 = vadd.f32 %v4455_v57, %v4209_v14  ;;  %v4499_v48 = vadd.f32 %v4498_v31, %v4252_v52 }
 0xb6a   :  { %v4457_v54 = vpop.f32.mrf.mxu0  ;;  %v4500_v20 = vpop.f32.mrf.mxu1 }
 0xb6b   :  { %v4507_v34 = vadd.f32 %v4456_v38, %v8432_v23  ;;  %v4458_v53 = vadd.f32 %v4457_v54, %v4211_v61  ;;  %v4501_v16 = vadd.f32 %v4500_v20, %v4254_v30  ;;  %v4509_v43 = vadd.f32 %v4499_v48, %v8442_v21  ;;  %v9843_v48 = vld [vmem:[%s10270_s4 + $0xcc] ss:$16 sps:$4 sm:$0xff]  }
 0xb6c   :  { %v4459_v0 = vpop.f32.mrf.mxu0  ;;  %v4502_v22 = vpop.f32.mrf.mxu1 }
 0xb6d   :  { %v6600_v4 = vmul.f32 -1.442695, %v4507_v34  ;;  %v4508_v50 = vadd.f32 %v4458_v53, %v8434_v28  ;;  %v4460_v60 = vadd.f32 %v4459_v0, %v4213_v25  ;;  %v4510_v24 = vadd.f32 %v4501_v16, %v8440_v19  ;;  %v9838_v16 = vld [vmem:[%s10270_s4 + $0xe8] ss:$16 sps:$4 sm:$0xff]  }
 0xb6e   :  { %v4461_v47 = vpop.f32.mrf.mxu0  ;;  %v4504_v1 = vpop.f32.mrf.mxu1  ;;  %v4503_v13 = vadd.f32 %v4502_v22, %v4256_v2 }
 0xb6f   :  { %7819 = vpow2.f32 %v6600_v4  ;;  %v6602_v26 = vmul.f32 -1.442695, %v4508_v50  ;;  %v4462_v33 = vadd.f32 %v4461_v47, %v4215_v11  ;;  %v4511_v17 = vadd.f32 %v4460_v60, %v8432_v23 }
 0xb70   :  { %v4505_v62 = vadd.f32 %v4504_v1, %v4258_v45  ;;  %v6604_v36 = vmul.f32 -1.442695, %v4510_v24  ;;  %v4513_v30 = vadd.f32 %v4503_v13, %v8442_v21  ;;  %v9859_v24 = vld [vmem:[%s10270_s4 + $0xac] ss:$16 sps:$4 sm:$0xff]   ;;  %v9878_v13 = vld [vmem:[%s10270_s4 + $0x88] ss:$16 sps:$4 sm:$0xff]  }
 0xb71   :  { %7821 = vpow2.f32 %v6602_v26  ;;  %v4512_v39 = vadd.f32 %v4462_v33, %v8434_v28  ;;  %v6601_v51 = vmul.f32 -1.442695, %v4511_v17 }
 0xb72   :  { %v4514_v7 = vadd.f32 %v4505_v62, %v8440_v19  ;;  %v9852_v62 = vld [vmem:[%s10270_s4 + $0xc8] ss:$16 sps:$4 sm:$0xff]  }
 0xb73   :  { %v6603_v58 = vmul.f32 -1.442695, %v4512_v39  ;;  %7823 = vpow2.f32 %v6601_v51 }
 0xb74   :  { %v6605_v14 = vmul.f32 -1.442695, %v4514_v7  ;;  %v9872_v7 = vld [vmem:[%s10270_s4 + $0x8c] ss:$16 sps:$4 sm:$0xff]  }
 0xb75   :  { %7825 = vpow2.f32 %v6603_v58 }
 0xb76   :  { %7827 = vtanh.f32 %v4509_v43  ;;  %v9866_v43 = vld [vmem:[%s10270_s4 + $0xa8] ss:$16 sps:$4 sm:$0xff]  }
 0xb7c   :  { %v7820_v55 = vpop.eup %7819 }
 0xb7d   :  { %v4521_v27 = vadd.f32 1.0, %v7820_v55  ;;  %v9884_v55 = vld [vmem:[%s10270_s4 + $0x6c] ss:$16 sps:$4 sm:$0xff]  }
 0xb7e   :  { %v7822_v42 = vpop.eup %7821 }
 0xb7f   :  { %7829 = vrcp.f32 %v4521_v27  ;;  %v4533_v61 = vadd.f32 1.0, %v7822_v42  ;;  %v9896_v27 = vld [vmem:[%s10270_s4 + $0x4c] ss:$16 sps:$4 sm:$0xff]   ;;  %v9902_v42 = vld [vmem:[%s10270_s4 + $0x48] ss:$16 sps:$4 sm:$0xff]  }
 0xb80   :  { %7831 = vpow2.f32 %v6604_v36  ;;  %v7824_v52 = vpop.eup %7823  ;;  %v9890_v36 = vld [vmem:[%s10270_s4 + $0x68] ss:$16 sps:$4 sm:$0xff]  }
 0xb81   :  { %7833 = vrcp.f32 %v4533_v61  ;;  %v4522_v11 = vadd.f32 1.0, %v7824_v52  ;;  %v9914_v61 = vld [vmem:[%s10270_s4 + $0x28] ss:$16 sps:$4 sm:$0xff]  }
 0xb82   :  { %v7826_v25 = vpop.eup %7825  ;;  %7835 = vpow2.f32 %v6605_v14  ;;  %v9908_v14 = vld [vmem:[%s10270_s4 + $0x2c] ss:$16 sps:$4 sm:$0xff]   ;;  %10446 = vst [vmem:[#allocation16_spill] sm:$0xff] %v9914_v61  ;;  %v9926_v52 = vld [vmem:[%s10270_s4 + $0x8] ss:$16 sps:$4 sm:$0xff]  }
 0xb83   :  { %7837 = vtanh.f32 %v4513_v30  ;;  %v4534_v45 = vadd.f32 1.0, %v7826_v25  ;;  %v7828_v2 = vpop.eup %7827  ;;  %v9920_v30 = vld [vmem:[%s10270_s4 + $0xc] ss:$16 sps:$4 sm:$0xff]   ;;  %10448 = vst [vmem:[#allocation4_spill] sm:$0xff] %v9926_v52  ;;  %v9934_v25 = vld [vmem:[%s10271_s3 + $0xe4] ss:$16 sps:$4 sm:$0xff]  }
 0xb84   :  { %7839 = vrcp.f32 %v4522_v11  ;;  %10447 = vst [vmem:[#allocation19_spill] sm:$0xff] %v9920_v30  ;;  %v9939_v11 = vld [vmem:[%s10271_s3 + $0xec] ss:$16 sps:$4 sm:$0xff]   ;;  %5174 = vmatprep.subr.bf16.mxu1 %v9934_v25 }
 0xb85   :  { %7841 = vrcp.f32 %v4534_v45  ;;  %10449 = vst [vmem:[#allocation17_spill] sm:$0xff] %v9939_v11  ;;  %v9944_v45 = vld [vmem:[%s10271_s3 + $0xe0] ss:$16 sps:$4 sm:$0xff]  }
 0xb8c   :  { %v7830_v57 = vpop.eup %7829 }
 0xb8d   :  { %v7832_v31 = vpop.eup %7831  ;;  %v4555_v34 = vmul.f32 %v7830_v57, %v7828_v2  ;;  %v9949_v2 = vld [vmem:[%s10271_s3 + $0xe8] ss:$16 sps:$4 sm:$0xff]   ;;  %v9958_v57 = vld [vmem:[%s10271_s3 + $0xc4] ss:$16 sps:$4 sm:$0xff]  }
 0xb8e   :  { %v7834_v38 = vpop.eup %7833  ;;  %v4547_v0 = vadd.f32 1.0, %v7832_v31  ;;  %10450 = vst [vmem:[#allocation22_spill] sm:$0xff] %v9949_v2  ;;  %v9963_v31 = vld [vmem:[%s10271_s3 + $0xcc] ss:$16 sps:$4 sm:$0xff]  }
 0xb8f   :  { %v7836_v54 = vpop.eup %7835  ;;  %v4553_v53 = vmul.f32 %v7834_v38, %v9617_v46  ;;  %10451 = vst [vmem:[#allocation5_spill] sm:$0xff] %v9963_v31  ;;  %v9968_v38 = vld [vmem:[%s10271_s3 + $0xc0] ss:$16 sps:$4 sm:$0xff]  }
 0xb90   :  { %v7838_v20 = vpop.eup %7837  ;;  %v4548_v47 = vadd.f32 1.0, %v7836_v54  ;;  %7843 = vrcp.f32 %v4547_v0  ;;  %v9973_v54 = vld [vmem:[%s10271_s3 + $0xc8] ss:$16 sps:$4 sm:$0xff]  }
 0xb91   :  { %v7840_v4 = vpop.eup %7839  ;;  %v9828_v50 = vadd.f32 %v4555_v34, %v4553_v53  ;;  %10452 = vst [vmem:[#allocation21_spill] sm:$0xff] %v9973_v54  ;;  %v9982_v34 = vld [vmem:[%s10271_s3 + $0xa4] ss:$16 sps:$4 sm:$0xff]   ;;  %v9987_v53 = vld [vmem:[%s10271_s3 + $0xac] ss:$16 sps:$4 sm:$0xff]  }
 0xb92   :  { %v7842_v60 = vpop.eup %7841  ;;  %v4556_v26 = vmul.f32 %v7840_v4, %v7838_v20  ;;  %10453 = vst [vmem:[#allocation20_spill] sm:$0xff] %v9987_v53  ;;  %v9992_v20 = vld [vmem:[%s10271_s3 + $0xa0] ss:$16 sps:$4 sm:$0xff]   ;;  %v9997_v0 = vld [vmem:[%s10271_s3 + $0xa8] ss:$16 sps:$4 sm:$0xff]  }
 0xb93   :  { %v4554_v22 = vmul.f32 %v7842_v60, %v9620_v37  ;;  %7845 = vtanh.f32 %v9828_v50  ;;  %10454 = vst [vmem:[#allocation24_spill] sm:$0xff] %v9997_v0  ;;  %v10006_v4 = vld [vmem:[%s10271_s3 + $0x84] ss:$16 sps:$4 sm:$0xff]   ;;  %v10011_v60 = vld [vmem:[%s10271_s3 + $0x8c] ss:$16 sps:$4 sm:$0xff]  }
 0xb94   :  { %7847 = vrcp.f32 %v4548_v47  ;;  %10455 = vst [vmem:[#allocation6_spill] sm:$0xff] %v10011_v60  ;;  %v10016_v47 = vld [vmem:[%s10271_s3 + $0x80] ss:$16 sps:$4 sm:$0xff]  }
 0xb95   :  { %v9831_v33 = vadd.f32 %v4556_v26, %v4554_v22  ;;  %v10021_v26 = vld [vmem:[%s10271_s3 + $0x88] ss:$16 sps:$4 sm:$0xff]   ;;  %v10028_v22 = vld [vmem:[%s10271_s3 + $0x64] ss:$16 sps:$4 sm:$0xff]  }
 0xb96   :  { %10456 = vst [vmem:[#allocation7_spill] sm:$0xff] %v10021_v26 }
 0xb97   :  { %7849 = vtanh.f32 %v9831_v33 }
 0xb9d   :  { %v7844_v17 = vpop.eup %7843 }
 0xba0   :  { %v7846_v46 = vpop.eup %7845 }
 0xba1   :  { %v7848_v39 = vpop.eup %7847  ;;  %v4561_v58 = vmul.f32 %v7846_v46, %v7844_v17  ;;  %v10035_v17 = vld [vmem:[%s10271_s3 + $0x60] ss:$16 sps:$4 sm:$0xff]   ;;  %v10040_v46 = vld [vmem:[%s10271_s3 + $0x68] ss:$16 sps:$4 sm:$0xff]  }
 0xba2   :  { %10457 = vst [vmem:[#allocation23_spill] sm:$0xff] %v10040_v46 }
 0xba4   :  { %v7850_v51 = vpop.eup %7849 }
 0xba5   :  { %v4562_v1 = vmul.f32 %v7850_v51, %v7848_v39  ;;  %v10045_v39 = vld [vmem:[%s10271_s3 + $0x6c] ss:$16 sps:$4 sm:$0xff]   ;;  %v10054_v51 = vld [vmem:[%s10271_s3 + $0x44] ss:$16 sps:$4 sm:$0xff]  }
 0xba6   :  { %10458 = vst [vmem:[#allocation8_spill] sm:$0xff] %v10045_v39 }
 0xba7   :  { %v4563_v37 = vpack.c.bf16 %v4562_v1, %v4561_v58  ;;  %v10059_v58 = vld [vmem:[%s10271_s3 + $0x4c] ss:$16 sps:$4 sm:$0xff]   ;;  %v10064_v1 = vld [vmem:[%s10271_s3 + $0x40] ss:$16 sps:$4 sm:$0xff]  }
 0xba8   :  { %10459 = vst [vmem:[#allocation9_spill] sm:$0xff] %v10059_v58 }
 0xba9   :  { %6920 = vst [vmem:[%s10275_s6 + $0x28] sm:$0xff] %v4563_v37   ;;  %7136 = vmatmul.mubr.bf16.vlgmr.msra.gmra.mxu0 %v4563_v37  ;;  %4961 = vmatmul.mubr.bf16.vlgmr.msra.gmra.mxu1 %v4563_v37 }
 0xbaa   :  { %4972 = vmatpush1.bf16.msra.mxu0 %v9838_v16  ;;  %5003 = vmatprep.mubr.bf16.mxu0 %v10351_v12 }
 0xbab   :  { %4973 = vmatprep.subr.bf16.mxu0 %v9843_v48  ;;  %5206 = vmatprep.mubr.bf16.mxu1 %v10351_v12 }
 0xbac   :  { %5175 = vmatpush1.bf16.msra.mxu1 %v9944_v45 }
 0xbad   :  { %5176 = vmatprep.subr.bf16.mxu1 %v9958_v57 }
 0xbae   :  { %4974 = vmatpush1.bf16.msra.mxu0 %v9852_v62 }
 0xbaf   :  { %4975 = vmatprep.subr.bf16.mxu0 %v9859_v24 }
 0xbb0   :  { %5177 = vmatpush1.bf16.msra.mxu1 %v9968_v38 }
 0xbb1   :  { %5178 = vmatprep.subr.bf16.mxu1 %v9982_v34 }
 0xbb2   :  { %4976 = vmatpush1.bf16.msra.mxu0 %v9866_v43 }
 0xbb3   :  { %4977 = vmatprep.subr.bf16.mxu0 %v9872_v7 }
 0xbb4   :  { %5179 = vmatpush1.bf16.msra.mxu1 %v9992_v20 }
 0xbb5   :  { %5180 = vmatprep.subr.bf16.mxu1 %v10006_v4 }
 0xbb6   :  { %4978 = vmatpush1.bf16.msra.mxu0 %v9878_v13 }
 0xbb7   :  { %4979 = vmatprep.subr.bf16.mxu0 %v9884_v55 }
 0xbb8   :  { %5181 = vmatpush1.bf16.msra.mxu1 %v10016_v47 }
 0xbb9   :  { %5182 = vmatprep.subr.bf16.mxu1 %v10028_v22 }
 0xbba   :  { %4980 = vmatpush1.bf16.msra.mxu0 %v9890_v36 }
 0xbbb   :  { %4981 = vmatprep.subr.bf16.mxu0 %v9896_v27 }
 0xbbc   :  { %5183 = vmatpush1.bf16.msra.mxu1 %v10035_v17 }
 0xbbd   :  { %5184 = vmatprep.subr.bf16.mxu1 %v10054_v51 }
 0xbbe   :  { %4982 = vmatpush1.bf16.msra.mxu0 %v9902_v42 }
 0xbbf   :  { %4983 = vmatprep.subr.bf16.mxu0 %v9908_v14 }
 0xbc0   :  { %5185 = vmatpush1.bf16.msra.mxu1 %v10064_v1 }
 0xbc2   :  { %4984 = vmatpush1.bf16.msra.mxu0 %v9914_v61 }
 0xbc3   :  { %4985 = vmatprep.subr.bf16.mxu0 %v9920_v30 }
 0xbc6   :  { %4986 = vmatpush1.bf16.msra.mxu0 %v9926_v52 }
 0xbc7   :  { %5217 = vmatprep.subr.bf16.mxu0 %v9939_v11 }
 0xbc9   :  { %5004 = vmatmul.mubr.bf16.vlgmr.msra.gmra.mxu0 %v4563_v37  ;;  %v10069_v37 = vld [vmem:[%s10271_s3 + $0x48] ss:$16 sps:$4 sm:$0xff]  }
 0xbca   :  { %5249 = vmatprep.mubr.bf16.mxu0 %v10351_v12  ;;  %5218 = vmatpush1.bf16.msra.mxu0 %v9949_v2  ;;  %10460 = vst [vmem:[#allocation10_spill] sm:$0xff] %v10069_v37 }
 0xbcb   :  { %5219 = vmatprep.subr.bf16.mxu0 %v9963_v31 }
 0xbce   :  { %5220 = vmatpush1.bf16.msra.mxu0 %v9973_v54 }
 0xbcf   :  { %5221 = vmatprep.subr.bf16.mxu0 %v9987_v53 }
 0xbd2   :  { %5222 = vmatpush1.bf16.msra.mxu0 %v9997_v0  ;;  %v10112_v0 = vld [vmem:[%s10271_s3 + $0x8] ss:$16 sps:$4 sm:$0xff]  }
 0xbd3   :  { %5223 = vmatprep.subr.bf16.mxu0 %v10011_v60  ;;  %v10107_v60 = vld [vmem:[%s10271_s3 + $0x4] ss:$16 sps:$4 sm:$0xff]   ;;  %10467 = vst [vmem:[#allocation25_spill] sm:$0xff] %v10112_v0 }
 0xbd4   :  { %10466 = vst [vmem:[#allocation18_spill] sm:$0xff] %v10107_v60 }
 0xbd6   :  { %5224 = vmatpush1.bf16.msra.mxu0 %v10021_v26  ;;  %v10088_v26 = vld [vmem:[%s10271_s3 + $0x20] ss:$16 sps:$4 sm:$0xff]  }
 0xbd7   :  { %5225 = vmatprep.subr.bf16.mxu0 %v10045_v39  ;;  %v10083_v39 = vld [vmem:[%s10271_s3 + $0x2c] ss:$16 sps:$4 sm:$0xff]   ;;  %10463 = vst [vmem:[#allocation13_spill] sm:$0xff] %v10088_v26 }
 0xbd8   :  { %10462 = vst [vmem:[#allocation11_spill] sm:$0xff] %v10083_v39 }
 0xbda   :  { %5226 = vmatpush1.bf16.msra.mxu0 %v10040_v46  ;;  %v10078_v46 = vld [vmem:[%s10271_s3 + $0x24] ss:$16 sps:$4 sm:$0xff]  }
 0xbdb   :  { %5227 = vmatprep.subr.bf16.mxu0 %v10059_v58  ;;  %10461 = vst [vmem:[#allocation12_spill] sm:$0xff] %v10078_v46  ;;  %v10093_v58 = vld [vmem:[%s10271_s3 + $0x28] ss:$16 sps:$4 sm:$0xff]   ;;  %5186 = vmatprep.subr.bf16.mxu1 %v10078_v46  ;;  %v6921_v46 = vld [vmem:[%s10273_s0 + $0x30] sm:$0xff]  }
 0xbdc   :  { %10464 = vst [vmem:[#allocation14_spill] sm:$0xff] %v10093_v58  ;;  %5187 = vmatpush1.bf16.msra.mxu1 %v10088_v26 }
 0xbdd   :  { %5188 = vmatprep.subr.bf16.mxu1 %v10107_v60 }
 0xbde   :  { %5228 = vmatpush1.bf16.msra.mxu0 %v10069_v37  ;;  %v10102_v37 = vld [vmem:[%s10271_s3] ss:$16 sps:$4 sm:$0xff]  }
 0xbdf   :  { %5229 = vmatprep.subr.bf16.mxu0 %v10083_v39  ;;  %10465 = vst [vmem:[#allocation15_spill] sm:$0xff] %v10102_v37  ;;  %v10117_v39 = vld [vmem:[%s10271_s3 + $0xc] ss:$16 sps:$4 sm:$0xff]  }
 0xbe0   :  { %10468 = vst [vmem:[#allocation26_spill] sm:$0xff] %v10117_v39  ;;  %5189 = vmatpush1.bf16.msra.mxu1 %v10102_v37 }
 0xbe1   :  { %7139 = vmatprep.subr.bf16.mxu1 %v10352_v59 }
 0xbe2   :  { %5230 = vmatpush1.bf16.msra.mxu0 %v10093_v58  ;;  %v6922_v58 = vld [vmem:[%s10272_s1 + $0x30] sm:$0xff]  }
 0xbe3   :  { %5231 = vmatprep.subr.bf16.mxu0 %v10117_v39  ;;  %v6886_v53 = vunpack.c.l.bf16 %v6922_v58  ;;  %v6887_v2 = vunpack.c.h.bf16 %v6922_v58 }
 0xbe6   :  { %5232 = vmatpush1.bf16.msra.mxu0 %v10112_v0 }
 0xbe7   :  { %5681 = vmatprep.subr.bf16.mxu0 %v9692_v56 }
 0xc69   :  { %v4680_v54 = vpop.f32.mrf.mxu0 }
 0xc6a   :  { %v4681_v31 = vadd.f32 %v6886_v53, %v4680_v54  ;;  %v6882_v54 = vunpack.c.l.bf16 %v6921_v46  ;;  %v6883_v53 = vunpack.c.h.bf16 %v6921_v46 }
 0xc6b   :  { %v7137_v11 = vpop.f32.mrf.mxu0 }
 0xc6c   :  { %v6622_v52 = vmul.f32 -1.442695, %v4681_v31 }
 0xc6d   :  { %v4683_v60 = vpop.f32.mrf.mxu0 }
 0xc6e   :  { %7851 = vpow2.f32 %v6622_v52  ;;  %v4684_v39 = vadd.f32 %v6887_v2, %v4683_v60 }
 0xc6f   :  { %v7138_v37 = vpop.f32.mrf.mxu0 }
 0xc70   :  { %v6623_v26 = vmul.f32 -1.442695, %v4684_v39 }
 0xc72   :  { %7853 = vpow2.f32 %v6623_v26 }
 0xc7b   :  { %v7852_v0 = vpop.eup %7851 }
 0xc7c   :  { %v4693_v30 = vadd.f32 1.0, %v7852_v0 }
 0xc7e   :  { %7855 = vrcp.f32 %v4693_v30 }
 0xc7f   :  { %v7854_v61 = vpop.eup %7853 }
 0xc80   :  { %v4694_v56 = vadd.f32 1.0, %v7854_v61 }
 0xc82   :  { %7857 = vrcp.f32 %v4694_v56 }
 0xc8b   :  { %v7856_v11 = vpop.eup %7855 }
 0xc8c   :  { %v4701_v58 = vmul.f32 %v7856_v11, %v6882_v54 }
 0xc8f   :  { %v7858_v31 = vpop.eup %7857 }
 0xc90   :  { %v4702_v52 = vmul.f32 %v7858_v31, %v6883_v53 }
 0xc92   :  { %v4703_v2 = vpack.c.bf16 %v4702_v52, %v4701_v58 }
 0xc94   :  { %5207 = vmatmul.mubr.bf16.vlgmr.msra.gmra.mxu1 %v4703_v2  ;;  %5250 = vmatmul.mubr.bf16.vlgmr.msra.gmra.mxu0 %v4703_v2 }
 0xc95   :  { %5682 = vmatpush1.bf16.msra.mxu0 %v9697_v18  ;;  %7155 = vmatprep.mubr.msk.bf16.mxu1 %vm7953_vm0, %v10352_v59  ;;  %v7603_v18 = vld [vmem:[%s10269_s2 + $0x38] sm:$0xff]  }
 0xc96   :  { %5683 = vmatprep.subr.bf16.mxu0 %v9708_v49  ;;  %5713 = vmatprep.mubr.bf16.mxu0 %v10351_v12  ;;  %v7604_v49 = vld [vmem:[%s10269_s2 + $0x30] sm:$0xff]  }
 0xc97   :  { %7140 = vmatpush3.bf16.msra.mxu1 %v7603_v18 }
 0xc98   :  { %7141 = vmatprep.subr.bf16.mxu1 %v10352_v59 }
 0xc99   :  { %5684 = vmatpush1.bf16.msra.mxu0 %v9713_v63  ;;  %v7605_v63 = vld [vmem:[%s10269_s2 + $0x28] sm:$0xff]  }
 0xc9a   :  { %5685 = vmatprep.subr.bf16.mxu0 %v9724_v8  ;;  %v7606_v8 = vld [vmem:[%s10269_s2 + $0x20] sm:$0xff]  }
 0xc9b   :  { %7142 = vmatpush3.bf16.msra.mxu1 %v7604_v49 }
 0xc9c   :  { %7143 = vmatprep.subr.bf16.mxu1 %v10352_v59 }
 0xc9d   :  { %5686 = vmatpush1.bf16.msra.mxu0 %v9729_v10  ;;  %v7607_v10 = vld [vmem:[%s10269_s2 + $0x18] sm:$0xff]  }
 0xc9e   :  { %5687 = vmatprep.subr.bf16.mxu0 %v9745_v41  ;;  %v7609_v41 = vld [vmem:[%s10269_s2 + $0x8] sm:$0xff]  }
 0xc9f   :  { %7144 = vmatpush3.bf16.msra.mxu1 %v7605_v63 }
 0xca0   :  { %7145 = vmatprep.subr.bf16.mxu1 %v10352_v59 }
 0xca1   :  { %5688 = vmatpush1.bf16.msra.mxu0 %v9740_v35  ;;  %v7608_v35 = vld [vmem:[%s10269_s2 + $0x10] sm:$0xff]  }
 0xca2   :  { %5689 = vmatprep.subr.bf16.mxu0 %v9750_v5  ;;  %v7610_v5 = vld [vmem:[%s10269_s2] sm:$0xff]  }
 0xca3   :  { %7146 = vmatpush3.bf16.msra.mxu1 %v7606_v8 }
 0xca4   :  { %7147 = vmatprep.subr.bf16.mxu1 %v10352_v59 }
 0xca5   :  { %5690 = vmatpush1.bf16.msra.mxu0 %v9761_v15  ;;  %v4962_v15 = vpop.f32.mrf.mxu1 }
 0xca6   :  { %5691 = vmatprep.subr.bf16.mxu0 %v9767_v29  ;;  %v5005_v29 = vpop.f32.mrf.mxu0 }
 0xca7   :  { %7148 = vmatpush3.bf16.msra.mxu1 %v7607_v10 }
 0xca8   :  { %7149 = vmatprep.subr.bf16.mxu1 %v10352_v59 }
 0xca9   :  { %5692 = vmatpush1.bf16.msra.mxu0 %v9777_v40  ;;  %v4964_v40 = vpop.f32.mrf.mxu1 }
 0xcaa   :  { %5693 = vmatprep.subr.bf16.mxu0 %v9783_v9  ;;  %v5007_v9 = vpop.f32.mrf.mxu0 }
 0xcab   :  { %7150 = vmatpush3.bf16.msra.mxu1 %v7608_v35 }
 0xcac   :  { %7151 = vmatprep.subr.bf16.mxu1 %v10352_v59 }
 0xcad   :  { %5694 = vmatpush1.bf16.msra.mxu0 %v9793_v32  ;;  %v4966_v32 = vpop.f32.mrf.mxu1 }
 0xcae   :  { %5695 = vmatprep.subr.bf16.mxu0 %v9799_v44  ;;  %v5009_v44 = vpop.f32.mrf.mxu0 }
 0xcaf   :  { %7152 = vmatpush3.bf16.msra.mxu1 %v7609_v41 }
 0xcb0   :  { %7153 = vmatprep.subr.bf16.mxu1 %v10352_v59  ;;  %v5011_v61 = vpop.f32.mrf.mxu0 }
 0xcb1   :  { %5696 = vmatpush1.bf16.msra.mxu0 %v9809_v3  ;;  %v4968_v3 = vpop.f32.mrf.mxu1 }
 0xcb2   :  { %5927 = vmatprep.subr.bf16.mxu0 %v9934_v25 }
 0xcb3   :  { %7154 = vmatpush3.bf16.msra.mxu1 %v7610_v5 }
 0xcb4   :  { %5724 = vmatprep.subr.bf16.mxu1 %v9814_v6 }
 0xd54   :  { %v5208_v30 = vpop.f32.mrf.mxu1  ;;  %v5251_v25 = vpop.f32.mrf.mxu0 }
 0xd55   :  { %v5209_v0 = vadd.f32 %v5208_v30, %v4962_v15  ;;  %v5252_v8 = vadd.f32 %v5251_v25, %v5005_v29 }
 0xd56   :  { %v5210_v60 = vpop.f32.mrf.mxu1  ;;  %v5253_v39 = vpop.f32.mrf.mxu0 }
 0xd57   :  { %v5260_v26 = vadd.f32 %v5209_v0, %v8432_v23  ;;  %v5211_v46 = vadd.f32 %v5210_v60, %v4964_v40  ;;  %v5254_v63 = vadd.f32 %v5253_v39, %v5007_v9  ;;  %v5262_v41 = vadd.f32 %v5252_v8, %v8442_v21 }
 0xd58   :  { %v5212_v59 = vpop.f32.mrf.mxu1  ;;  %v5255_v11 = vpop.f32.mrf.mxu0 }
 0xd59   :  { %v6688_v37 = vmul.f32 -1.442695, %v5260_v26  ;;  %v5261_v6 = vadd.f32 %v5211_v46, %v8434_v28  ;;  %v5213_v56 = vadd.f32 %v5212_v59, %v4966_v32  ;;  %v5263_v35 = vadd.f32 %v5254_v63, %v8440_v19 }
 0xd5a   :  { %v5214_v54 = vpop.f32.mrf.mxu1  ;;  %v5257_v49 = vpop.f32.mrf.mxu0  ;;  %v5256_v15 = vadd.f32 %v5255_v11, %v5009_v44 }
 0xd5b   :  { %7859 = vpow2.f32 %v6688_v37  ;;  %v6690_v53 = vmul.f32 -1.442695, %v5261_v6  ;;  %v5215_v31 = vadd.f32 %v5214_v54, %v4968_v3  ;;  %v5264_v58 = vadd.f32 %v5213_v56, %v8432_v23 }
 0xd5c   :  { %v5258_v10 = vadd.f32 %v5257_v49, %v5011_v61  ;;  %v6692_v32 = vmul.f32 -1.442695, %v5263_v35  ;;  %v5266_v9 = vadd.f32 %v5256_v15, %v8442_v21 }
 0xd5d   :  { %7861 = vpow2.f32 %v6690_v53  ;;  %v5265_v52 = vadd.f32 %v5215_v31, %v8434_v28  ;;  %v6689_v2 = vmul.f32 -1.442695, %v5264_v58 }
 0xd5e   :  { %v5267_v5 = vadd.f32 %v5258_v10, %v8440_v19 }
 0xd5f   :  { %v6691_v18 = vmul.f32 -1.442695, %v5265_v52  ;;  %7863 = vpow2.f32 %v6689_v2 }
 0xd60   :  { %v6693_v0 = vmul.f32 -1.442695, %v5267_v5 }
 0xd61   :  { %7865 = vpow2.f32 %v6691_v18 }
 0xd62   :  { %7867 = vtanh.f32 %v5262_v41 }
 0xd68   :  { %v7860_v40 = vpop.eup %7859 }
 0xd69   :  { %v5274_v3 = vadd.f32 1.0, %v7860_v40 }
 0xd6a   :  { %v7862_v30 = vpop.eup %7861 }
 0xd6b   :  { %7869 = vrcp.f32 %v5274_v3  ;;  %v5286_v60 = vadd.f32 1.0, %v7862_v30 }
 0xd6c   :  { %7871 = vpow2.f32 %v6692_v32  ;;  %v7864_v29 = vpop.eup %7863 }
 0xd6d   :  { %7873 = vrcp.f32 %v5286_v60  ;;  %v5275_v25 = vadd.f32 1.0, %v7864_v29 }
 0xd6e   :  { %v7866_v61 = vpop.eup %7865  ;;  %7875 = vpow2.f32 %v6693_v0 }
 0xd6f   :  { %7877 = vtanh.f32 %v5266_v9  ;;  %v5287_v26 = vadd.f32 1.0, %v7866_v61  ;;  %v7868_v44 = vpop.eup %7867 }
 0xd70   :  { %7879 = vrcp.f32 %v5275_v25 }
 0xd71   :  { %7881 = vrcp.f32 %v5287_v26 }
 0xd78   :  { %v7870_v46 = vpop.eup %7869 }
 0xd79   :  { %v7872_v39 = vpop.eup %7871  ;;  %v5308_v6 = vmul.f32 %v7870_v46, %v7868_v44  ;;  %v6924_v46 = vld [vmem:[%s10273_s0 + $0x38] sm:$0xff]  }
 0xd7a   :  { %v7874_v59 = vpop.eup %7873  ;;  %v5300_v53 = vadd.f32 1.0, %v7872_v39  ;;  %v6895_v39 = vunpack.c.l.bf16 %v6924_v46 }
 0xd7b   :  { %v7876_v37 = vpop.eup %7875  ;;  %v5306_v56 = vmul.f32 %v7874_v59, %v9828_v50  ;;  %v6896_v59 = vunpack.c.h.bf16 %v6924_v46 }
 0xd7c   :  { %v7878_v54 = vpop.eup %7877  ;;  %v5301_v52 = vadd.f32 1.0, %v7876_v37  ;;  %7883 = vrcp.f32 %v5300_v53 }
 0xd7d   :  { %v7880_v11 = vpop.eup %7879  ;;  %v10191_v31 = vadd.f32 %v5308_v6, %v5306_v56 }
 0xd7e   :  { %v7882_v58 = vpop.eup %7881  ;;  %v5309_v2 = vmul.f32 %v7880_v11, %v7878_v54 }
 0xd7f   :  { %v5307_v18 = vmul.f32 %v7882_v58, %v9831_v33  ;;  %7885 = vtanh.f32 %v10191_v31  ;;  %v10469_v33 = vld [vmem:[#allocation12_spill] sm:$0xff] }
 0xd80   :  { %7887 = vrcp.f32 %v5301_v52 }
 0xd81   :  { %v10194_v49 = vadd.f32 %v5309_v2, %v5307_v18 }
 0xd83   :  { %7889 = vtanh.f32 %v10194_v49 }
 0xd89   :  { %v7884_v63 = vpop.eup %7883 }
 0xd8c   :  { %v7886_v50 = vpop.eup %7885 }
 0xd8d   :  { %v7888_v8 = vpop.eup %7887  ;;  %v5314_v35 = vmul.f32 %v7886_v50, %v7884_v63 }
 0xd90   :  { %v7890_v10 = vpop.eup %7889 }
 0xd91   :  { %v5315_v41 = vmul.f32 %v7890_v10, %v7888_v8 }
 0xd93   :  { %v5316_v5 = vpack.c.bf16 %v5315_v41, %v5314_v35 }
 0xd95   :  { %6923 = vst [vmem:[%s10275_s6 + $0x30] sm:$0xff] %v5316_v5   ;;  %7156 = vmatmul.mubr.bf16.vlgmr.msra.gmra.mxu1 %v5316_v5  ;;  %5714 = vmatmul.mubr.bf16.vlgmr.msra.gmra.mxu0 %v5316_v5 }
 0xd96   :  { %5725 = vmatpush1.bf16.msra.mxu1 %v9838_v16  ;;  %5756 = vmatprep.mubr.bf16.mxu1 %v10351_v12  ;;  %v10470_v16 = vld [vmem:[#allocation16_spill] sm:$0xff] }
 0xd97   :  { %5726 = vmatprep.subr.bf16.mxu1 %v9843_v48  ;;  %5928 = vmatpush1.bf16.msra.mxu0 %v9944_v45  ;;  %v10471_v48 = vld [vmem:[#allocation19_spill] sm:$0xff]  ;;  %v10482_v45 = vld [vmem:[#allocation6_spill] sm:$0xff] }
 0xd98   :  { %5929 = vmatprep.subr.bf16.mxu0 %v9958_v57  ;;  %5959 = vmatprep.mubr.bf16.mxu0 %v10351_v12  ;;  %v10483_v57 = vld [vmem:[#allocation7_spill] sm:$0xff] }
 0xd9a   :  { %5727 = vmatpush1.bf16.msra.mxu1 %v9852_v62  ;;  %v10472_v62 = vld [vmem:[#allocation13_spill] sm:$0xff] }
 0xd9b   :  { %5728 = vmatprep.subr.bf16.mxu1 %v9859_v24  ;;  %5930 = vmatpush1.bf16.msra.mxu0 %v9968_v38  ;;  %v10473_v24 = vld [vmem:[#allocation18_spill] sm:$0xff]  ;;  %v10484_v38 = vld [vmem:[#allocation8_spill] sm:$0xff] }
 0xd9c   :  { %5931 = vmatprep.subr.bf16.mxu0 %v9982_v34  ;;  %v10485_v34 = vld [vmem:[#allocation23_spill] sm:$0xff] }
 0xd9e   :  { %5729 = vmatpush1.bf16.msra.mxu1 %v9866_v43  ;;  %v10474_v43 = vld [vmem:[#allocation4_spill] sm:$0xff] }
 0xd9f   :  { %5730 = vmatprep.subr.bf16.mxu1 %v9872_v7  ;;  %5932 = vmatpush1.bf16.msra.mxu0 %v9992_v20  ;;  %v10475_v7 = vld [vmem:[#allocation17_spill] sm:$0xff] }
 0xda0   :  { %5933 = vmatprep.subr.bf16.mxu0 %v10006_v4  ;;  %v10486_v20 = vld [vmem:[#allocation9_spill] sm:$0xff]  ;;  %v10487_v4 = vld [vmem:[#allocation10_spill] sm:$0xff] }
 0xda2   :  { %5731 = vmatpush1.bf16.msra.mxu1 %v9878_v13  ;;  %v10476_v13 = vld [vmem:[#allocation15_spill] sm:$0xff] }
 0xda3   :  { %5732 = vmatprep.subr.bf16.mxu1 %v9884_v55  ;;  %5934 = vmatpush1.bf16.msra.mxu0 %v10016_v47  ;;  %v10477_v55 = vld [vmem:[#allocation22_spill] sm:$0xff] }
 0xda4   :  { %5935 = vmatprep.subr.bf16.mxu0 %v10028_v22  ;;  %v10489_v47 = vld [vmem:[#allocation14_spill] sm:$0xff] }
 0xda5   :  { %v10490_v22 = vld [vmem:[#allocation26_spill] sm:$0xff] }
 0xda6   :  { %5733 = vmatpush1.bf16.msra.mxu1 %v9890_v36  ;;  %v10478_v36 = vld [vmem:[#allocation5_spill] sm:$0xff] }
 0xda7   :  { %5734 = vmatprep.subr.bf16.mxu1 %v9896_v27  ;;  %5936 = vmatpush1.bf16.msra.mxu0 %v10035_v17  ;;  %v10479_v27 = vld [vmem:[#allocation21_spill] sm:$0xff] }
 0xda8   :  { %5937 = vmatprep.subr.bf16.mxu0 %v10054_v51  ;;  %v10491_v17 = vld [vmem:[#allocation25_spill] sm:$0xff]  ;;  %v6925_v51 = vld [vmem:[%s10272_s1 + $0x38] sm:$0xff]  }
 0xda9   :  { %v6900_v32 = vunpack.c.h.bf16 %v6925_v51 }
 0xdaa   :  { %5735 = vmatpush1.bf16.msra.mxu1 %v9902_v42  ;;  %v10480_v42 = vld [vmem:[#allocation20_spill] sm:$0xff] }
 0xdab   :  { %5736 = vmatprep.subr.bf16.mxu1 %v9908_v14  ;;  %5938 = vmatpush1.bf16.msra.mxu0 %v10064_v1  ;;  %v10481_v14 = vld [vmem:[#allocation24_spill] sm:$0xff]  ;;  %v6899_v1 = vunpack.c.l.bf16 %v6925_v51 }
 0xdac   :  { %5939 = vmatprep.subr.bf16.mxu0 %v10469_v33 }
 0xdae   :  { %5737 = vmatpush1.bf16.msra.mxu1 %v10470_v16 }
 0xdaf   :  { %5738 = vmatprep.subr.bf16.mxu1 %v10471_v48  ;;  %5940 = vmatpush1.bf16.msra.mxu0 %v10472_v62 }
 0xdb0   :  { %5941 = vmatprep.subr.bf16.mxu0 %v10473_v24 }
 0xdb2   :  { %5739 = vmatpush1.bf16.msra.mxu1 %v10474_v43 }
 0xdb3   :  { %5970 = vmatprep.subr.bf16.mxu1 %v10475_v7  ;;  %5942 = vmatpush1.bf16.msra.mxu0 %v10476_v13 }
 0xdb5   :  { %5757 = vmatmul.mubr.bf16.vlgmr.msra.gmra.mxu1 %v5316_v5 }
 0xdb6   :  { %5971 = vmatpush1.bf16.msra.mxu1 %v10477_v55  ;;  %6002 = vmatprep.mubr.bf16.mxu1 %v10351_v12  ;;  %v10488_v12 = vld [vmem:[#allocation11_spill] sm:$0xff] }
 0xdb7   :  { %5972 = vmatprep.subr.bf16.mxu1 %v10478_v36 }
 0xdba   :  { %5973 = vmatpush1.bf16.msra.mxu1 %v10479_v27 }
 0xdbb   :  { %5974 = vmatprep.subr.bf16.mxu1 %v10480_v42 }
 0xdbe   :  { %5975 = vmatpush1.bf16.msra.mxu1 %v10481_v14 }
 0xdbf   :  { %5976 = vmatprep.subr.bf16.mxu1 %v10482_v45 }
 0xdc2   :  { %5977 = vmatpush1.bf16.msra.mxu1 %v10483_v57 }
 0xdc3   :  { %5978 = vmatprep.subr.bf16.mxu1 %v10484_v38 }
 0xdc6   :  { %5979 = vmatpush1.bf16.msra.mxu1 %v10485_v34 }
 0xdc7   :  { %5980 = vmatprep.subr.bf16.mxu1 %v10486_v20 }
 0xdca   :  { %5981 = vmatpush1.bf16.msra.mxu1 %v10487_v4 }
 0xdcb   :  { %5982 = vmatprep.subr.bf16.mxu1 %v10488_v12 }
 0xdce   :  { %5983 = vmatpush1.bf16.msra.mxu1 %v10489_v47 }
 0xdcf   :  { %5984 = vmatprep.subr.bf16.mxu1 %v10490_v22 }
 0xdd2   :  { %5985 = vmatpush1.bf16.msra.mxu1 %v10491_v17 }
 0xe55   :  { %v5433_v15 = vpop.f32.mrf.mxu1  ;;  %v5715_v11 = vpop.f32.mrf.mxu0 }
 0xe56   :  { %v5434_v40 = vadd.f32 %v6899_v1, %v5433_v15 }
 0xe57   :  { %v7157_v3 = vpop.f32.mrf.mxu1  ;;  %v5717_v52 = vpop.f32.mrf.mxu0 }
 0xe58   :  { %v6710_v30 = vmul.f32 -1.442695, %v5434_v40 }
 0xe59   :  { %v5436_v0 = vpop.f32.mrf.mxu1  ;;  %v5719_v18 = vpop.f32.mrf.mxu0 }
 0xe5a   :  { %7891 = vpow2.f32 %v6710_v30  ;;  %v5437_v60 = vadd.f32 %v6900_v32, %v5436_v0 }
 0xe5b   :  { %v7158_v9 = vpop.f32.mrf.mxu1  ;;  %v5721_v50 = vpop.f32.mrf.mxu0 }
 0xe5c   :  { %v6711_v29 = vmul.f32 -1.442695, %v5437_v60 }
 0xe5e   :  { %7893 = vpow2.f32 %v6711_v29 }
 0xe67   :  { %v7892_v61 = vpop.eup %7891 }
 0xe68   :  { %v5446_v25 = vadd.f32 1.0, %v7892_v61 }
 0xe6a   :  { %7895 = vrcp.f32 %v5446_v25 }
 0xe6b   :  { %v7894_v26 = vpop.eup %7893 }
 0xe6c   :  { %v5447_v44 = vadd.f32 1.0, %v7894_v26 }
 0xe6e   :  { %7897 = vrcp.f32 %v5447_v44 }
 0xe75   :  { %v5758_v58 = vpop.f32.mrf.mxu1 }
 0xe77   :  { %v7896_v37 = vpop.eup %7895  ;;  %v5760_v2 = vpop.f32.mrf.mxu1 }
 0xe78   :  { %v5454_v56 = vmul.f32 %v7896_v37, %v6895_v39 }
 0xe79   :  { %v5762_v63 = vpop.f32.mrf.mxu1 }
 0xe7b   :  { %v7898_v6 = vpop.eup %7897  ;;  %v5764_v8 = vpop.f32.mrf.mxu1 }
 0xe7c   :  { %v5455_v54 = vmul.f32 %v7898_v6, %v6896_v59 }
 0xe7e   :  { %v5456_v53 = vpack.c.bf16 %v5455_v54, %v5454_v56 }
 0xe80   :  { %5960 = vmatmul.mubr.bf16.vlgmr.msra.gmra.mxu0 %v5456_v53  ;;  %6003 = vmatmul.mubr.bf16.vlgmr.msra.gmra.mxu1 %v5456_v53 }
 0xf40   :  { %v5961_v10 = vpop.f32.mrf.mxu0  ;;  %v6004_v35 = vpop.f32.mrf.mxu1 }
 0xf41   :  { %v5962_v41 = vadd.f32 %v5961_v10, %v5715_v11  ;;  %v6005_v20 = vadd.f32 %v6004_v35, %v5758_v58 }
 0xf42   :  { %v5963_v5 = vpop.f32.mrf.mxu0  ;;  %v6006_v48 = vpop.f32.mrf.mxu1 }
 0xf43   :  { %v6013_v33 = vadd.f32 %v5962_v41, %v8432_v23  ;;  %v5964_v16 = vadd.f32 %v5963_v5, %v5717_v52  ;;  %v6007_v34 = vadd.f32 %v6006_v48, %v5760_v2  ;;  %v6015_v47 = vadd.f32 %v6005_v20, %v8442_v21 }
 0xf44   :  { %v5965_v62 = vpop.f32.mrf.mxu0  ;;  %v6008_v36 = vpop.f32.mrf.mxu1 }
 0xf45   :  { %v6776_v24 = vmul.f32 -1.442695, %v6013_v33  ;;  %v6014_v43 = vadd.f32 %v5964_v16, %v8434_v28  ;;  %v5966_v7 = vadd.f32 %v5965_v62, %v5719_v18  ;;  %v6016_v12 = vadd.f32 %v6007_v34, %v8440_v19 }
 0xf46   :  { %v5967_v13 = vpop.f32.mrf.mxu0  ;;  %v6010_v38 = vpop.f32.mrf.mxu1  ;;  %v6009_v17 = vadd.f32 %v6008_v36, %v5762_v63 }
 0xf47   :  { %7899 = vpow2.f32 %v6776_v24  ;;  %v6778_v55 = vmul.f32 -1.442695, %v6014_v43  ;;  %v5968_v27 = vadd.f32 %v5967_v13, %v5721_v50  ;;  %v6017_v42 = vadd.f32 %v5966_v7, %v8432_v23 }
 0xf48   :  { %v6011_v4 = vadd.f32 %v6010_v38, %v5764_v8  ;;  %v6780_v23 = vmul.f32 -1.442695, %v6016_v12  ;;  %v6019_v32 = vadd.f32 %v6009_v17, %v8442_v21 }
 0xf49   :  { %7901 = vpow2.f32 %v6778_v55  ;;  %v6018_v14 = vadd.f32 %v5968_v27, %v8434_v28  ;;  %v6777_v45 = vmul.f32 -1.442695, %v6017_v42 }
 0xf4a   :  { %v6020_v22 = vadd.f32 %v6011_v4, %v8440_v19 }
 0xf4b   :  { %v6779_v57 = vmul.f32 -1.442695, %v6018_v14  ;;  %7903 = vpow2.f32 %v6777_v45 }
 0xf4c   :  { %v6781_v28 = vmul.f32 -1.442695, %v6020_v22 }
 0xf4d   :  { %7905 = vpow2.f32 %v6779_v57 }
 0xf4e   :  { %7907 = vtanh.f32 %v6015_v47 }
 0xf54   :  { %v7900_v51 = vpop.eup %7899 }
 0xf55   :  { %v6027_v1 = vadd.f32 1.0, %v7900_v51 }
 0xf56   :  { %v7902_v15 = vpop.eup %7901 }
 0xf57   :  { %7909 = vrcp.f32 %v6027_v1  ;;  %v6039_v40 = vadd.f32 1.0, %v7902_v15 }
 0xf58   :  { %7911 = vpow2.f32 %v6780_v23  ;;  %v7904_v3 = vpop.eup %7903 }
 0xf59   :  { %7913 = vrcp.f32 %v6039_v40  ;;  %v6028_v0 = vadd.f32 1.0, %v7904_v3 }
 0xf5a   :  { %v7906_v30 = vpop.eup %7905  ;;  %7915 = vpow2.f32 %v6781_v28 }
 0xf5b   :  { %7917 = vtanh.f32 %v6019_v32  ;;  %v6040_v60 = vadd.f32 1.0, %v7906_v30  ;;  %v7908_v19 = vpop.eup %7907 }
 0xf5c   :  { %7919 = vrcp.f32 %v6028_v0 }
 0xf5d   :  { %7921 = vrcp.f32 %v6040_v60 }
 0xf64   :  { %v7910_v9 = vpop.eup %7909 }
 0xf65   :  { %v7912_v29 = vpop.eup %7911  ;;  %v6061_v26 = vmul.f32 %v7910_v9, %v7908_v19 }
 0xf66   :  { %v7914_v61 = vpop.eup %7913  ;;  %v6053_v21 = vadd.f32 1.0, %v7912_v29 }
 0xf67   :  { %v7916_v25 = vpop.eup %7915  ;;  %v6059_v44 = vmul.f32 %v7914_v61, %v10191_v31 }
 0xf68   :  { %v7918_v46 = vpop.eup %7917  ;;  %v6054_v6 = vadd.f32 1.0, %v7916_v25  ;;  %7923 = vrcp.f32 %v6053_v21 }
 0xf69   :  { %v7920_v39 = vpop.eup %7919  ;;  %v6063_v59 = vadd.f32 %v6061_v26, %v6059_v44 }
 0xf6a   :  { %v7922_v37 = vpop.eup %7921  ;;  %v6062_v56 = vmul.f32 %v7920_v39, %v7918_v46 }
 0xf6b   :  { %v6060_v54 = vmul.f32 %v7922_v37, %v10194_v49  ;;  %7925 = vtanh.f32 %v6063_v59 }
 0xf6c   :  { %7927 = vrcp.f32 %v6054_v6 }
 0xf6d   :  { %v6064_v53 = vadd.f32 %v6062_v56, %v6060_v54 }
 0xf6f   :  { %7929 = vtanh.f32 %v6064_v53 }
 0xf75   :  { %v7924_v11 = vpop.eup %7923 }
 0xf78   :  { %v7926_v58 = vpop.eup %7925 }
 0xf79   :  { %v7928_v52 = vpop.eup %7927  ;;  %v6067_v18 = vmul.f32 %v7926_v58, %v7924_v11 }
 0xf7c   :  { %v7930_v2 = vpop.eup %7929 }
 0xf7d   :  { %v6068_v31 = vmul.f32 %v7930_v2, %v7928_v52 }
 0xf7f   :  { %v6904_v63 = vpack.c.bf16 %v6068_v31, %v6067_v18 }
 0xf81   :  { %6926 = vst [vmem:[%s10275_s6 + $0x38] sm:$0xff] %v6904_v63  }

</bundles_post_ra>
